<compile_context>
chip_gen: v7x
topology: tpu7x:2x2x1
jax: 0.10.0
libtpu: 0.0.40
codegen_flags: <defaults>
</compile_context>

<pallas_src>
import functools

import jax
import jax.numpy as jnp
from jax.experimental import pallas as pl
from jax.experimental.pallas import tpu as pltpu

BN_EPS = 1e-5
MATMUL_DTYPE = jnp.bfloat16   # MXU inputs (f32 accumulate); elementwise math stays f32


# ----------------------------------------------------------------------------
# Kernel A: bandAttention gate  (B, C, H*W) -> (B, C)
# ----------------------------------------------------------------------------
def band_mask_kernel(x_ref, w1_ref, b1_ref, w2_ref, b2_ref, out_ref):
    x = x_ref[...]                                   # (B, C, HW)
    avg = jnp.mean(x, axis=-1)                       # (B, C)
    mx = jnp.max(x, axis=-1)                         # (B, C)

    def mlp(v):
        h = jnp.tanh(jnp.dot(v, w1_ref[...], preferred_element_type=jnp.float32) + b1_ref[...])
        return jnp.tanh(jnp.dot(h, w2_ref[...], preferred_element_type=jnp.float32) + b2_ref[...])

    out_ref[...] = jax.nn.sigmoid(mlp(avg) + mlp(mx))


# ----------------------------------------------------------------------------
# Kernel M: fused channelAttention + conv stack + AvgPool(H)
# ----------------------------------------------------------------------------
def _shift_lane(a, s):
    """out[:, q] = a[:, q + s] with zero fill (static shift along the lane axis)."""
    n = a.shape[-1]
    if s == 0:
        return a
    if s > 0:
        return jnp.concatenate([a[:, s:], jnp.zeros((a.shape[0], s), a.dtype)], axis=1)
    return jnp.concatenate([jnp.zeros((a.shape[0], -s), a.dtype), a[:, : n + s]], axis=1)


def mega_kernel(x_ref, band_ref, tmask_ref, mapw_ref, mk_ref,
                cvw_ref, cvb_ref, cvs_ref, out_ref,
                *, C, H, I0, I1, Cout, mk_bn_scale):
    P = I0 * I1

    # ---- band gate + mapImage matmul (Conv3d(1,P,(W,1,1)) == matmul over W) ----
    xs = x_ref[0] * band_ref[0]                      # (H*C, W) * (H*C, 1)
    y = jnp.dot(xs.astype(MATMUL_DTYPE), mapw_ref[...],
                preferred_element_type=jnp.float32)  # (H*C, P), rows ordered (h, c)

    tm = tmask_ref[...]                              # (9, P) validity masks for 3x3 'same'
    taps = [(di, dj) for di in range(3) for dj in range(3)]

    # ---- channel avg/max pooling over C (per h block of C contiguous rows) ----
    fa_rows, fm_rows = [], []
    for h in range(H):
        yh = y[h * C:(h + 1) * C, :]                 # (C, P)
        fa_rows.append(jnp.mean(yh, axis=0, keepdims=True))
        fm_rows.append(jnp.max(yh, axis=0, keepdims=True))
    fa = jnp.concatenate(fa_rows, axis=0)            # (H, P)
    fm = jnp.concatenate(fm_rows, axis=0)            # (H, P)

    # ---- attention conv Conv3d(2,1,(1,3,3),'same') on the VPU: 18 shifted MACs ----
    z = jnp.zeros((H, P), jnp.float32) + mk_ref[0, 18]          # bias
    for ci, f in enumerate((fa, fm)):
        for t, (di, dj) in enumerate(taps):
            s = (di - 1) * I1 + (dj - 1)
            z = z + mk_ref[0, ci * 9 + t] * (_shift_lane(f, s) * tm[t:t + 1, :])
    z = jnp.where(z > 0.0, z, jnp.exp(jnp.minimum(z, 0.0)) - 1.0)  # ELU
    z = z * mk_bn_scale                                             # eval-mode BN(1)
    att = jax.nn.sigmoid(jnp.mean(z, axis=0, keepdims=True))        # (1, P): AvgPool(H)+sigmoid

    ym = y * att                                     # (H*C, P), spatial mask applied in VMEM

    # ---- Conv3d(C->Cout,(1,3,3),'same') + ReLU + BN, AvgPool(H) fused into acc ----
    # 9 shifted/masked copies of ym live entirely in VMEM (no HBM im2col).
    shifted = [_shift_lane(ym, (di - 1) * I1 + (dj - 1)) * tm[t:t + 1, :]
               for t, (di, dj) in enumerate(taps)]   # 9 x (H*C, P)
    acc = jnp.zeros((Cout, P), jnp.float32)
    for h in range(H):
        cols = jnp.concatenate([sh[h * C:(h + 1) * C, :] for sh in shifted], axis=0)  # (9C, P)
        oh = jnp.dot(cvw_ref[...], cols.astype(MATMUL_DTYPE),
                     preferred_element_type=jnp.float32)            # (Cout, P)
        acc = acc + jnp.maximum(oh + cvb_ref[...], 0.0)
    # BN scale (after ReLU) commutes with the mean over H -> apply once.
    out_ref[0] = acc * (cvs_ref[...] * (1.0 / H))


# ----------------------------------------------------------------------------
# Kernel F: both FC layers fused (Linear -> Dropout -> Linear -> Dropout, eval)
# ----------------------------------------------------------------------------
def fc_kernel(x_ref, w1_ref, b1_ref, w2_ref, b2_ref, out_ref):
    h = jnp.dot(x_ref[...], w1_ref[...], preferred_element_type=jnp.float32) + b1_ref[...]
    out_ref[...] = jnp.dot(h, w2_ref[...], preferred_element_type=jnp.float32) + b2_ref[...]


# ----------------------------------------------------------------------------
# pallas_call helper for the two small whole-array kernels (grid=(1,))
# ----------------------------------------------------------------------------
def _pcall(kernel, out_shape, *args):
    in_specs = [pl.BlockSpec(a.shape, (lambda n: (lambda i: (0,) * n))(a.ndim)) for a in args]
    return pl.pallas_call(
        kernel,
        grid=(1,),
        in_specs=in_specs,
        out_specs=pl.BlockSpec(out_shape, (lambda n: (lambda i: (0,) * n))(len(out_shape))),
        out_shape=jax.ShapeDtypeStruct(out_shape, jnp.float32),
        compiler_params=pltpu.CompilerParams(dimension_semantics=("arbitrary",)),
    )(*args)


def _make_tap_masks(I0, I1):
    """(9, P) validity masks for the 9 taps of a 3x3 'same' conv on an I0 x I1 grid."""
    P = I0 * I1
    q = jnp.arange(P)
    i, j = q // I1, q % I1
    rows = []
    for di in range(3):
        for dj in range(3):
            oi, oj = di - 1, dj - 1
            valid = (i + oi >= 0) & (i + oi < I0) & (j + oj >= 0) & (j + oj < I1)
            rows.append(valid.astype(jnp.float32))
    return jnp.stack(rows, axis=0)


# ----------------------------------------------------------------------------
# deepNetwork forward
# ----------------------------------------------------------------------------
def deep_network_forward(x, p, image_size, num_conv_filter, fc_dims):
    B, C, H, W = x.shape
    I0, I1 = image_size
    P = I0 * I1
    Cout = num_conv_filter
    HC = H * C

    # 1) bandAttention gate (tiny kernel, whole-array block).
    x3 = x.reshape(B, C, H * W)
    band = _pcall(band_mask_kernel, (B, C),
                  x3, p["ba_w1"], p["ba_b1"], p["ba_w2"], p["ba_b2"])
    # repeat the per-channel gate into the h-major (h, c) row order of the fused kernel
    band_rep = jnp.tile(band, (1, H)).reshape(B, HC, 1)

    # 2+3+4a) fused channelAttention + conv stack + AvgPool over H.
    x_t = x.transpose(0, 2, 1, 3).reshape(B, HC, W)     # rows ordered (h, c)
    tap_masks = _make_tap_masks(I0, I1)
    kern = functools.partial(mega_kernel, C=C, H=H, I0=I0, I1=I1, Cout=Cout,
                             mk_bn_scale=float(1.0 / (1.0 + BN_EPS) ** 0.5))
    pooled = pl.pallas_call(
        kern,
        grid=(B,),
        in_specs=[
            pl.BlockSpec((1, HC, W), lambda b: (b, 0, 0)),      # x (per-batch tile)
            pl.BlockSpec((1, HC, 1), lambda b: (b, 0, 0)),      # band gate (repeated)
            pl.BlockSpec((9, P), lambda b: (0, 0)),             # 3x3 tap validity masks
            pl.BlockSpec((W, P), lambda b: (0, 0)),             # mapImage weight (BN folded, bf16)
            pl.BlockSpec((1, 19), lambda b: (0, 0)),            # attention-conv weights + bias
            pl.BlockSpec((Cout, 9 * C), lambda b: (0, 0)),      # conv weight (bf16)
            pl.BlockSpec((Cout, 1), lambda b: (0, 0)),          # conv bias
            pl.BlockSpec((Cout, 1), lambda b: (0, 0)),          # conv BN scale
        ],
        out_specs=pl.BlockSpec((1, Cout, P), lambda b: (b, 0, 0)),
        out_shape=jax.ShapeDtypeStruct((B, Cout, P), jnp.float32),
        compiler_params=pltpu.CompilerParams(
            dimension_semantics=("parallel",),                  # shards across TCs on v7x
            vmem_limit_bytes=32 * 1024 * 1024),
    )(x_t, band_rep, tap_masks, p["map_w"], p["mk_wb"],
      p["cv_w"], p["cv_b"], p["cv_scale"])

    # 4b) Flatten (matches torch Flatten order: co-major) + fused FC stack.
    flat = pooled.reshape(B, Cout * P)
    out = _pcall(fc_kernel, (B, fc_dims[1]),
                 flat, p["fc1_w"], p["fc1_b"], p["fc2_w"], p["fc2_b"])
    return out


# ----------------------------------------------------------------------------
# Deterministic parameter init (shapes follow the PyTorch __init__)
# ----------------------------------------------------------------------------
def init_params(key, C, W, image_size, num_conv_filter, fc_dims):
    I0, I1 = image_size
    P = I0 * I1
    Cout = num_conv_filter
    ks = jax.random.split(key, 13)

    def rnd(k, shape, scale=0.1):
        return (scale * jax.random.normal(k, shape)).astype(jnp.float32)

    bn_scale = float(1.0 / (1.0 + BN_EPS) ** 0.5)   # eval-mode BN with fresh running stats
    p = {}
    # bandAttention fcnet: Linear(C, C//1) -> Tanh -> Dropout -> Linear(C, C) -> Tanh -> Dropout
    p["ba_w1"] = rnd(ks[0], (C, C));  p["ba_b1"] = rnd(ks[1], (1, C))
    p["ba_w2"] = rnd(ks[2], (C, C));  p["ba_b2"] = rnd(ks[3], (1, C))
    # mapImage: Conv3d(1, P, (W,1,1), bias=False) + BatchNorm3d(P)  (BN folded into weight)
    p["map_w"] = (rnd(ks[4], (W, P)) * bn_scale).astype(MATMUL_DTYPE)
    # channelAttention conv: Conv3d(2, 1, (1,3,3)) -- 18 scalar weights + bias
    mk = rnd(ks[5], (2, 3, 3))                     # [in_channel(avg,max), kh, kw]
    mk_b = rnd(ks[6], (1,))
    p["mk_wb"] = jnp.concatenate([mk.reshape(-1), mk_b]).reshape(1, 19)
    # convnet[0]: Conv3d(C, Cout, (1,3,3), 'same') + ReLU + BatchNorm3d(Cout)
    cw = rnd(ks[7], (Cout, C, 3, 3))               # torch layout (out, in, kh, kw)
    p["cv_w"] = cw.transpose(0, 2, 3, 1).reshape(Cout, 9 * C).astype(MATMUL_DTYPE)
    p["cv_b"] = rnd(ks[8], (Cout, 1))
    p["cv_scale"] = jnp.full((Cout, 1), bn_scale, jnp.float32)
    # FC layers (Linear + Dropout only, no BN)
    d_in = Cout * P
    p["fc1_w"] = rnd(ks[9], (d_in, fc_dims[0]));   p["fc1_b"] = rnd(ks[10], (1, fc_dims[0]))
    p["fc2_w"] = rnd(ks[11], (fc_dims[0], fc_dims[1])); p["fc2_b"] = rnd(ks[12], (1, fc_dims[1]))
    return p


if __name__ == "__main__":
    # x: (B, C, H, W) NCHW, imageSize=(8, 8), imageKernelSize=(1, 3, 3),
    # numConvFilter=[16], numFCNeurons=[32, 10]
    B, C, H, W = 2, 8, 8, 16
    image_size = (8, 8)
    num_conv_filter = 16
    fc_dims = (32, 10)

    key = jax.random.PRNGKey(0)
    kx, kp = jax.random.split(key)
    x = jax.random.normal(kx, (B, C, H, W), dtype=jnp.float32)
    params = init_params(kp, C, W, image_size, num_conv_filter, fc_dims)

    fwd = jax.jit(functools.partial(deep_network_forward,
                                    image_size=image_size,
                                    num_conv_filter=num_conv_filter,
                                    fc_dims=fc_dims))
    out = jax.block_until_ready(fwd(x, params))
    assert out.shape == (B, fc_dims[-1]), out.shape
    assert bool(jnp.all(jnp.isfinite(out)))
    print("KERNEL_OK")
</pallas_src>

<mosaic_0001>
module attributes {stable_mosaic.version = 11 : i64} {
  func.func @band_mask_kernel(%arg0: i32, %arg1: memref<2x8x128xf32, #tpu.memory_space<vmem>>, %arg2: memref<8x8xf32, #tpu.memory_space<vmem>>, %arg3: memref<1x8xf32, #tpu.memory_space<vmem>>, %arg4: memref<8x8xf32, #tpu.memory_space<vmem>>, %arg5: memref<1x8xf32, #tpu.memory_space<vmem>>, %arg6: memref<2x8xf32, #tpu.memory_space<vmem>>) attributes {dimension_semantics = [#tpu.dimension_semantics<arbitrary>], iteration_bounds = array<i64: 1>, scalar_prefetch = 0 : i64, scratch_operands = 0 : i64, tpu.core_type = #tpu.core_type<tc>, window_params = [{pipeline_mode = #tpu.pipeline_mode<synchronous>, transform_indices = @transform_0, window_bounds = array<i64: 2, 8, 128>}, {pipeline_mode = #tpu.pipeline_mode<synchronous>, transform_indices = @transform_1, window_bounds = array<i64: 8, 8>}, {pipeline_mode = #tpu.pipeline_mode<synchronous>, transform_indices = @transform_2, window_bounds = array<i64: 1, 8>}, {pipeline_mode = #tpu.pipeline_mode<synchronous>, transform_indices = @transform_3, window_bounds = array<i64: 8, 8>}, {pipeline_mode = #tpu.pipeline_mode<synchronous>, transform_indices = @transform_4, window_bounds = array<i64: 1, 8>}, {pipeline_mode = #tpu.pipeline_mode<synchronous>, transform_indices = @transform_5, window_bounds = array<i64: 2, 8>}]} {
    %c0 = arith.constant 0 : index
    %c0_0 = arith.constant 0 : index
    %c0_1 = arith.constant 0 : index
    %0 = vector.load %arg1[%c0, %c0_0, %c0_1] : memref<2x8x128xf32, #tpu.memory_space<vmem>>, vector<2x8x128xf32>
    %cst = arith.constant dense<0.000000e+00> : vector<2x8xf32>
    %1 = vector.multi_reduction <add>, %0, %cst [2] : vector<2x8x128xf32> to vector<2x8xf32>
    %cst_2 = arith.constant 1.280000e+02 : f32
    %2 = vector.broadcast %cst_2 : f32 to vector<2x8xf32>
    %3 = arith.divf %1, %2 : vector<2x8xf32>
    %cst_3 = arith.constant dense<0xFF800000> : vector<2x8xf32>
    %4 = vector.multi_reduction <maximumf>, %0, %cst_3 [2] : vector<2x8x128xf32> to vector<2x8xf32>
    %c0_4 = arith.constant 0 : index
    %c0_5 = arith.constant 0 : index
    %5 = vector.load %arg2[%c0_4, %c0_5] : memref<8x8xf32, #tpu.memory_space<vmem>>, vector<8x8xf32>
    %cst_6 = arith.constant dense<0.000000e+00> : vector<2x8xf32>
    %6 = tpu.matmul %3, %5, %cst_6 {dimension_numbers = #tpu.dot_dimension_numbers<[1], [0], [0], [1], [0, 0, 1, 1], [], []>} : vector<2x8xf32>, vector<8x8xf32>, vector<2x8xf32> -> vector<2x8xf32>
    %c0_7 = arith.constant 0 : index
    %c0_8 = arith.constant 0 : index
    %7 = vector.load %arg3[%c0_7, %c0_8] : memref<1x8xf32, #tpu.memory_space<vmem>>, vector<1x8xf32>
    %8 = vector.broadcast %7 : vector<1x8xf32> to vector<2x8xf32>
    %9 = arith.addf %6, %8 : vector<2x8xf32>
    %10 = math.tanh %9 : vector<2x8xf32>
    %c0_9 = arith.constant 0 : index
    %c0_10 = arith.constant 0 : index
    %11 = vector.load %arg4[%c0_9, %c0_10] : memref<8x8xf32, #tpu.memory_space<vmem>>, vector<8x8xf32>
    %cst_11 = arith.constant dense<0.000000e+00> : vector<2x8xf32>
    %12 = tpu.matmul %10, %11, %cst_11 {dimension_numbers = #tpu.dot_dimension_numbers<[1], [0], [0], [1], [0, 0, 1, 1], [], []>} : vector<2x8xf32>, vector<8x8xf32>, vector<2x8xf32> -> vector<2x8xf32>
    %c0_12 = arith.constant 0 : index
    %c0_13 = arith.constant 0 : index
    %13 = vector.load %arg5[%c0_12, %c0_13] : memref<1x8xf32, #tpu.memory_space<vmem>>, vector<1x8xf32>
    %14 = vector.broadcast %13 : vector<1x8xf32> to vector<2x8xf32>
    %15 = arith.addf %12, %14 : vector<2x8xf32>
    %16 = math.tanh %15 : vector<2x8xf32>
    %c0_14 = arith.constant 0 : index
    %c0_15 = arith.constant 0 : index
    %17 = vector.load %arg2[%c0_14, %c0_15] : memref<8x8xf32, #tpu.memory_space<vmem>>, vector<8x8xf32>
    %cst_16 = arith.constant dense<0.000000e+00> : vector<2x8xf32>
    %18 = tpu.matmul %4, %17, %cst_16 {dimension_numbers = #tpu.dot_dimension_numbers<[1], [0], [0], [1], [0, 0, 1, 1], [], []>} : vector<2x8xf32>, vector<8x8xf32>, vector<2x8xf32> -> vector<2x8xf32>
    %c0_17 = arith.constant 0 : index
    %c0_18 = arith.constant 0 : index
    %19 = vector.load %arg3[%c0_17, %c0_18] : memref<1x8xf32, #tpu.memory_space<vmem>>, vector<1x8xf32>
    %20 = vector.broadcast %19 : vector<1x8xf32> to vector<2x8xf32>
    %21 = arith.addf %18, %20 : vector<2x8xf32>
    %22 = math.tanh %21 : vector<2x8xf32>
    %c0_19 = arith.constant 0 : index
    %c0_20 = arith.constant 0 : index
    %23 = vector.load %arg4[%c0_19, %c0_20] : memref<8x8xf32, #tpu.memory_space<vmem>>, vector<8x8xf32>
    %cst_21 = arith.constant dense<0.000000e+00> : vector<2x8xf32>
    %24 = tpu.matmul %22, %23, %cst_21 {dimension_numbers = #tpu.dot_dimension_numbers<[1], [0], [0], [1], [0, 0, 1, 1], [], []>} : vector<2x8xf32>, vector<8x8xf32>, vector<2x8xf32> -> vector<2x8xf32>
    %c0_22 = arith.constant 0 : index
    %c0_23 = arith.constant 0 : index
    %25 = vector.load %arg5[%c0_22, %c0_23] : memref<1x8xf32, #tpu.memory_space<vmem>>, vector<1x8xf32>
    %26 = vector.broadcast %25 : vector<1x8xf32> to vector<2x8xf32>
    %27 = arith.addf %24, %26 : vector<2x8xf32>
    %28 = math.tanh %27 : vector<2x8xf32>
    %29 = arith.addf %16, %28 : vector<2x8xf32>
    %30 = arith.negf %29 : vector<2x8xf32>
    %31 = math.exp %30 : vector<2x8xf32>
    %cst_24 = arith.constant 1.000000e+00 : f32
    %32 = vector.broadcast %cst_24 : f32 to vector<2x8xf32>
    %33 = arith.addf %32, %31 : vector<2x8xf32>
    %34 = arith.divf %32, %33 : vector<2x8xf32>
    %c0_25 = arith.constant 0 : index
    %c0_26 = arith.constant 0 : index
    %35 = vector.load %arg6[%c0_25, %c0_26] : memref<2x8xf32, #tpu.memory_space<vmem>>, vector<2x8xf32>
    tpu.vector_store %arg6[%c0_25, %c0_26], %34 {strides = array<i32>} : memref<2x8xf32, #tpu.memory_space<vmem>>, vector<2x8xf32>,
    return
  }
  func.func @transform_0(%arg0: i32) -> (i32, i32, i32) {
    %c0_i32 = arith.constant 0 : i32
    %c0_i32_0 = arith.constant 0 : i32
    %c0_i32_1 = arith.constant 0 : i32
    %c0_i32_2 = arith.constant 0 : i32
    return %c0_i32, %c0_i32_0, %c0_i32_1 : i32, i32, i32
  }
  func.func @transform_1(%arg0: i32) -> (i32, i32) {
    %c0_i32 = arith.constant 0 : i32
    %c0_i32_0 = arith.constant 0 : i32
    %c0_i32_1 = arith.constant 0 : i32
    return %c0_i32, %c0_i32_0 : i32, i32
  }
  func.func @transform_2(%arg0: i32) -> (i32, i32) {
    %c0_i32 = arith.constant 0 : i32
    %c0_i32_0 = arith.constant 0 : i32
    %c0_i32_1 = arith.constant 0 : i32
    return %c0_i32, %c0_i32_0 : i32, i32
  }
  func.func @transform_3(%arg0: i32) -> (i32, i32) {
    %c0_i32 = arith.constant 0 : i32
    %c0_i32_0 = arith.constant 0 : i32
    %c0_i32_1 = arith.constant 0 : i32
    return %c0_i32, %c0_i32_0 : i32, i32
  }
  func.func @transform_4(%arg0: i32) -> (i32, i32) {
    %c0_i32 = arith.constant 0 : i32
    %c0_i32_0 = arith.constant 0 : i32
    %c0_i32_1 = arith.constant 0 : i32
    return %c0_i32, %c0_i32_0 : i32, i32
  }
  func.func @transform_5(%arg0: i32) -> (i32, i32) {
    %c0_i32 = arith.constant 0 : i32
    %c0_i32_0 = arith.constant 0 : i32
    %c0_i32_1 = arith.constant 0 : i32
    return %c0_i32, %c0_i32_0 : i32, i32
  }
}

module attributes {stable_mosaic.version = 11 : i64} {
  func.func @fc_kernel(%arg0: i32, %arg1: memref<2x1024xf32, #tpu.memory_space<vmem>>, %arg2: memref<1024x32xf32, #tpu.memory_space<vmem>>, %arg3: memref<1x32xf32, #tpu.memory_space<vmem>>, %arg4: memref<32x10xf32, #tpu.memory_space<vmem>>, %arg5: memref<1x10xf32, #tpu.memory_space<vmem>>, %arg6: memref<2x10xf32, #tpu.memory_space<vmem>>) attributes {dimension_semantics = [#tpu.dimension_semantics<arbitrary>], iteration_bounds = array<i64: 1>, scalar_prefetch = 0 : i64, scratch_operands = 0 : i64, tpu.core_type = #tpu.core_type<tc>, window_params = [{pipeline_mode = #tpu.pipeline_mode<synchronous>, transform_indices = @transform_0, window_bounds = array<i64: 2, 1024>}, {pipeline_mode = #tpu.pipeline_mode<synchronous>, transform_indices = @transform_1, window_bounds = array<i64: 1024, 32>}, {pipeline_mode = #tpu.pipeline_mode<synchronous>, transform_indices = @transform_2, window_bounds = array<i64: 1, 32>}, {pipeline_mode = #tpu.pipeline_mode<synchronous>, transform_indices = @transform_3, window_bounds = array<i64: 32, 10>}, {pipeline_mode = #tpu.pipeline_mode<synchronous>, transform_indices = @transform_4, window_bounds = array<i64: 1, 10>}, {pipeline_mode = #tpu.pipeline_mode<synchronous>, transform_indices = @transform_5, window_bounds = array<i64: 2, 10>}]} {
    %c0 = arith.constant 0 : index
    %c0_0 = arith.constant 0 : index
    %0 = vector.load %arg1[%c0, %c0_0] : memref<2x1024xf32, #tpu.memory_space<vmem>>, vector<2x1024xf32>
    %c0_1 = arith.constant 0 : index
    %c0_2 = arith.constant 0 : index
    %1 = vector.load %arg2[%c0_1, %c0_2] : memref<1024x32xf32, #tpu.memory_space<vmem>>, vector<1024x32xf32>
    %cst = arith.constant dense<0.000000e+00> : vector<2x32xf32>
    %2 = tpu.matmul %0, %1, %cst {dimension_numbers = #tpu.dot_dimension_numbers<[1], [0], [0], [1], [0, 0, 1, 1], [], []>} : vector<2x1024xf32>, vector<1024x32xf32>, vector<2x32xf32> -> vector<2x32xf32>
    %c0_3 = arith.constant 0 : index
    %c0_4 = arith.constant 0 : index
    %3 = vector.load %arg3[%c0_3, %c0_4] : memref<1x32xf32, #tpu.memory_space<vmem>>, vector<1x32xf32>
    %4 = vector.broadcast %3 : vector<1x32xf32> to vector<2x32xf32>
    %5 = arith.addf %2, %4 : vector<2x32xf32>
    %c0_5 = arith.constant 0 : index
    %c0_6 = arith.constant 0 : index
    %6 = vector.load %arg4[%c0_5, %c0_6] : memref<32x10xf32, #tpu.memory_space<vmem>>, vector<32x10xf32>
    %cst_7 = arith.constant dense<0.000000e+00> : vector<2x10xf32>
    %7 = tpu.matmul %5, %6, %cst_7 {dimension_numbers = #tpu.dot_dimension_numbers<[1], [0], [0], [1], [0, 0, 1, 1], [], []>} : vector<2x32xf32>, vector<32x10xf32>, vector<2x10xf32> -> vector<2x10xf32>
    %c0_8 = arith.constant 0 : index
    %c0_9 = arith.constant 0 : index
    %8 = vector.load %arg5[%c0_8, %c0_9] : memref<1x10xf32, #tpu.memory_space<vmem>>, vector<1x10xf32>
    %9 = vector.broadcast %8 : vector<1x10xf32> to vector<2x10xf32>
    %10 = arith.addf %7, %9 : vector<2x10xf32>
    %c0_10 = arith.constant 0 : index
    %c0_11 = arith.constant 0 : index
    %11 = vector.load %arg6[%c0_10, %c0_11] : memref<2x10xf32, #tpu.memory_space<vmem>>, vector<2x10xf32>
    tpu.vector_store %arg6[%c0_10, %c0_11], %10 {strides = array<i32>} : memref<2x10xf32, #tpu.memory_space<vmem>>, vector<2x10xf32>,
    return
  }
  func.func @transform_0(%arg0: i32) -> (i32, i32) {
    %c0_i32 = arith.constant 0 : i32
    %c0_i32_0 = arith.constant 0 : i32
    %c0_i32_1 = arith.constant 0 : i32
    return %c0_i32, %c0_i32_0 : i32, i32
  }
  func.func @transform_1(%arg0: i32) -> (i32, i32) {
    %c0_i32 = arith.constant 0 : i32
    %c0_i32_0 = arith.constant 0 : i32
    %c0_i32_1 = arith.constant 0 : i32
    return %c0_i32, %c0_i32_0 : i32, i32
  }
  func.func @transform_2(%arg0: i32) -> (i32, i32) {
    %c0_i32 = arith.constant 0 : i32
    %c0_i32_0 = arith.constant 0 : i32
    %c0_i32_1 = arith.constant 0 : i32
    return %c0_i32, %c0_i32_0 : i32, i32
  }
  func.func @transform_3(%arg0: i32) -> (i32, i32) {
    %c0_i32 = arith.constant 0 : i32
    %c0_i32_0 = arith.constant 0 : i32
    %c0_i32_1 = arith.constant 0 : i32
    return %c0_i32, %c0_i32_0 : i32, i32
  }
  func.func @transform_4(%arg0: i32) -> (i32, i32) {
    %c0_i32 = arith.constant 0 : i32
    %c0_i32_0 = arith.constant 0 : i32
    %c0_i32_1 = arith.constant 0 : i32
    return %c0_i32, %c0_i32_0 : i32, i32
  }
  func.func @transform_5(%arg0: i32) -> (i32, i32) {
    %c0_i32 = arith.constant 0 : i32
    %c0_i32_0 = arith.constant 0 : i32
    %c0_i32_1 = arith.constant 0 : i32
    return %c0_i32, %c0_i32_0 : i32, i32
  }
}

module attributes {stable_mosaic.version = 11 : i64} {
  func.func @mega_kernel(%arg0: i32, %arg1: memref<1x64x16xf32, #tpu.memory_space<vmem>>, %arg2: memref<1x64x1xf32, #tpu.memory_space<vmem>>, %arg3: memref<9x64xf32, #tpu.memory_space<vmem>>, %arg4: memref<16x64xbf16, #tpu.memory_space<vmem>>, %arg5: memref<1x19xf32, #tpu.memory_space<vmem>>, %arg6: memref<16x72xbf16, #tpu.memory_space<vmem>>, %arg7: memref<16x1xf32, #tpu.memory_space<vmem>>, %arg8: memref<16x1xf32, #tpu.memory_space<vmem>>, %arg9: memref<1x16x64xf32, #tpu.memory_space<vmem>>) attributes {dimension_semantics = [#tpu.dimension_semantics<parallel>], iteration_bounds = array<i64: 2>, scalar_prefetch = 0 : i64, scratch_operands = 0 : i64, tpu.core_type = #tpu.core_type<tc>, window_params = [{transform_indices = @transform_0, window_bounds = array<i64: 1, 64, 16>}, {transform_indices = @transform_1, window_bounds = array<i64: 1, 64, 1>}, {pipeline_mode = #tpu.pipeline_mode<synchronous>, transform_indices = @transform_2, window_bounds = array<i64: 9, 64>}, {pipeline_mode = #tpu.pipeline_mode<synchronous>, transform_indices = @transform_3, window_bounds = array<i64: 16, 64>}, {pipeline_mode = #tpu.pipeline_mode<synchronous>, transform_indices = @transform_4, window_bounds = array<i64: 1, 19>}, {pipeline_mode = #tpu.pipeline_mode<synchronous>, transform_indices = @transform_5, window_bounds = array<i64: 16, 72>}, {pipeline_mode = #tpu.pipeline_mode<synchronous>, transform_indices = @transform_6, window_bounds = array<i64: 16, 1>}, {pipeline_mode = #tpu.pipeline_mode<synchronous>, transform_indices = @transform_7, window_bounds = array<i64: 16, 1>}, {transform_indices = @transform_8, window_bounds = array<i64: 1, 16, 64>}]} {
    %c0 = arith.constant 0 : index
    %c0_0 = arith.constant 0 : index
    %c0_1 = arith.constant 0 : index
    %0 = vector.load %arg1[%c0, %c0_0, %c0_1] : memref<1x64x16xf32, #tpu.memory_space<vmem>>, vector<1x64x16xf32>
    %1 = vector.shape_cast %0 : vector<1x64x16xf32> to vector<64x16xf32>
    %c0_2 = arith.constant 0 : index
    %c0_3 = arith.constant 0 : index
    %c0_4 = arith.constant 0 : index
    %2 = vector.load %arg2[%c0_2, %c0_3, %c0_4] : memref<1x64x1xf32, #tpu.memory_space<vmem>>, vector<1x64x1xf32>
    %3 = vector.shape_cast %2 : vector<1x64x1xf32> to vector<64x1xf32>
    %4 = vector.broadcast %3 : vector<64x1xf32> to vector<64x16xf32>
    %5 = arith.mulf %1, %4 : vector<64x16xf32>
    %6 = arith.truncf %5 : vector<64x16xf32> to vector<64x16xbf16>
    %c0_5 = arith.constant 0 : index
    %c0_6 = arith.constant 0 : index
    %7 = vector.load %arg4[%c0_5, %c0_6] : memref<16x64xbf16, #tpu.memory_space<vmem>>, vector<16x64xbf16>
    %cst = arith.constant dense<0.000000e+00> : vector<64x64xf32>
    %8 = tpu.matmul %6, %7, %cst {dimension_numbers = #tpu.dot_dimension_numbers<[1], [0], [0], [1], [0, 0, 1, 1], [], []>} : vector<64x16xbf16>, vector<16x64xbf16>, vector<64x64xf32> -> vector<64x64xf32>
    %c0_7 = arith.constant 0 : index
    %c0_8 = arith.constant 0 : index
    %9 = vector.load %arg3[%c0_7, %c0_8] : memref<9x64xf32, #tpu.memory_space<vmem>>, vector<9x64xf32>
    %10 = vector.extract_strided_slice %8 {offsets = [0, 0], sizes = [8, 64], strides = [1, 1]} : vector<64x64xf32> to vector<8x64xf32>
    %cst_9 = arith.constant dense<0.000000e+00> : vector<64xf32>
    %11 = vector.multi_reduction <add>, %10, %cst_9 [0] : vector<8x64xf32> to vector<64xf32>
    %12 = vector.shape_cast %11 : vector<64xf32> to vector<1x64xf32>
    %cst_10 = arith.constant 8.000000e+00 : f32
    %13 = vector.broadcast %cst_10 : f32 to vector<1x64xf32>
    %14 = arith.divf %12, %13 : vector<1x64xf32>
    %cst_11 = arith.constant dense<0xFF800000> : vector<64xf32>
    %15 = vector.multi_reduction <maximumf>, %10, %cst_11 [0] : vector<8x64xf32> to vector<64xf32>
    %16 = vector.shape_cast %15 : vector<64xf32> to vector<1x64xf32>
    %17 = vector.extract_strided_slice %8 {offsets = [8, 0], sizes = [8, 64], strides = [1, 1]} : vector<64x64xf32> to vector<8x64xf32>
    %cst_12 = arith.constant dense<0.000000e+00> : vector<64xf32>
    %18 = vector.multi_reduction <add>, %17, %cst_12 [0] : vector<8x64xf32> to vector<64xf32>
    %19 = vector.shape_cast %18 : vector<64xf32> to vector<1x64xf32>
    %cst_13 = arith.constant 8.000000e+00 : f32
    %20 = vector.broadcast %cst_13 : f32 to vector<1x64xf32>
    %21 = arith.divf %19, %20 : vector<1x64xf32>
    %cst_14 = arith.constant dense<0xFF800000> : vector<64xf32>
    %22 = vector.multi_reduction <maximumf>, %17, %cst_14 [0] : vector<8x64xf32> to vector<64xf32>
    %23 = vector.shape_cast %22 : vector<64xf32> to vector<1x64xf32>
    %24 = vector.extract_strided_slice %8 {offsets = [16, 0], sizes = [8, 64], strides = [1, 1]} : vector<64x64xf32> to vector<8x64xf32>
    %cst_15 = arith.constant dense<0.000000e+00> : vector<64xf32>
    %25 = vector.multi_reduction <add>, %24, %cst_15 [0] : vector<8x64xf32> to vector<64xf32>
    %26 = vector.shape_cast %25 : vector<64xf32> to vector<1x64xf32>
    %cst_16 = arith.constant 8.000000e+00 : f32
    %27 = vector.broadcast %cst_16 : f32 to vector<1x64xf32>
    %28 = arith.divf %26, %27 : vector<1x64xf32>
    %cst_17 = arith.constant dense<0xFF800000> : vector<64xf32>
    %29 = vector.multi_reduction <maximumf>, %24, %cst_17 [0] : vector<8x64xf32> to vector<64xf32>
    %30 = vector.shape_cast %29 : vector<64xf32> to vector<1x64xf32>
    %31 = vector.extract_strided_slice %8 {offsets = [24, 0], sizes = [8, 64], strides = [1, 1]} : vector<64x64xf32> to vector<8x64xf32>
    %cst_18 = arith.constant dense<0.000000e+00> : vector<64xf32>
    %32 = vector.multi_reduction <add>, %31, %cst_18 [0] : vector<8x64xf32> to vector<64xf32>
    %33 = vector.shape_cast %32 : vector<64xf32> to vector<1x64xf32>
    %cst_19 = arith.constant 8.000000e+00 : f32
    %34 = vector.broadcast %cst_19 : f32 to vector<1x64xf32>
    %35 = arith.divf %33, %34 : vector<1x64xf32>
    %cst_20 = arith.constant dense<0xFF800000> : vector<64xf32>
    %36 = vector.multi_reduction <maximumf>, %31, %cst_20 [0] : vector<8x64xf32> to vector<64xf32>
    %37 = vector.shape_cast %36 : vector<64xf32> to vector<1x64xf32>
    %38 = vector.extract_strided_slice %8 {offsets = [32, 0], sizes = [8, 64], strides = [1, 1]} : vector<64x64xf32> to vector<8x64xf32>
    %cst_21 = arith.constant dense<0.000000e+00> : vector<64xf32>
    %39 = vector.multi_reduction <add>, %38, %cst_21 [0] : vector<8x64xf32> to vector<64xf32>
    %40 = vector.shape_cast %39 : vector<64xf32> to vector<1x64xf32>
    %cst_22 = arith.constant 8.000000e+00 : f32
    %41 = vector.broadcast %cst_22 : f32 to vector<1x64xf32>
    %42 = arith.divf %40, %41 : vector<1x64xf32>
    %cst_23 = arith.constant dense<0xFF800000> : vector<64xf32>
    %43 = vector.multi_reduction <maximumf>, %38, %cst_23 [0] : vector<8x64xf32> to vector<64xf32>
    %44 = vector.shape_cast %43 : vector<64xf32> to vector<1x64xf32>
    %45 = vector.extract_strided_slice %8 {offsets = [40, 0], sizes = [8, 64], strides = [1, 1]} : vector<64x64xf32> to vector<8x64xf32>
    %cst_24 = arith.constant dense<0.000000e+00> : vector<64xf32>
    %46 = vector.multi_reduction <add>, %45, %cst_24 [0] : vector<8x64xf32> to vector<64xf32>
    %47 = vector.shape_cast %46 : vector<64xf32> to vector<1x64xf32>
    %cst_25 = arith.constant 8.000000e+00 : f32
    %48 = vector.broadcast %cst_25 : f32 to vector<1x64xf32>
    %49 = arith.divf %47, %48 : vector<1x64xf32>
    %cst_26 = arith.constant dense<0xFF800000> : vector<64xf32>
    %50 = vector.multi_reduction <maximumf>, %45, %cst_26 [0] : vector<8x64xf32> to vector<64xf32>
    %51 = vector.shape_cast %50 : vector<64xf32> to vector<1x64xf32>
    %52 = vector.extract_strided_slice %8 {offsets = [48, 0], sizes = [8, 64], strides = [1, 1]} : vector<64x64xf32> to vector<8x64xf32>
    %cst_27 = arith.constant dense<0.000000e+00> : vector<64xf32>
    %53 = vector.multi_reduction <add>, %52, %cst_27 [0] : vector<8x64xf32> to vector<64xf32>
    %54 = vector.shape_cast %53 : vector<64xf32> to vector<1x64xf32>
    %cst_28 = arith.constant 8.000000e+00 : f32
    %55 = vector.broadcast %cst_28 : f32 to vector<1x64xf32>
    %56 = arith.divf %54, %55 : vector<1x64xf32>
    %cst_29 = arith.constant dense<0xFF800000> : vector<64xf32>
    %57 = vector.multi_reduction <maximumf>, %52, %cst_29 [0] : vector<8x64xf32> to vector<64xf32>
    %58 = vector.shape_cast %57 : vector<64xf32> to vector<1x64xf32>
    %59 = vector.extract_strided_slice %8 {offsets = [56, 0], sizes = [8, 64], strides = [1, 1]} : vector<64x64xf32> to vector<8x64xf32>
    %cst_30 = arith.constant dense<0.000000e+00> : vector<64xf32>
    %60 = vector.multi_reduction <add>, %59, %cst_30 [0] : vector<8x64xf32> to vector<64xf32>
    %61 = vector.shape_cast %60 : vector<64xf32> to vector<1x64xf32>
    %cst_31 = arith.constant 8.000000e+00 : f32
    %62 = vector.broadcast %cst_31 : f32 to vector<1x64xf32>
    %63 = arith.divf %61, %62 : vector<1x64xf32>
    %cst_32 = arith.constant dense<0xFF800000> : vector<64xf32>
    %64 = vector.multi_reduction <maximumf>, %59, %cst_32 [0] : vector<8x64xf32> to vector<64xf32>
    %65 = vector.shape_cast %64 : vector<64xf32> to vector<1x64xf32>
    %66 = tpu.concatenate %14, %21, %28, %35, %42, %49, %56, %63 in 0 : vector<1x64xf32>, vector<1x64xf32>, vector<1x64xf32>, vector<1x64xf32>, vector<1x64xf32>, vector<1x64xf32>, vector<1x64xf32>, vector<1x64xf32> -> vector<8x64xf32>
    %67 = tpu.concatenate %16, %23, %30, %37, %44, %51, %58, %65 in 0 : vector<1x64xf32>, vector<1x64xf32>, vector<1x64xf32>, vector<1x64xf32>, vector<1x64xf32>, vector<1x64xf32>, vector<1x64xf32>, vector<1x64xf32> -> vector<8x64xf32>
    %cst_33 = arith.constant 0.000000e+00 : f32
    %68 = vector.broadcast %cst_33 : f32 to vector<8x64xf32>
    %c0_34 = arith.constant 0 : index
    %c18 = arith.constant 18 : index
    %69 = vector.load %arg5[%c0_34, %c18] : memref<1x19xf32, #tpu.memory_space<vmem>>, vector<1x1xf32>
    %70 = vector.extract %69[0, 0] : f32 from vector<1x1xf32>
    %71 = vector.broadcast %70 : f32 to vector<8x64xf32>
    %72 = arith.addf %68, %71 : vector<8x64xf32>
    %c0_35 = arith.constant 0 : index
    %c0_36 = arith.constant 0 : index
    %73 = vector.load %arg5[%c0_35, %c0_36] : memref<1x19xf32, #tpu.memory_space<vmem>>, vector<1x1xf32>
    %74 = vector.extract %73[0, 0] : f32 from vector<1x1xf32>
    %cst_37 = arith.constant 0.000000e+00 : f32
    %75 = vector.broadcast %cst_37 : f32 to vector<8x9xf32>
    %76 = vector.extract_strided_slice %66 {offsets = [0, 0], sizes = [8, 55], strides = [1, 1]} : vector<8x64xf32> to vector<8x55xf32>
    %77 = tpu.concatenate %75, %76 in 1 : vector<8x9xf32>, vector<8x55xf32> -> vector<8x64xf32>
    %78 = vector.extract_strided_slice %9 {offsets = [0, 0], sizes = [1, 64], strides = [1, 1]} : vector<9x64xf32> to vector<1x64xf32>
    %79 = vector.broadcast %78 : vector<1x64xf32> to vector<8x64xf32>
    %80 = arith.mulf %77, %79 : vector<8x64xf32>
    %81 = vector.broadcast %74 : f32 to vector<8x64xf32>
    %82 = arith.mulf %81, %80 : vector<8x64xf32>
    %83 = arith.addf %72, %82 : vector<8x64xf32>
    %c0_38 = arith.constant 0 : index
    %c1 = arith.constant 1 : index
    %84 = vector.load %arg5[%c0_38, %c1] : memref<1x19xf32, #tpu.memory_space<vmem>>, vector<1x1xf32>
    %85 = vector.extract %84[0, 0] : f32 from vector<1x1xf32>
    %cst_39 = arith.constant 0.000000e+00 : f32
    %86 = vector.broadcast %cst_39 : f32 to vector<8x8xf32>
    %87 = vector.extract_strided_slice %66 {offsets = [0, 0], sizes = [8, 56], strides = [1, 1]} : vector<8x64xf32> to vector<8x56xf32>
    %88 = tpu.concatenate %86, %87 in 1 : vector<8x8xf32>, vector<8x56xf32> -> vector<8x64xf32>
    %89 = vector.extract_strided_slice %9 {offsets = [1, 0], sizes = [1, 64], strides = [1, 1]} : vector<9x64xf32> to vector<1x64xf32>
    %90 = vector.broadcast %89 : vector<1x64xf32> to vector<8x64xf32>
    %91 = arith.mulf %88, %90 : vector<8x64xf32>
    %92 = vector.broadcast %85 : f32 to vector<8x64xf32>
    %93 = arith.mulf %92, %91 : vector<8x64xf32>
    %94 = arith.addf %83, %93 : vector<8x64xf32>
    %c0_40 = arith.constant 0 : index
    %c2 = arith.constant 2 : index
    %95 = vector.load %arg5[%c0_40, %c2] : memref<1x19xf32, #tpu.memory_space<vmem>>, vector<1x1xf32>
    %96 = vector.extract %95[0, 0] : f32 from vector<1x1xf32>
    %cst_41 = arith.constant 0.000000e+00 : f32
    %97 = vector.broadcast %cst_41 : f32 to vector<8x7xf32>
    %98 = vector.extract_strided_slice %66 {offsets = [0, 0], sizes = [8, 57], strides = [1, 1]} : vector<8x64xf32> to vector<8x57xf32>
    %99 = tpu.concatenate %97, %98 in 1 : vector<8x7xf32>, vector<8x57xf32> -> vector<8x64xf32>
    %100 = vector.extract_strided_slice %9 {offsets = [2, 0], sizes = [1, 64], strides = [1, 1]} : vector<9x64xf32> to vector<1x64xf32>
    %101 = vector.broadcast %100 : vector<1x64xf32> to vector<8x64xf32>
    %102 = arith.mulf %99, %101 : vector<8x64xf32>
    %103 = vector.broadcast %96 : f32 to vector<8x64xf32>
    %104 = arith.mulf %103, %102 : vector<8x64xf32>
    %105 = arith.addf %94, %104 : vector<8x64xf32>
    %c0_42 = arith.constant 0 : index
    %c3 = arith.constant 3 : index
    %106 = vector.load %arg5[%c0_42, %c3] : memref<1x19xf32, #tpu.memory_space<vmem>>, vector<1x1xf32>
    %107 = vector.extract %106[0, 0] : f32 from vector<1x1xf32>
    %cst_43 = arith.constant 0.000000e+00 : f32
    %108 = vector.broadcast %cst_43 : f32 to vector<8x1xf32>
    %109 = vector.extract_strided_slice %66 {offsets = [0, 0], sizes = [8, 63], strides = [1, 1]} : vector<8x64xf32> to vector<8x63xf32>
    %110 = tpu.concatenate %108, %109 in 1 : vector<8x1xf32>, vector<8x63xf32> -> vector<8x64xf32>
    %111 = vector.extract_strided_slice %9 {offsets = [3, 0], sizes = [1, 64], strides = [1, 1]} : vector<9x64xf32> to vector<1x64xf32>
    %112 = vector.broadcast %111 : vector<1x64xf32> to vector<8x64xf32>
    %113 = arith.mulf %110, %112 : vector<8x64xf32>
    %114 = vector.broadcast %107 : f32 to vector<8x64xf32>
    %115 = arith.mulf %114, %113 : vector<8x64xf32>
    %116 = arith.addf %105, %115 : vector<8x64xf32>
    %c0_44 = arith.constant 0 : index
    %c4 = arith.constant 4 : index
    %117 = vector.load %arg5[%c0_44, %c4] : memref<1x19xf32, #tpu.memory_space<vmem>>, vector<1x1xf32>
    %118 = vector.extract %117[0, 0] : f32 from vector<1x1xf32>
    %119 = vector.extract_strided_slice %9 {offsets = [4, 0], sizes = [1, 64], strides = [1, 1]} : vector<9x64xf32> to vector<1x64xf32>
    %120 = vector.broadcast %119 : vector<1x64xf32> to vector<8x64xf32>
    %121 = arith.mulf %66, %120 : vector<8x64xf32>
    %122 = vector.broadcast %118 : f32 to vector<8x64xf32>
    %123 = arith.mulf %122, %121 : vector<8x64xf32>
    %124 = arith.addf %116, %123 : vector<8x64xf32>
    %c0_45 = arith.constant 0 : index
    %c5 = arith.constant 5 : index
    %125 = vector.load %arg5[%c0_45, %c5] : memref<1x19xf32, #tpu.memory_space<vmem>>, vector<1x1xf32>
    %126 = vector.extract %125[0, 0] : f32 from vector<1x1xf32>
    %127 = vector.extract_strided_slice %66 {offsets = [0, 1], sizes = [8, 63], strides = [1, 1]} : vector<8x64xf32> to vector<8x63xf32>
    %cst_46 = arith.constant 0.000000e+00 : f32
    %128 = vector.broadcast %cst_46 : f32 to vector<8x1xf32>
    %129 = tpu.concatenate %127, %128 in 1 : vector<8x63xf32>, vector<8x1xf32> -> vector<8x64xf32>
    %130 = vector.extract_strided_slice %9 {offsets = [5, 0], sizes = [1, 64], strides = [1, 1]} : vector<9x64xf32> to vector<1x64xf32>
    %131 = vector.broadcast %130 : vector<1x64xf32> to vector<8x64xf32>
    %132 = arith.mulf %129, %131 : vector<8x64xf32>
    %133 = vector.broadcast %126 : f32 to vector<8x64xf32>
    %134 = arith.mulf %133, %132 : vector<8x64xf32>
    %135 = arith.addf %124, %134 : vector<8x64xf32>
    %c0_47 = arith.constant 0 : index
    %c6 = arith.constant 6 : index
    %136 = vector.load %arg5[%c0_47, %c6] : memref<1x19xf32, #tpu.memory_space<vmem>>, vector<1x1xf32>
    %137 = vector.extract %136[0, 0] : f32 from vector<1x1xf32>
    %138 = vector.extract_strided_slice %66 {offsets = [0, 7], sizes = [8, 57], strides = [1, 1]} : vector<8x64xf32> to vector<8x57xf32>
    %cst_48 = arith.constant 0.000000e+00 : f32
    %139 = vector.broadcast %cst_48 : f32 to vector<8x7xf32>
    %140 = tpu.concatenate %138, %139 in 1 : vector<8x57xf32>, vector<8x7xf32> -> vector<8x64xf32>
    %141 = vector.extract_strided_slice %9 {offsets = [6, 0], sizes = [1, 64], strides = [1, 1]} : vector<9x64xf32> to vector<1x64xf32>
    %142 = vector.broadcast %141 : vector<1x64xf32> to vector<8x64xf32>
    %143 = arith.mulf %140, %142 : vector<8x64xf32>
    %144 = vector.broadcast %137 : f32 to vector<8x64xf32>
    %145 = arith.mulf %144, %143 : vector<8x64xf32>
    %146 = arith.addf %135, %145 : vector<8x64xf32>
    %c0_49 = arith.constant 0 : index
    %c7 = arith.constant 7 : index
    %147 = vector.load %arg5[%c0_49, %c7] : memref<1x19xf32, #tpu.memory_space<vmem>>, vector<1x1xf32>
    %148 = vector.extract %147[0, 0] : f32 from vector<1x1xf32>
    %149 = vector.extract_strided_slice %66 {offsets = [0, 8], sizes = [8, 56], strides = [1, 1]} : vector<8x64xf32> to vector<8x56xf32>
    %cst_50 = arith.constant 0.000000e+00 : f32
    %150 = vector.broadcast %cst_50 : f32 to vector<8x8xf32>
    %151 = tpu.concatenate %149, %150 in 1 : vector<8x56xf32>, vector<8x8xf32> -> vector<8x64xf32>
    %152 = vector.extract_strided_slice %9 {offsets = [7, 0], sizes = [1, 64], strides = [1, 1]} : vector<9x64xf32> to vector<1x64xf32>
    %153 = vector.broadcast %152 : vector<1x64xf32> to vector<8x64xf32>
    %154 = arith.mulf %151, %153 : vector<8x64xf32>
    %155 = vector.broadcast %148 : f32 to vector<8x64xf32>
    %156 = arith.mulf %155, %154 : vector<8x64xf32>
    %157 = arith.addf %146, %156 : vector<8x64xf32>
    %c0_51 = arith.constant 0 : index
    %c8 = arith.constant 8 : index
    %158 = vector.load %arg5[%c0_51, %c8] : memref<1x19xf32, #tpu.memory_space<vmem>>, vector<1x1xf32>
    %159 = vector.extract %158[0, 0] : f32 from vector<1x1xf32>
    %160 = vector.extract_strided_slice %66 {offsets = [0, 9], sizes = [8, 55], strides = [1, 1]} : vector<8x64xf32> to vector<8x55xf32>
    %cst_52 = arith.constant 0.000000e+00 : f32
    %161 = vector.broadcast %cst_52 : f32 to vector<8x9xf32>
    %162 = tpu.concatenate %160, %161 in 1 : vector<8x55xf32>, vector<8x9xf32> -> vector<8x64xf32>
    %163 = vector.extract_strided_slice %9 {offsets = [8, 0], sizes = [1, 64], strides = [1, 1]} : vector<9x64xf32> to vector<1x64xf32>
    %164 = vector.broadcast %163 : vector<1x64xf32> to vector<8x64xf32>
    %165 = arith.mulf %162, %164 : vector<8x64xf32>
    %166 = vector.broadcast %159 : f32 to vector<8x64xf32>
    %167 = arith.mulf %166, %165 : vector<8x64xf32>
    %168 = arith.addf %157, %167 : vector<8x64xf32>
    %c0_53 = arith.constant 0 : index
    %c9 = arith.constant 9 : index
    %169 = vector.load %arg5[%c0_53, %c9] : memref<1x19xf32, #tpu.memory_space<vmem>>, vector<1x1xf32>
    %170 = vector.extract %169[0, 0] : f32 from vector<1x1xf32>
    %cst_54 = arith.constant 0.000000e+00 : f32
    %171 = vector.broadcast %cst_54 : f32 to vector<8x9xf32>
    %172 = vector.extract_strided_slice %67 {offsets = [0, 0], sizes = [8, 55], strides = [1, 1]} : vector<8x64xf32> to vector<8x55xf32>
    %173 = tpu.concatenate %171, %172 in 1 : vector<8x9xf32>, vector<8x55xf32> -> vector<8x64xf32>
    %174 = vector.extract_strided_slice %9 {offsets = [0, 0], sizes = [1, 64], strides = [1, 1]} : vector<9x64xf32> to vector<1x64xf32>
    %175 = vector.broadcast %174 : vector<1x64xf32> to vector<8x64xf32>
    %176 = arith.mulf %173, %175 : vector<8x64xf32>
    %177 = vector.broadcast %170 : f32 to vector<8x64xf32>
    %178 = arith.mulf %177, %176 : vector<8x64xf32>
    %179 = arith.addf %168, %178 : vector<8x64xf32>
    %c0_55 = arith.constant 0 : index
    %c10 = arith.constant 10 : index
    %180 = vector.load %arg5[%c0_55, %c10] : memref<1x19xf32, #tpu.memory_space<vmem>>, vector<1x1xf32>
    %181 = vector.extract %180[0, 0] : f32 from vector<1x1xf32>
    %cst_56 = arith.constant 0.000000e+00 : f32
    %182 = vector.broadcast %cst_56 : f32 to vector<8x8xf32>
    %183 = vector.extract_strided_slice %67 {offsets = [0, 0], sizes = [8, 56], strides = [1, 1]} : vector<8x64xf32> to vector<8x56xf32>
    %184 = tpu.concatenate %182, %183 in 1 : vector<8x8xf32>, vector<8x56xf32> -> vector<8x64xf32>
    %185 = vector.extract_strided_slice %9 {offsets = [1, 0], sizes = [1, 64], strides = [1, 1]} : vector<9x64xf32> to vector<1x64xf32>
    %186 = vector.broadcast %185 : vector<1x64xf32> to vector<8x64xf32>
    %187 = arith.mulf %184, %186 : vector<8x64xf32>
    %188 = vector.broadcast %181 : f32 to vector<8x64xf32>
    %189 = arith.mulf %188, %187 : vector<8x64xf32>
    %190 = arith.addf %179, %189 : vector<8x64xf32>
    %c0_57 = arith.constant 0 : index
    %c11 = arith.constant 11 : index
    %191 = vector.load %arg5[%c0_57, %c11] : memref<1x19xf32, #tpu.memory_space<vmem>>, vector<1x1xf32>
    %192 = vector.extract %191[0, 0] : f32 from vector<1x1xf32>
    %cst_58 = arith.constant 0.000000e+00 : f32
    %193 = vector.broadcast %cst_58 : f32 to vector<8x7xf32>
    %194 = vector.extract_strided_slice %67 {offsets = [0, 0], sizes = [8, 57], strides = [1, 1]} : vector<8x64xf32> to vector<8x57xf32>
    %195 = tpu.concatenate %193, %194 in 1 : vector<8x7xf32>, vector<8x57xf32> -> vector<8x64xf32>
    %196 = vector.extract_strided_slice %9 {offsets = [2, 0], sizes = [1, 64], strides = [1, 1]} : vector<9x64xf32> to vector<1x64xf32>
    %197 = vector.broadcast %196 : vector<1x64xf32> to vector<8x64xf32>
    %198 = arith.mulf %195, %197 : vector<8x64xf32>
    %199 = vector.broadcast %192 : f32 to vector<8x64xf32>
    %200 = arith.mulf %199, %198 : vector<8x64xf32>
    %201 = arith.addf %190, %200 : vector<8x64xf32>
    %c0_59 = arith.constant 0 : index
    %c12 = arith.constant 12 : index
    %202 = vector.load %arg5[%c0_59, %c12] : memref<1x19xf32, #tpu.memory_space<vmem>>, vector<1x1xf32>
    %203 = vector.extract %202[0, 0] : f32 from vector<1x1xf32>
    %cst_60 = arith.constant 0.000000e+00 : f32
    %204 = vector.broadcast %cst_60 : f32 to vector<8x1xf32>
    %205 = vector.extract_strided_slice %67 {offsets = [0, 0], sizes = [8, 63], strides = [1, 1]} : vector<8x64xf32> to vector<8x63xf32>
    %206 = tpu.concatenate %204, %205 in 1 : vector<8x1xf32>, vector<8x63xf32> -> vector<8x64xf32>
    %207 = vector.extract_strided_slice %9 {offsets = [3, 0], sizes = [1, 64], strides = [1, 1]} : vector<9x64xf32> to vector<1x64xf32>
    %208 = vector.broadcast %207 : vector<1x64xf32> to vector<8x64xf32>
    %209 = arith.mulf %206, %208 : vector<8x64xf32>
    %210 = vector.broadcast %203 : f32 to vector<8x64xf32>
    %211 = arith.mulf %210, %209 : vector<8x64xf32>
    %212 = arith.addf %201, %211 : vector<8x64xf32>
    %c0_61 = arith.constant 0 : index
    %c13 = arith.constant 13 : index
    %213 = vector.load %arg5[%c0_61, %c13] : memref<1x19xf32, #tpu.memory_space<vmem>>, vector<1x1xf32>
    %214 = vector.extract %213[0, 0] : f32 from vector<1x1xf32>
    %215 = vector.extract_strided_slice %9 {offsets = [4, 0], sizes = [1, 64], strides = [1, 1]} : vector<9x64xf32> to vector<1x64xf32>
    %216 = vector.broadcast %215 : vector<1x64xf32> to vector<8x64xf32>
    %217 = arith.mulf %67, %216 : vector<8x64xf32>
    %218 = vector.broadcast %214 : f32 to vector<8x64xf32>
    %219 = arith.mulf %218, %217 : vector<8x64xf32>
    %220 = arith.addf %212, %219 : vector<8x64xf32>
    %c0_62 = arith.constant 0 : index
    %c14 = arith.constant 14 : index
    %221 = vector.load %arg5[%c0_62, %c14] : memref<1x19xf32, #tpu.memory_space<vmem>>, vector<1x1xf32>
    %222 = vector.extract %221[0, 0] : f32 from vector<1x1xf32>
    %223 = vector.extract_strided_slice %67 {offsets = [0, 1], sizes = [8, 63], strides = [1, 1]} : vector<8x64xf32> to vector<8x63xf32>
    %cst_63 = arith.constant 0.000000e+00 : f32
    %224 = vector.broadcast %cst_63 : f32 to vector<8x1xf32>
    %225 = tpu.concatenate %223, %224 in 1 : vector<8x63xf32>, vector<8x1xf32> -> vector<8x64xf32>
    %226 = vector.extract_strided_slice %9 {offsets = [5, 0], sizes = [1, 64], strides = [1, 1]} : vector<9x64xf32> to vector<1x64xf32>
    %227 = vector.broadcast %226 : vector<1x64xf32> to vector<8x64xf32>
    %228 = arith.mulf %225, %227 : vector<8x64xf32>
    %229 = vector.broadcast %222 : f32 to vector<8x64xf32>
    %230 = arith.mulf %229, %228 : vector<8x64xf32>
    %231 = arith.addf %220, %230 : vector<8x64xf32>
    %c0_64 = arith.constant 0 : index
    %c15 = arith.constant 15 : index
    %232 = vector.load %arg5[%c0_64, %c15] : memref<1x19xf32, #tpu.memory_space<vmem>>, vector<1x1xf32>
    %233 = vector.extract %232[0, 0] : f32 from vector<1x1xf32>
    %234 = vector.extract_strided_slice %67 {offsets = [0, 7], sizes = [8, 57], strides = [1, 1]} : vector<8x64xf32> to vector<8x57xf32>
    %cst_65 = arith.constant 0.000000e+00 : f32
    %235 = vector.broadcast %cst_65 : f32 to vector<8x7xf32>
    %236 = tpu.concatenate %234, %235 in 1 : vector<8x57xf32>, vector<8x7xf32> -> vector<8x64xf32>
    %237 = vector.extract_strided_slice %9 {offsets = [6, 0], sizes = [1, 64], strides = [1, 1]} : vector<9x64xf32> to vector<1x64xf32>
    %238 = vector.broadcast %237 : vector<1x64xf32> to vector<8x64xf32>
    %239 = arith.mulf %236, %238 : vector<8x64xf32>
    %240 = vector.broadcast %233 : f32 to vector<8x64xf32>
    %241 = arith.mulf %240, %239 : vector<8x64xf32>
    %242 = arith.addf %231, %241 : vector<8x64xf32>
    %c0_66 = arith.constant 0 : index
    %c16 = arith.constant 16 : index
    %243 = vector.load %arg5[%c0_66, %c16] : memref<1x19xf32, #tpu.memory_space<vmem>>, vector<1x1xf32>
    %244 = vector.extract %243[0, 0] : f32 from vector<1x1xf32>
    %245 = vector.extract_strided_slice %67 {offsets = [0, 8], sizes = [8, 56], strides = [1, 1]} : vector<8x64xf32> to vector<8x56xf32>
    %cst_67 = arith.constant 0.000000e+00 : f32
    %246 = vector.broadcast %cst_67 : f32 to vector<8x8xf32>
    %247 = tpu.concatenate %245, %246 in 1 : vector<8x56xf32>, vector<8x8xf32> -> vector<8x64xf32>
    %248 = vector.extract_strided_slice %9 {offsets = [7, 0], sizes = [1, 64], strides = [1, 1]} : vector<9x64xf32> to vector<1x64xf32>
    %249 = vector.broadcast %248 : vector<1x64xf32> to vector<8x64xf32>
    %250 = arith.mulf %247, %249 : vector<8x64xf32>
    %251 = vector.broadcast %244 : f32 to vector<8x64xf32>
    %252 = arith.mulf %251, %250 : vector<8x64xf32>
    %253 = arith.addf %242, %252 : vector<8x64xf32>
    %c0_68 = arith.constant 0 : index
    %c17 = arith.constant 17 : index
    %254 = vector.load %arg5[%c0_68, %c17] : memref<1x19xf32, #tpu.memory_space<vmem>>, vector<1x1xf32>
    %255 = vector.extract %254[0, 0] : f32 from vector<1x1xf32>
    %256 = vector.extract_strided_slice %67 {offsets = [0, 9], sizes = [8, 55], strides = [1, 1]} : vector<8x64xf32> to vector<8x55xf32>
    %cst_69 = arith.constant 0.000000e+00 : f32
    %257 = vector.broadcast %cst_69 : f32 to vector<8x9xf32>
    %258 = tpu.concatenate %256, %257 in 1 : vector<8x55xf32>, vector<8x9xf32> -> vector<8x64xf32>
    %259 = vector.extract_strided_slice %9 {offsets = [8, 0], sizes = [1, 64], strides = [1, 1]} : vector<9x64xf32> to vector<1x64xf32>
    %260 = vector.broadcast %259 : vector<1x64xf32> to vector<8x64xf32>
    %261 = arith.mulf %258, %260 : vector<8x64xf32>
    %262 = vector.broadcast %255 : f32 to vector<8x64xf32>
    %263 = arith.mulf %262, %261 : vector<8x64xf32>
    %264 = arith.addf %253, %263 : vector<8x64xf32>
    %cst_70 = arith.constant 0.000000e+00 : f32
    %265 = vector.broadcast %cst_70 : f32 to vector<8x64xf32>
    %266 = arith.cmpf ogt, %264, %265 : vector<8x64xf32>
    %cst_71 = arith.constant 0.000000e+00 : f32
    %267 = vector.broadcast %cst_71 : f32 to vector<8x64xf32>
    %268 = arith.minimumf %264, %267 : vector<8x64xf32>
    %269 = math.exp %268 : vector<8x64xf32>
    %cst_72 = arith.constant 1.000000e+00 : f32
    %270 = vector.broadcast %cst_72 : f32 to vector<8x64xf32>
    %271 = arith.subf %269, %270 : vector<8x64xf32>
    %272 = arith.select %266, %264, %271 : vector<8x64xi1>, vector<8x64xf32>
    %cst_73 = arith.constant 0.999994993 : f32
    %273 = vector.broadcast %cst_73 : f32 to vector<8x64xf32>
    %274 = arith.mulf %272, %273 : vector<8x64xf32>
    %cst_74 = arith.constant dense<0.000000e+00> : vector<64xf32>
    %275 = vector.multi_reduction <add>, %274, %cst_74 [0] : vector<8x64xf32> to vector<64xf32>
    %276 = vector.shape_cast %275 : vector<64xf32> to vector<1x64xf32>
    %cst_75 = arith.constant 8.000000e+00 : f32
    %277 = vector.broadcast %cst_75 : f32 to vector<1x64xf32>
    %278 = arith.divf %276, %277 : vector<1x64xf32>
    %279 = arith.negf %278 : vector<1x64xf32>
    %280 = math.exp %279 : vector<1x64xf32>
    %cst_76 = arith.constant 1.000000e+00 : f32
    %281 = vector.broadcast %cst_76 : f32 to vector<1x64xf32>
    %282 = arith.addf %281, %280 : vector<1x64xf32>
    %283 = arith.divf %281, %282 : vector<1x64xf32>
    %284 = vector.broadcast %283 : vector<1x64xf32> to vector<64x64xf32>
    %285 = arith.mulf %8, %284 : vector<64x64xf32>
    %cst_77 = arith.constant 0.000000e+00 : f32
    %286 = vector.broadcast %cst_77 : f32 to vector<64x9xf32>
    %287 = vector.extract_strided_slice %285 {offsets = [0, 0], sizes = [64, 55], strides = [1, 1]} : vector<64x64xf32> to vector<64x55xf32>
    %288 = tpu.concatenate %286, %287 in 1 : vector<64x9xf32>, vector<64x55xf32> -> vector<64x64xf32>
    %289 = vector.extract_strided_slice %9 {offsets = [0, 0], sizes = [1, 64], strides = [1, 1]} : vector<9x64xf32> to vector<1x64xf32>
    %290 = vector.broadcast %289 : vector<1x64xf32> to vector<64x64xf32>
    %291 = arith.mulf %288, %290 : vector<64x64xf32>
    %cst_78 = arith.constant 0.000000e+00 : f32
    %292 = vector.broadcast %cst_78 : f32 to vector<64x8xf32>
    %293 = vector.extract_strided_slice %285 {offsets = [0, 0], sizes = [64, 56], strides = [1, 1]} : vector<64x64xf32> to vector<64x56xf32>
    %294 = tpu.concatenate %292, %293 in 1 : vector<64x8xf32>, vector<64x56xf32> -> vector<64x64xf32>
    %295 = vector.extract_strided_slice %9 {offsets = [1, 0], sizes = [1, 64], strides = [1, 1]} : vector<9x64xf32> to vector<1x64xf32>
    %296 = vector.broadcast %295 : vector<1x64xf32> to vector<64x64xf32>
    %297 = arith.mulf %294, %296 : vector<64x64xf32>
    %cst_79 = arith.constant 0.000000e+00 : f32
    %298 = vector.broadcast %cst_79 : f32 to vector<64x7xf32>
    %299 = vector.extract_strided_slice %285 {offsets = [0, 0], sizes = [64, 57], strides = [1, 1]} : vector<64x64xf32> to vector<64x57xf32>
    %300 = tpu.concatenate %298, %299 in 1 : vector<64x7xf32>, vector<64x57xf32> -> vector<64x64xf32>
    %301 = vector.extract_strided_slice %9 {offsets = [2, 0], sizes = [1, 64], strides = [1, 1]} : vector<9x64xf32> to vector<1x64xf32>
    %302 = vector.broadcast %301 : vector<1x64xf32> to vector<64x64xf32>
    %303 = arith.mulf %300, %302 : vector<64x64xf32>
    %cst_80 = arith.constant 0.000000e+00 : f32
    %304 = vector.broadcast %cst_80 : f32 to vector<64x1xf32>
    %305 = vector.extract_strided_slice %285 {offsets = [0, 0], sizes = [64, 63], strides = [1, 1]} : vector<64x64xf32> to vector<64x63xf32>
    %306 = tpu.concatenate %304, %305 in 1 : vector<64x1xf32>, vector<64x63xf32> -> vector<64x64xf32>
    %307 = vector.extract_strided_slice %9 {offsets = [3, 0], sizes = [1, 64], strides = [1, 1]} : vector<9x64xf32> to vector<1x64xf32>
    %308 = vector.broadcast %307 : vector<1x64xf32> to vector<64x64xf32>
    %309 = arith.mulf %306, %308 : vector<64x64xf32>
    %310 = vector.extract_strided_slice %9 {offsets = [4, 0], sizes = [1, 64], strides = [1, 1]} : vector<9x64xf32> to vector<1x64xf32>
    %311 = vector.broadcast %310 : vector<1x64xf32> to vector<64x64xf32>
    %312 = arith.mulf %285, %311 : vector<64x64xf32>
    %313 = vector.extract_strided_slice %285 {offsets = [0, 1], sizes = [64, 63], strides = [1, 1]} : vector<64x64xf32> to vector<64x63xf32>
    %cst_81 = arith.constant 0.000000e+00 : f32
    %314 = vector.broadcast %cst_81 : f32 to vector<64x1xf32>
    %315 = tpu.concatenate %313, %314 in 1 : vector<64x63xf32>, vector<64x1xf32> -> vector<64x64xf32>
    %316 = vector.extract_strided_slice %9 {offsets = [5, 0], sizes = [1, 64], strides = [1, 1]} : vector<9x64xf32> to vector<1x64xf32>
    %317 = vector.broadcast %316 : vector<1x64xf32> to vector<64x64xf32>
    %318 = arith.mulf %315, %317 : vector<64x64xf32>
    %319 = vector.extract_strided_slice %285 {offsets = [0, 7], sizes = [64, 57], strides = [1, 1]} : vector<64x64xf32> to vector<64x57xf32>
    %cst_82 = arith.constant 0.000000e+00 : f32
    %320 = vector.broadcast %cst_82 : f32 to vector<64x7xf32>
    %321 = tpu.concatenate %319, %320 in 1 : vector<64x57xf32>, vector<64x7xf32> -> vector<64x64xf32>
    %322 = vector.extract_strided_slice %9 {offsets = [6, 0], sizes = [1, 64], strides = [1, 1]} : vector<9x64xf32> to vector<1x64xf32>
    %323 = vector.broadcast %322 : vector<1x64xf32> to vector<64x64xf32>
    %324 = arith.mulf %321, %323 : vector<64x64xf32>
    %325 = vector.extract_strided_slice %285 {offsets = [0, 8], sizes = [64, 56], strides = [1, 1]} : vector<64x64xf32> to vector<64x56xf32>
    %cst_83 = arith.constant 0.000000e+00 : f32
    %326 = vector.broadcast %cst_83 : f32 to vector<64x8xf32>
    %327 = tpu.concatenate %325, %326 in 1 : vector<64x56xf32>, vector<64x8xf32> -> vector<64x64xf32>
    %328 = vector.extract_strided_slice %9 {offsets = [7, 0], sizes = [1, 64], strides = [1, 1]} : vector<9x64xf32> to vector<1x64xf32>
    %329 = vector.broadcast %328 : vector<1x64xf32> to vector<64x64xf32>
    %330 = arith.mulf %327, %329 : vector<64x64xf32>
    %331 = vector.extract_strided_slice %285 {offsets = [0, 9], sizes = [64, 55], strides = [1, 1]} : vector<64x64xf32> to vector<64x55xf32>
    %cst_84 = arith.constant 0.000000e+00 : f32
    %332 = vector.broadcast %cst_84 : f32 to vector<64x9xf32>
    %333 = tpu.concatenate %331, %332 in 1 : vector<64x55xf32>, vector<64x9xf32> -> vector<64x64xf32>
    %334 = vector.extract_strided_slice %9 {offsets = [8, 0], sizes = [1, 64], strides = [1, 1]} : vector<9x64xf32> to vector<1x64xf32>
    %335 = vector.broadcast %334 : vector<1x64xf32> to vector<64x64xf32>
    %336 = arith.mulf %333, %335 : vector<64x64xf32>
    %cst_85 = arith.constant 0.000000e+00 : f32
    %337 = vector.broadcast %cst_85 : f32 to vector<16x64xf32>
    %338 = vector.extract_strided_slice %291 {offsets = [0, 0], sizes = [8, 64], strides = [1, 1]} : vector<64x64xf32> to vector<8x64xf32>
    %339 = vector.extract_strided_slice %297 {offsets = [0, 0], sizes = [8, 64], strides = [1, 1]} : vector<64x64xf32> to vector<8x64xf32>
    %340 = vector.extract_strided_slice %303 {offsets = [0, 0], sizes = [8, 64], strides = [1, 1]} : vector<64x64xf32> to vector<8x64xf32>
    %341 = vector.extract_strided_slice %309 {offsets = [0, 0], sizes = [8, 64], strides = [1, 1]} : vector<64x64xf32> to vector<8x64xf32>
    %342 = vector.extract_strided_slice %312 {offsets = [0, 0], sizes = [8, 64], strides = [1, 1]} : vector<64x64xf32> to vector<8x64xf32>
    %343 = vector.extract_strided_slice %318 {offsets = [0, 0], sizes = [8, 64], strides = [1, 1]} : vector<64x64xf32> to vector<8x64xf32>
    %344 = vector.extract_strided_slice %324 {offsets = [0, 0], sizes = [8, 64], strides = [1, 1]} : vector<64x64xf32> to vector<8x64xf32>
    %345 = vector.extract_strided_slice %330 {offsets = [0, 0], sizes = [8, 64], strides = [1, 1]} : vector<64x64xf32> to vector<8x64xf32>
    %346 = vector.extract_strided_slice %336 {offsets = [0, 0], sizes = [8, 64], strides = [1, 1]} : vector<64x64xf32> to vector<8x64xf32>
    %347 = tpu.concatenate %338, %339, %340, %341, %342, %343, %344, %345, %346 in 0 : vector<8x64xf32>, vector<8x64xf32>, vector<8x64xf32>, vector<8x64xf32>, vector<8x64xf32>, vector<8x64xf32>, vector<8x64xf32>, vector<8x64xf32>, vector<8x64xf32> -> vector<72x64xf32>
    %c0_86 = arith.constant 0 : index
    %c0_87 = arith.constant 0 : index
    %348 = vector.load %arg6[%c0_86, %c0_87] : memref<16x72xbf16, #tpu.memory_space<vmem>>, vector<16x72xbf16>
    %349 = arith.truncf %347 : vector<72x64xf32> to vector<72x64xbf16>
    %cst_88 = arith.constant dense<0.000000e+00> : vector<16x64xf32>
    %350 = tpu.matmul %348, %349, %cst_88 {dimension_numbers = #tpu.dot_dimension_numbers<[1], [0], [0], [1], [0, 0, 1, 1], [], []>} : vector<16x72xbf16>, vector<72x64xbf16>, vector<16x64xf32> -> vector<16x64xf32>
    %c0_89 = arith.constant 0 : index
    %c0_90 = arith.constant 0 : index
    %351 = vector.load %arg7[%c0_89, %c0_90] : memref<16x1xf32, #tpu.memory_space<vmem>>, vector<16x1xf32>
    %352 = vector.broadcast %351 : vector<16x1xf32> to vector<16x64xf32>
    %353 = arith.addf %350, %352 : vector<16x64xf32>
    %cst_91 = arith.constant 0.000000e+00 : f32
    %354 = vector.broadcast %cst_91 : f32 to vector<16x64xf32>
    %355 = arith.maximumf %353, %354 : vector<16x64xf32>
    %356 = arith.addf %337, %355 : vector<16x64xf32>
    %357 = vector.extract_strided_slice %291 {offsets = [8, 0], sizes = [8, 64], strides = [1, 1]} : vector<64x64xf32> to vector<8x64xf32>
    %358 = vector.extract_strided_slice %297 {offsets = [8, 0], sizes = [8, 64], strides = [1, 1]} : vector<64x64xf32> to vector<8x64xf32>
    %359 = vector.extract_strided_slice %303 {offsets = [8, 0], sizes = [8, 64], strides = [1, 1]} : vector<64x64xf32> to vector<8x64xf32>
    %360 = vector.extract_strided_slice %309 {offsets = [8, 0], sizes = [8, 64], strides = [1, 1]} : vector<64x64xf32> to vector<8x64xf32>
    %361 = vector.extract_strided_slice %312 {offsets = [8, 0], sizes = [8, 64], strides = [1, 1]} : vector<64x64xf32> to vector<8x64xf32>
    %362 = vector.extract_strided_slice %318 {offsets = [8, 0], sizes = [8, 64], strides = [1, 1]} : vector<64x64xf32> to vector<8x64xf32>
    %363 = vector.extract_strided_slice %324 {offsets = [8, 0], sizes = [8, 64], strides = [1, 1]} : vector<64x64xf32> to vector<8x64xf32>
    %364 = vector.extract_strided_slice %330 {offsets = [8, 0], sizes = [8, 64], strides = [1, 1]} : vector<64x64xf32> to vector<8x64xf32>
    %365 = vector.extract_strided_slice %336 {offsets = [8, 0], sizes = [8, 64], strides = [1, 1]} : vector<64x64xf32> to vector<8x64xf32>
    %366 = tpu.concatenate %357, %358, %359, %360, %361, %362, %363, %364, %365 in 0 : vector<8x64xf32>, vector<8x64xf32>, vector<8x64xf32>, vector<8x64xf32>, vector<8x64xf32>, vector<8x64xf32>, vector<8x64xf32>, vector<8x64xf32>, vector<8x64xf32> -> vector<72x64xf32>
    %c0_92 = arith.constant 0 : index
    %c0_93 = arith.constant 0 : index
    %367 = vector.load %arg6[%c0_92, %c0_93] : memref<16x72xbf16, #tpu.memory_space<vmem>>, vector<16x72xbf16>
    %368 = arith.truncf %366 : vector<72x64xf32> to vector<72x64xbf16>
    %cst_94 = arith.constant dense<0.000000e+00> : vector<16x64xf32>
    %369 = tpu.matmul %367, %368, %cst_94 {dimension_numbers = #tpu.dot_dimension_numbers<[1], [0], [0], [1], [0, 0, 1, 1], [], []>} : vector<16x72xbf16>, vector<72x64xbf16>, vector<16x64xf32> -> vector<16x64xf32>
    %c0_95 = arith.constant 0 : index
    %c0_96 = arith.constant 0 : index
    %370 = vector.load %arg7[%c0_95, %c0_96] : memref<16x1xf32, #tpu.memory_space<vmem>>, vector<16x1xf32>
    %371 = vector.broadcast %370 : vector<16x1xf32> to vector<16x64xf32>
    %372 = arith.addf %369, %371 : vector<16x64xf32>
    %cst_97 = arith.constant 0.000000e+00 : f32
    %373 = vector.broadcast %cst_97 : f32 to vector<16x64xf32>
    %374 = arith.maximumf %372, %373 : vector<16x64xf32>
    %375 = arith.addf %356, %374 : vector<16x64xf32>
    %376 = vector.extract_strided_slice %291 {offsets = [16, 0], sizes = [8, 64], strides = [1, 1]} : vector<64x64xf32> to vector<8x64xf32>
    %377 = vector.extract_strided_slice %297 {offsets = [16, 0], sizes = [8, 64], strides = [1, 1]} : vector<64x64xf32> to vector<8x64xf32>
    %378 = vector.extract_strided_slice %303 {offsets = [16, 0], sizes = [8, 64], strides = [1, 1]} : vector<64x64xf32> to vector<8x64xf32>
    %379 = vector.extract_strided_slice %309 {offsets = [16, 0], sizes = [8, 64], strides = [1, 1]} : vector<64x64xf32> to vector<8x64xf32>
    %380 = vector.extract_strided_slice %312 {offsets = [16, 0], sizes = [8, 64], strides = [1, 1]} : vector<64x64xf32> to vector<8x64xf32>
    %381 = vector.extract_strided_slice %318 {offsets = [16, 0], sizes = [8, 64], strides = [1, 1]} : vector<64x64xf32> to vector<8x64xf32>
    %382 = vector.extract_strided_slice %324 {offsets = [16, 0], sizes = [8, 64], strides = [1, 1]} : vector<64x64xf32> to vector<8x64xf32>
    %383 = vector.extract_strided_slice %330 {offsets = [16, 0], sizes = [8, 64], strides = [1, 1]} : vector<64x64xf32> to vector<8x64xf32>
    %384 = vector.extract_strided_slice %336 {offsets = [16, 0], sizes = [8, 64], strides = [1, 1]} : vector<64x64xf32> to vector<8x64xf32>
    %385 = tpu.concatenate %376, %377, %378, %379, %380, %381, %382, %383, %384 in 0 : vector<8x64xf32>, vector<8x64xf32>, vector<8x64xf32>, vector<8x64xf32>, vector<8x64xf32>, vector<8x64xf32>, vector<8x64xf32>, vector<8x64xf32>, vector<8x64xf32> -> vector<72x64xf32>
    %c0_98 = arith.constant 0 : index
    %c0_99 = arith.constant 0 : index
    %386 = vector.load %arg6[%c0_98, %c0_99] : memref<16x72xbf16, #tpu.memory_space<vmem>>, vector<16x72xbf16>
    %387 = arith.truncf %385 : vector<72x64xf32> to vector<72x64xbf16>
    %cst_100 = arith.constant dense<0.000000e+00> : vector<16x64xf32>
    %388 = tpu.matmul %386, %387, %cst_100 {dimension_numbers = #tpu.dot_dimension_numbers<[1], [0], [0], [1], [0, 0, 1, 1], [], []>} : vector<16x72xbf16>, vector<72x64xbf16>, vector<16x64xf32> -> vector<16x64xf32>
    %c0_101 = arith.constant 0 : index
    %c0_102 = arith.constant 0 : index
    %389 = vector.load %arg7[%c0_101, %c0_102] : memref<16x1xf32, #tpu.memory_space<vmem>>, vector<16x1xf32>
    %390 = vector.broadcast %389 : vector<16x1xf32> to vector<16x64xf32>
    %391 = arith.addf %388, %390 : vector<16x64xf32>
    %cst_103 = arith.constant 0.000000e+00 : f32
    %392 = vector.broadcast %cst_103 : f32 to vector<16x64xf32>
    %393 = arith.maximumf %391, %392 : vector<16x64xf32>
    %394 = arith.addf %375, %393 : vector<16x64xf32>
    %395 = vector.extract_strided_slice %291 {offsets = [24, 0], sizes = [8, 64], strides = [1, 1]} : vector<64x64xf32> to vector<8x64xf32>
    %396 = vector.extract_strided_slice %297 {offsets = [24, 0], sizes = [8, 64], strides = [1, 1]} : vector<64x64xf32> to vector<8x64xf32>
    %397 = vector.extract_strided_slice %303 {offsets = [24, 0], sizes = [8, 64], strides = [1, 1]} : vector<64x64xf32> to vector<8x64xf32>
    %398 = vector.extract_strided_slice %309 {offsets = [24, 0], sizes = [8, 64], strides = [1, 1]} : vector<64x64xf32> to vector<8x64xf32>
    %399 = vector.extract_strided_slice %312 {offsets = [24, 0], sizes = [8, 64], strides = [1, 1]} : vector<64x64xf32> to vector<8x64xf32>
    %400 = vector.extract_strided_slice %318 {offsets = [24, 0], sizes = [8, 64], strides = [1, 1]} : vector<64x64xf32> to vector<8x64xf32>
    %401 = vector.extract_strided_slice %324 {offsets = [24, 0], sizes = [8, 64], strides = [1, 1]} : vector<64x64xf32> to vector<8x64xf32>
    %402 = vector.extract_strided_slice %330 {offsets = [24, 0], sizes = [8, 64], strides = [1, 1]} : vector<64x64xf32> to vector<8x64xf32>
    %403 = vector.extract_strided_slice %336 {offsets = [24, 0], sizes = [8, 64], strides = [1, 1]} : vector<64x64xf32> to vector<8x64xf32>
    %404 = tpu.concatenate %395, %396, %397, %398, %399, %400, %401, %402, %403 in 0 : vector<8x64xf32>, vector<8x64xf32>, vector<8x64xf32>, vector<8x64xf32>, vector<8x64xf32>, vector<8x64xf32>, vector<8x64xf32>, vector<8x64xf32>, vector<8x64xf32> -> vector<72x64xf32>
    %c0_104 = arith.constant 0 : index
    %c0_105 = arith.constant 0 : index
    %405 = vector.load %arg6[%c0_104, %c0_105] : memref<16x72xbf16, #tpu.memory_space<vmem>>, vector<16x72xbf16>
    %406 = arith.truncf %404 : vector<72x64xf32> to vector<72x64xbf16>
    %cst_106 = arith.constant dense<0.000000e+00> : vector<16x64xf32>
    %407 = tpu.matmul %405, %406, %cst_106 {dimension_numbers = #tpu.dot_dimension_numbers<[1], [0], [0], [1], [0, 0, 1, 1], [], []>} : vector<16x72xbf16>, vector<72x64xbf16>, vector<16x64xf32> -> vector<16x64xf32>
    %c0_107 = arith.constant 0 : index
    %c0_108 = arith.constant 0 : index
    %408 = vector.load %arg7[%c0_107, %c0_108] : memref<16x1xf32, #tpu.memory_space<vmem>>, vector<16x1xf32>
    %409 = vector.broadcast %408 : vector<16x1xf32> to vector<16x64xf32>
    %410 = arith.addf %407, %409 : vector<16x64xf32>
    %cst_109 = arith.constant 0.000000e+00 : f32
    %411 = vector.broadcast %cst_109 : f32 to vector<16x64xf32>
    %412 = arith.maximumf %410, %411 : vector<16x64xf32>
    %413 = arith.addf %394, %412 : vector<16x64xf32>
    %414 = vector.extract_strided_slice %291 {offsets = [32, 0], sizes = [8, 64], strides = [1, 1]} : vector<64x64xf32> to vector<8x64xf32>
    %415 = vector.extract_strided_slice %297 {offsets = [32, 0], sizes = [8, 64], strides = [1, 1]} : vector<64x64xf32> to vector<8x64xf32>
    %416 = vector.extract_strided_slice %303 {offsets = [32, 0], sizes = [8, 64], strides = [1, 1]} : vector<64x64xf32> to vector<8x64xf32>
    %417 = vector.extract_strided_slice %309 {offsets = [32, 0], sizes = [8, 64], strides = [1, 1]} : vector<64x64xf32> to vector<8x64xf32>
    %418 = vector.extract_strided_slice %312 {offsets = [32, 0], sizes = [8, 64], strides = [1, 1]} : vector<64x64xf32> to vector<8x64xf32>
    %419 = vector.extract_strided_slice %318 {offsets = [32, 0], sizes = [8, 64], strides = [1, 1]} : vector<64x64xf32> to vector<8x64xf32>
    %420 = vector.extract_strided_slice %324 {offsets = [32, 0], sizes = [8, 64], strides = [1, 1]} : vector<64x64xf32> to vector<8x64xf32>
    %421 = vector.extract_strided_slice %330 {offsets = [32, 0], sizes = [8, 64], strides = [1, 1]} : vector<64x64xf32> to vector<8x64xf32>
    %422 = vector.extract_strided_slice %336 {offsets = [32, 0], sizes = [8, 64], strides = [1, 1]} : vector<64x64xf32> to vector<8x64xf32>
    %423 = tpu.concatenate %414, %415, %416, %417, %418, %419, %420, %421, %422 in 0 : vector<8x64xf32>, vector<8x64xf32>, vector<8x64xf32>, vector<8x64xf32>, vector<8x64xf32>, vector<8x64xf32>, vector<8x64xf32>, vector<8x64xf32>, vector<8x64xf32> -> vector<72x64xf32>
    %c0_110 = arith.constant 0 : index
    %c0_111 = arith.constant 0 : index
    %424 = vector.load %arg6[%c0_110, %c0_111] : memref<16x72xbf16, #tpu.memory_space<vmem>>, vector<16x72xbf16>
    %425 = arith.truncf %423 : vector<72x64xf32> to vector<72x64xbf16>
    %cst_112 = arith.constant dense<0.000000e+00> : vector<16x64xf32>
    %426 = tpu.matmul %424, %425, %cst_112 {dimension_numbers = #tpu.dot_dimension_numbers<[1], [0], [0], [1], [0, 0, 1, 1], [], []>} : vector<16x72xbf16>, vector<72x64xbf16>, vector<16x64xf32> -> vector<16x64xf32>
    %c0_113 = arith.constant 0 : index
    %c0_114 = arith.constant 0 : index
    %427 = vector.load %arg7[%c0_113, %c0_114] : memref<16x1xf32, #tpu.memory_space<vmem>>, vector<16x1xf32>
    %428 = vector.broadcast %427 : vector<16x1xf32> to vector<16x64xf32>
    %429 = arith.addf %426, %428 : vector<16x64xf32>
    %cst_115 = arith.constant 0.000000e+00 : f32
    %430 = vector.broadcast %cst_115 : f32 to vector<16x64xf32>
    %431 = arith.maximumf %429, %430 : vector<16x64xf32>
    %432 = arith.addf %413, %431 : vector<16x64xf32>
    %433 = vector.extract_strided_slice %291 {offsets = [40, 0], sizes = [8, 64], strides = [1, 1]} : vector<64x64xf32> to vector<8x64xf32>
    %434 = vector.extract_strided_slice %297 {offsets = [40, 0], sizes = [8, 64], strides = [1, 1]} : vector<64x64xf32> to vector<8x64xf32>
    %435 = vector.extract_strided_slice %303 {offsets = [40, 0], sizes = [8, 64], strides = [1, 1]} : vector<64x64xf32> to vector<8x64xf32>
    %436 = vector.extract_strided_slice %309 {offsets = [40, 0], sizes = [8, 64], strides = [1, 1]} : vector<64x64xf32> to vector<8x64xf32>
    %437 = vector.extract_strided_slice %312 {offsets = [40, 0], sizes = [8, 64], strides = [1, 1]} : vector<64x64xf32> to vector<8x64xf32>
    %438 = vector.extract_strided_slice %318 {offsets = [40, 0], sizes = [8, 64], strides = [1, 1]} : vector<64x64xf32> to vector<8x64xf32>
    %439 = vector.extract_strided_slice %324 {offsets = [40, 0], sizes = [8, 64], strides = [1, 1]} : vector<64x64xf32> to vector<8x64xf32>
    %440 = vector.extract_strided_slice %330 {offsets = [40, 0], sizes = [8, 64], strides = [1, 1]} : vector<64x64xf32> to vector<8x64xf32>
    %441 = vector.extract_strided_slice %336 {offsets = [40, 0], sizes = [8, 64], strides = [1, 1]} : vector<64x64xf32> to vector<8x64xf32>
    %442 = tpu.concatenate %433, %434, %435, %436, %437, %438, %439, %440, %441 in 0 : vector<8x64xf32>, vector<8x64xf32>, vector<8x64xf32>, vector<8x64xf32>, vector<8x64xf32>, vector<8x64xf32>, vector<8x64xf32>, vector<8x64xf32>, vector<8x64xf32> -> vector<72x64xf32>
    %c0_116 = arith.constant 0 : index
    %c0_117 = arith.constant 0 : index
    %443 = vector.load %arg6[%c0_116, %c0_117] : memref<16x72xbf16, #tpu.memory_space<vmem>>, vector<16x72xbf16>
    %444 = arith.truncf %442 : vector<72x64xf32> to vector<72x64xbf16>
    %cst_118 = arith.constant dense<0.000000e+00> : vector<16x64xf32>
    %445 = tpu.matmul %443, %444, %cst_118 {dimension_numbers = #tpu.dot_dimension_numbers<[1], [0], [0], [1], [0, 0, 1, 1], [], []>} : vector<16x72xbf16>, vector<72x64xbf16>, vector<16x64xf32> -> vector<16x64xf32>
    %c0_119 = arith.constant 0 : index
    %c0_120 = arith.constant 0 : index
    %446 = vector.load %arg7[%c0_119, %c0_120] : memref<16x1xf32, #tpu.memory_space<vmem>>, vector<16x1xf32>
    %447 = vector.broadcast %446 : vector<16x1xf32> to vector<16x64xf32>
    %448 = arith.addf %445, %447 : vector<16x64xf32>
    %cst_121 = arith.constant 0.000000e+00 : f32
    %449 = vector.broadcast %cst_121 : f32 to vector<16x64xf32>
    %450 = arith.maximumf %448, %449 : vector<16x64xf32>
    %451 = arith.addf %432, %450 : vector<16x64xf32>
    %452 = vector.extract_strided_slice %291 {offsets = [48, 0], sizes = [8, 64], strides = [1, 1]} : vector<64x64xf32> to vector<8x64xf32>
    %453 = vector.extract_strided_slice %297 {offsets = [48, 0], sizes = [8, 64], strides = [1, 1]} : vector<64x64xf32> to vector<8x64xf32>
    %454 = vector.extract_strided_slice %303 {offsets = [48, 0], sizes = [8, 64], strides = [1, 1]} : vector<64x64xf32> to vector<8x64xf32>
    %455 = vector.extract_strided_slice %309 {offsets = [48, 0], sizes = [8, 64], strides = [1, 1]} : vector<64x64xf32> to vector<8x64xf32>
    %456 = vector.extract_strided_slice %312 {offsets = [48, 0], sizes = [8, 64], strides = [1, 1]} : vector<64x64xf32> to vector<8x64xf32>
    %457 = vector.extract_strided_slice %318 {offsets = [48, 0], sizes = [8, 64], strides = [1, 1]} : vector<64x64xf32> to vector<8x64xf32>
    %458 = vector.extract_strided_slice %324 {offsets = [48, 0], sizes = [8, 64], strides = [1, 1]} : vector<64x64xf32> to vector<8x64xf32>
    %459 = vector.extract_strided_slice %330 {offsets = [48, 0], sizes = [8, 64], strides = [1, 1]} : vector<64x64xf32> to vector<8x64xf32>
    %460 = vector.extract_strided_slice %336 {offsets = [48, 0], sizes = [8, 64], strides = [1, 1]} : vector<64x64xf32> to vector<8x64xf32>
    %461 = tpu.concatenate %452, %453, %454, %455, %456, %457, %458, %459, %460 in 0 : vector<8x64xf32>, vector<8x64xf32>, vector<8x64xf32>, vector<8x64xf32>, vector<8x64xf32>, vector<8x64xf32>, vector<8x64xf32>, vector<8x64xf32>, vector<8x64xf32> -> vector<72x64xf32>
    %c0_122 = arith.constant 0 : index
    %c0_123 = arith.constant 0 : index
    %462 = vector.load %arg6[%c0_122, %c0_123] : memref<16x72xbf16, #tpu.memory_space<vmem>>, vector<16x72xbf16>
    %463 = arith.truncf %461 : vector<72x64xf32> to vector<72x64xbf16>
    %cst_124 = arith.constant dense<0.000000e+00> : vector<16x64xf32>
    %464 = tpu.matmul %462, %463, %cst_124 {dimension_numbers = #tpu.dot_dimension_numbers<[1], [0], [0], [1], [0, 0, 1, 1], [], []>} : vector<16x72xbf16>, vector<72x64xbf16>, vector<16x64xf32> -> vector<16x64xf32>
    %c0_125 = arith.constant 0 : index
    %c0_126 = arith.constant 0 : index
    %465 = vector.load %arg7[%c0_125, %c0_126] : memref<16x1xf32, #tpu.memory_space<vmem>>, vector<16x1xf32>
    %466 = vector.broadcast %465 : vector<16x1xf32> to vector<16x64xf32>
    %467 = arith.addf %464, %466 : vector<16x64xf32>
    %cst_127 = arith.constant 0.000000e+00 : f32
    %468 = vector.broadcast %cst_127 : f32 to vector<16x64xf32>
    %469 = arith.maximumf %467, %468 : vector<16x64xf32>
    %470 = arith.addf %451, %469 : vector<16x64xf32>
    %471 = vector.extract_strided_slice %291 {offsets = [56, 0], sizes = [8, 64], strides = [1, 1]} : vector<64x64xf32> to vector<8x64xf32>
    %472 = vector.extract_strided_slice %297 {offsets = [56, 0], sizes = [8, 64], strides = [1, 1]} : vector<64x64xf32> to vector<8x64xf32>
    %473 = vector.extract_strided_slice %303 {offsets = [56, 0], sizes = [8, 64], strides = [1, 1]} : vector<64x64xf32> to vector<8x64xf32>
    %474 = vector.extract_strided_slice %309 {offsets = [56, 0], sizes = [8, 64], strides = [1, 1]} : vector<64x64xf32> to vector<8x64xf32>
    %475 = vector.extract_strided_slice %312 {offsets = [56, 0], sizes = [8, 64], strides = [1, 1]} : vector<64x64xf32> to vector<8x64xf32>
    %476 = vector.extract_strided_slice %318 {offsets = [56, 0], sizes = [8, 64], strides = [1, 1]} : vector<64x64xf32> to vector<8x64xf32>
    %477 = vector.extract_strided_slice %324 {offsets = [56, 0], sizes = [8, 64], strides = [1, 1]} : vector<64x64xf32> to vector<8x64xf32>
    %478 = vector.extract_strided_slice %330 {offsets = [56, 0], sizes = [8, 64], strides = [1, 1]} : vector<64x64xf32> to vector<8x64xf32>
    %479 = vector.extract_strided_slice %336 {offsets = [56, 0], sizes = [8, 64], strides = [1, 1]} : vector<64x64xf32> to vector<8x64xf32>
    %480 = tpu.concatenate %471, %472, %473, %474, %475, %476, %477, %478, %479 in 0 : vector<8x64xf32>, vector<8x64xf32>, vector<8x64xf32>, vector<8x64xf32>, vector<8x64xf32>, vector<8x64xf32>, vector<8x64xf32>, vector<8x64xf32>, vector<8x64xf32> -> vector<72x64xf32>
    %c0_128 = arith.constant 0 : index
    %c0_129 = arith.constant 0 : index
    %481 = vector.load %arg6[%c0_128, %c0_129] : memref<16x72xbf16, #tpu.memory_space<vmem>>, vector<16x72xbf16>
    %482 = arith.truncf %480 : vector<72x64xf32> to vector<72x64xbf16>
    %cst_130 = arith.constant dense<0.000000e+00> : vector<16x64xf32>
    %483 = tpu.matmul %481, %482, %cst_130 {dimension_numbers = #tpu.dot_dimension_numbers<[1], [0], [0], [1], [0, 0, 1, 1], [], []>} : vector<16x72xbf16>, vector<72x64xbf16>, vector<16x64xf32> -> vector<16x64xf32>
    %c0_131 = arith.constant 0 : index
    %c0_132 = arith.constant 0 : index
    %484 = vector.load %arg7[%c0_131, %c0_132] : memref<16x1xf32, #tpu.memory_space<vmem>>, vector<16x1xf32>
    %485 = vector.broadcast %484 : vector<16x1xf32> to vector<16x64xf32>
    %486 = arith.addf %483, %485 : vector<16x64xf32>
    %cst_133 = arith.constant 0.000000e+00 : f32
    %487 = vector.broadcast %cst_133 : f32 to vector<16x64xf32>
    %488 = arith.maximumf %486, %487 : vector<16x64xf32>
    %489 = arith.addf %470, %488 : vector<16x64xf32>
    %c0_134 = arith.constant 0 : index
    %c0_135 = arith.constant 0 : index
    %490 = vector.load %arg8[%c0_134, %c0_135] : memref<16x1xf32, #tpu.memory_space<vmem>>, vector<16x1xf32>
    %cst_136 = arith.constant 1.250000e-01 : f32
    %491 = vector.broadcast %cst_136 : f32 to vector<16x1xf32>
    %492 = arith.mulf %490, %491 : vector<16x1xf32>
    %493 = vector.broadcast %492 : vector<16x1xf32> to vector<16x64xf32>
    %494 = arith.mulf %489, %493 : vector<16x64xf32>
    %c0_137 = arith.constant 0 : index
    %c0_138 = arith.constant 0 : index
    %c0_139 = arith.constant 0 : index
    %495 = vector.load %arg9[%c0_137, %c0_138, %c0_139] : memref<1x16x64xf32, #tpu.memory_space<vmem>>, vector<1x16x64xf32>
    %496 = vector.shape_cast %495 : vector<1x16x64xf32> to vector<16x64xf32>
    %497 = vector.shape_cast %494 : vector<16x64xf32> to vector<1x16x64xf32>
    tpu.vector_store %arg9[%c0_137, %c0_138, %c0_139], %497 {strides = array<i32>} : memref<1x16x64xf32, #tpu.memory_space<vmem>>, vector<1x16x64xf32>,
    return
  }
  func.func @transform_0(%arg0: i32) -> (i32, i32, i32) {
    %c0_i32 = arith.constant 0 : i32
    %c0_i32_0 = arith.constant 0 : i32
    %c0_i32_1 = arith.constant 0 : i32
    return %arg0, %c0_i32, %c0_i32_0 : i32, i32, i32
  }
  func.func @transform_1(%arg0: i32) -> (i32, i32, i32) {
    %c0_i32 = arith.constant 0 : i32
    %c0_i32_0 = arith.constant 0 : i32
    %c0_i32_1 = arith.constant 0 : i32
    return %arg0, %c0_i32, %c0_i32_0 : i32, i32, i32
  }
  func.func @transform_2(%arg0: i32) -> (i32, i32) {
    %c0_i32 = arith.constant 0 : i32
    %c0_i32_0 = arith.constant 0 : i32
    %c0_i32_1 = arith.constant 0 : i32
    return %c0_i32, %c0_i32_0 : i32, i32
  }
  func.func @transform_3(%arg0: i32) -> (i32, i32) {
    %c0_i32 = arith.constant 0 : i32
    %c0_i32_0 = arith.constant 0 : i32
    %c0_i32_1 = arith.constant 0 : i32
    return %c0_i32, %c0_i32_0 : i32, i32
  }
  func.func @transform_4(%arg0: i32) -> (i32, i32) {
    %c0_i32 = arith.constant 0 : i32
    %c0_i32_0 = arith.constant 0 : i32
    %c0_i32_1 = arith.constant 0 : i32
    return %c0_i32, %c0_i32_0 : i32, i32
  }
  func.func @transform_5(%arg0: i32) -> (i32, i32) {
    %c0_i32 = arith.constant 0 : i32
    %c0_i32_0 = arith.constant 0 : i32
    %c0_i32_1 = arith.constant 0 : i32
    return %c0_i32, %c0_i32_0 : i32, i32
  }
  func.func @transform_6(%arg0: i32) -> (i32, i32) {
    %c0_i32 = arith.constant 0 : i32
    %c0_i32_0 = arith.constant 0 : i32
    %c0_i32_1 = arith.constant 0 : i32
    return %c0_i32, %c0_i32_0 : i32, i32
  }
  func.func @transform_7(%arg0: i32) -> (i32, i32) {
    %c0_i32 = arith.constant 0 : i32
    %c0_i32_0 = arith.constant 0 : i32
    %c0_i32_1 = arith.constant 0 : i32
    return %c0_i32, %c0_i32_0 : i32, i32
  }
  func.func @transform_8(%arg0: i32) -> (i32, i32, i32) {
    %c0_i32 = arith.constant 0 : i32
    %c0_i32_0 = arith.constant 0 : i32
    %c0_i32_1 = arith.constant 0 : i32
    return %arg0, %c0_i32, %c0_i32_0 : i32, i32, i32
  }
}

</mosaic_0001>

<bundles_post_ra>
// kernel: deep_network_forward.3
= control target key start
LH: loop header
LB: loop body
LE: loop exit
PB: predicated region body
PF: predicated region fallthrough
CT: control target
= control target key end

     0   :  { %v431_v2 = vmov 0.0   ;;  %vm432_vm0 = vmmov 0   ;;  %v43_v4 = vlaneseq  ;;  %vm53_vm1 = vcmask 1041409   ;;  %s492_s0 = inlined_call_operand.vmem [shape: f32[2,8,128], index: 0, kind: input, shape index: {}]   ;;  %s493_s1 = inlined_call_operand.vmem [shape: f32[8,8], index: 1, kind: input, shape index: {}]   ;;  %s494_s3 = inlined_call_operand.vmem [shape: f32[8,8], index: 3, kind: input, shape index: {}]   ;;  %s495_s2 = inlined_call_operand.vmem [shape: f32[1,8], index: 2, kind: input, shape index: {}]   ;;  %s496_s4 = inlined_call_operand.vmem [shape: f32[1,8], index: 4, kind: input, shape index: {}]   ;;  %s497_s5 = inlined_call_operand.vmem [shape: f32[2,8], index: 5, kind: output, shape index: {}]  }
   0x1   :  { %v20_v0 = vld [vmem:[%s492_s0] sm:$0xff]  ;;  %v21_v1 = vld [vmem:[%s492_s0 + $0x8] sm:$0xff]  ;;  %397 = vmatprep.subr.mxu0 %v431_v2  ;;  %399 = vmatprep.mubr.msk.f32.mxu0 %vm432_vm0, %v431_v2  ;;  %vm55_vm2 = vcmask 64512   ;;  %vm376_vm3 = vcmask 58368  }
   0x2   :  { %22 = vadd.xlane.f32.xlu0 %v20_v0  ;;  %29 = vmax.xlane.f32.xlu1 %v20_v0  ;;  %v33_v3 = vld [vmem:[%s493_s1] sm:$0xff]  ;;  %v44_v5 = vand.u32 127, %v43_v4  ;;  %v46_v6 = vshrl.u32 %v43_v4, 7 }
   0x3   :  { %398 = vmatpush3.msra.mxu0 %v33_v3  ;;  %402 = vmatprep.subr.mxu1 %v431_v2  ;;  %v129_v20 = vld [vmem:[%s494_s3] sm:$0xff] }
   0x4   :  { %407 = vmatprep.subr.mxu0 %v431_v2  ;;  %404 = vmatprep.mubr.msk.f32.mxu1 %vm432_vm0, %v431_v2  ;;  %v47_v9 = vsub.s32 %v44_v5, %v46_v6  ;;  %v382_v21 = vld [vmem:[%s495_s2] ss:$0 sm:$0xff] }
   0x5   :  { %403 = vmatpush3.msra.mxu1 %v129_v20  ;;  %v384_v30 = vld [vmem:[%s496_s4] ss:$0 sm:$0xff] }
   0x6   :  { %24 = vadd.xlane.f32.xlu0 %v21_v1  ;;  %31 = vmax.xlane.f32.xlu1 %v21_v1 }
   0x7   :  { %412 = vmatprep.subr.mxu1 %v431_v2 }
  0x8f   :  { %v23_v7 = vpop.xlane.xlu0 %22  ;;  %v30_v8 = vpop.xlane.xlu1 %29 }
  0x90   :  { %v27_v10 = vmul.f32 0.0078125, %v23_v7  ;;  %v216_v16 = vrot.slane %v30_v8, %v47_v9 }
  0x92   :  { %v48_v14 = vrot.slane %v27_v10, %v47_v9 }
  0x93   :  { %v25_v11 = vpop.xlane.xlu0 %24  ;;  %v32_v13 = vpop.xlane.xlu1 %31 }
  0x94   :  { %v28_v12 = vmul.f32 0.0078125, %v25_v11  ;;  %v220_v17 = vrot.slane %v32_v13, %v47_v9 }
  0x96   :  { %v52_v15 = vrot.slane %v28_v12, %v47_v9  ;;  %v221_v19 = vsel %vm53_vm1, %v220_v17, %v216_v16 }
  0x98   :  { %v54_v18 = vsel %vm53_vm1, %v52_v15, %v48_v14 }
  0x99   :  { %400 = vmatmul.mubr.msk.f32.vlgmr.msra.gmra.mrb[0].mxu0 %vm55_vm2, %v54_v18 }
  0x9a   :  { %408 = vmatpush3.msra.mxu0 %v33_v3  ;;  %409 = vmatprep.mubr.msk.f32.mxu0 %vm432_vm0, %v431_v2 }
  0x9d   :  { %410 = vmatmul.mubr.msk.f32.vlgmr.msra.gmra.mrb[2].mxu0 %vm55_vm2, %v221_v19 }
 0x16c   :  { %v124_v22 = vpop.f32.mrb[0].mxu0 }
 0x16d   :  { %v125_v23 = vadd.f32 %v382_v21, %v124_v22  ;;  %v401_v24 = vpop.f32.mrb[1].mxu0 }
 0x16f   :  { %419 = vtanh.f32 %v125_v23 }
 0x170   :  { %v290_v25 = vpop.f32.mrb[2].mxu0 }
 0x171   :  { %v291_v26 = vadd.f32 %v382_v21, %v290_v25  ;;  %v411_v27 = vpop.f32.mrb[3].mxu0 }
 0x173   :  { %421 = vtanh.f32 %v291_v26 }
 0x179   :  { %v420_v28 = vpop.eup %419 }
 0x17a   :  { %405 = vmatmul.mubr.msk.f32.vlgmr.msra.gmra.mrb[0].mxu1 %vm55_vm2, %v420_v28 }
 0x17b   :  { %413 = vmatpush3.msra.mxu1 %v129_v20  ;;  %414 = vmatprep.mubr.msk.f32.mxu1 %vm432_vm0, %v431_v2 }
 0x17d   :  { %v422_v29 = vpop.eup %421 }
 0x17e   :  { %415 = vmatmul.mubr.msk.f32.vlgmr.msra.gmra.mrb[2].mxu1 %vm55_vm2, %v422_v29 }
 0x24d   :  { %v206_v31 = vpop.f32.mrb[0].mxu1 }
 0x24e   :  { %v406_v32 = vpop.f32.mrb[1].mxu1  ;;  %v207_v33 = vadd.f32 %v384_v30, %v206_v31 }
 0x250   :  { %423 = vtanh.f32 %v207_v33 }
 0x251   :  { %v364_v34 = vpop.f32.mrb[2].mxu1 }
 0x252   :  { %v365_v35 = vadd.f32 %v384_v30, %v364_v34  ;;  %v416_v36 = vpop.f32.mrb[3].mxu1 }
 0x254   :  { %425 = vtanh.f32 %v365_v35 }
 0x25a   :  { %v424_v37 = vpop.eup %423 }
 0x25e   :  { %v426_v38 = vpop.eup %425 }
 0x25f   :  { %v369_v39 = vadd.f32 %v426_v38, %v424_v37 }
 0x261   :  { %v388_v40 = vmul.f32 -1.442695, %v369_v39 }
 0x263   :  { %427 = vpow2.f32 %v388_v40 }
 0x26d   :  { %v428_v41 = vpop.eup %427 }
 0x26e   :  { %v373_v42 = vadd.f32 1.0, %v428_v41 }
 0x270   :  { %429 = vrcp.f32 %v373_v42 }
 0x27a   :  { %v430_v43 = vpop.eup %429 }
 0x27b   :  { %377 = vst.msk [vmem:[%s497_s5] sm:$0x3] %vm376_vm3, %v430_v43 }

// kernel: deep_network_forward.5
= control target key start
LH: loop header
LB: loop body
LE: loop exit
PB: predicated region body
PF: predicated region fallthrough
CT: control target
= control target key end

     0   :  { %v907_v47 = vmov 1983009808   ;;  %v164_v49 = vlaneseq  ;;  %s1373_s0 = inlined_call_operand.vmem [shape: f32[2,1024], index: 0, kind: input, shape index: {}]   ;;  %s1374_s1 = inlined_call_operand.vmem [shape: f32[1024,32], index: 1, kind: input, shape index: {}]   ;;  %s1375_s2 = inlined_call_operand.vmem [shape: f32[1,32], index: 2, kind: input, shape index: {}]   ;;  %s1376_s3 = inlined_call_operand.vmem [shape: f32[32,10], index: 3, kind: input, shape index: {}]   ;;  %s1377_s4 = inlined_call_operand.vmem [shape: f32[1,10], index: 4, kind: input, shape index: {}]   ;;  %s1378_s5 = inlined_call_operand.hbm [shape: f32[2,10], index: 5, kind: output, shape index: {}]  }
   0x1   :  { %v39_v0 = vld [vmem:[%s1374_s1 + $0x80] sm:$0xff]  ;;  %v40_v1 = vld [vmem:[%s1374_s1 + $0x88] sm:$0xff]  ;;  %v41_v11 = vld [vmem:[%s1374_s1 + $0x90] sm:$0xff]  ;;  %v162_v48 = vunpack.c.l.s4 %v907_v47 }
   0x2   :  { %v23_v2 = vld [vmem:[%s1374_s1] sm:$0xff]  ;;  %v742_v3 = vpack.c.bf16 %v40_v1, %v39_v0  ;;  %v24_v4 = vld [vmem:[%s1374_s1 + $0x8] sm:$0xff]  ;;  %v42_v13 = vld [vmem:[%s1374_s1 + $0x98] sm:$0xff]  ;;  %v165_v0 = vshrl.u32 %v164_v49, 7 }
   0x3   :  { %v71_v5 = vld [vmem:[%s1374_s1 + $0x180] sm:$0xff]  ;;  %v72_v6 = vld [vmem:[%s1374_s1 + $0x188] sm:$0xff]  ;;  %v744_v7 = vpack.c.bf16 %v24_v4, %v23_v2  ;;  %v25_v14 = vld [vmem:[%s1374_s1 + $0x10] sm:$0xff]  ;;  %v746_v16 = vpack.c.bf16 %v42_v13, %v41_v11  ;;  %v163_v63 = vunpack.c.0.s8 %v162_v48 }
   0x4   :  { %v774_v8 = vpack.c.bf16 %v72_v6, %v71_v5  ;;  %v55_v9 = vld [vmem:[%s1374_s1 + $0x100] sm:$0xff]  ;;  %v56_v10 = vld [vmem:[%s1374_s1 + $0x108] sm:$0xff]  ;;  %743 = vmatprep.subr.bf16.mxu0 %v742_v3  ;;  %v26_v15 = vld [vmem:[%s1374_s1 + $0x18] sm:$0xff] }
   0x5   :  { %v776_v12 = vpack.c.bf16 %v56_v10, %v55_v9  ;;  %745 = vmatpush3.bf16.msra.mxu0 %v744_v7  ;;  %v748_v17 = vpack.c.bf16 %v26_v15, %v25_v14  ;;  %v73_v18 = vld [vmem:[%s1374_s1 + $0x190] sm:$0xff]  ;;  %v74_v19 = vld [vmem:[%s1374_s1 + $0x198] sm:$0xff]  ;;  %v43_v23 = vld [vmem:[%s1374_s1 + $0xa0] sm:$0xff]  ;;  %v1092_v13 = vsub.s32 %v163_v63, %v165_v0 }
   0x6   :  { %775 = vmatprep.subr.bf16.mxu1 %v774_v8  ;;  %v57_v20 = vld [vmem:[%s1374_s1 + $0x110] sm:$0xff]  ;;  %v778_v21 = vpack.c.bf16 %v74_v19, %v73_v18  ;;  %v58_v22 = vld [vmem:[%s1374_s1 + $0x118] sm:$0xff]  ;;  %v44_v24 = vld [vmem:[%s1374_s1 + $0xa8] sm:$0xff]  ;;  %747 = vmatprep.subr.bf16.mxu0 %v746_v16 }
   0x7   :  { %777 = vmatpush3.bf16.msra.mxu1 %v776_v12  ;;  %v780_v25 = vpack.c.bf16 %v58_v22, %v57_v20  ;;  %v750_v26 = vpack.c.bf16 %v44_v24, %v43_v23  ;;  %v27_v27 = vld [vmem:[%s1374_s1 + $0x20] sm:$0xff]  ;;  %v28_v28 = vld [vmem:[%s1374_s1 + $0x28] sm:$0xff]  ;;  %v45_v35 = vld [vmem:[%s1374_s1 + $0xb0] sm:$0xff] }
   0x8   :  { %v75_v29 = vld [vmem:[%s1374_s1 + $0x1a0] sm:$0xff]  ;;  %779 = vmatprep.subr.bf16.mxu1 %v778_v21  ;;  %v76_v30 = vld [vmem:[%s1374_s1 + $0x1a8] sm:$0xff]  ;;  %v752_v33 = vpack.c.bf16 %v28_v28, %v27_v27  ;;  %v46_v36 = vld [vmem:[%s1374_s1 + $0xb8] sm:$0xff] }
   0x9   :  { %v59_v31 = vld [vmem:[%s1374_s1 + $0x120] sm:$0xff]  ;;  %v60_v32 = vld [vmem:[%s1374_s1 + $0x128] sm:$0xff]  ;;  %749 = vmatpush3.bf16.msra.mxu0 %v748_v17  ;;  %v782_v34 = vpack.c.bf16 %v76_v30, %v75_v29  ;;  %v29_v37 = vld [vmem:[%s1374_s1 + $0x30] sm:$0xff]  ;;  %v754_v39 = vpack.c.bf16 %v46_v36, %v45_v35 }
   0xa   :  { %751 = vmatprep.subr.bf16.mxu0 %v750_v26  ;;  %v784_v38 = vpack.c.bf16 %v60_v32, %v59_v31  ;;  %v30_v40 = vld [vmem:[%s1374_s1 + $0x38] sm:$0xff]  ;;  %v77_v41 = vld [vmem:[%s1374_s1 + $0x1b0] sm:$0xff]  ;;  %v47_v46 = vld [vmem:[%s1374_s1 + $0xc0] sm:$0xff] }
   0xb   :  { %781 = vmatpush3.bf16.msra.mxu1 %v780_v25  ;;  %v78_v42 = vld [vmem:[%s1374_s1 + $0x1b8] sm:$0xff]  ;;  %v61_v44 = vld [vmem:[%s1374_s1 + $0x130] sm:$0xff]  ;;  %v48_v50 = vld [vmem:[%s1374_s1 + $0xc8] sm:$0xff]  ;;  %v756_v51 = vpack.c.bf16 %v30_v40, %v29_v37 }
   0xc   :  { %783 = vmatprep.subr.bf16.mxu1 %v782_v34  ;;  %v786_v43 = vpack.c.bf16 %v78_v42, %v77_v41  ;;  %v62_v45 = vld [vmem:[%s1374_s1 + $0x138] sm:$0xff]  ;;  %v79_v52 = vld [vmem:[%s1374_s1 + $0x1c0] sm:$0xff]  ;;  %v80_v53 = vld [vmem:[%s1374_s1 + $0x1c8] sm:$0xff]  ;;  %v758_v55 = vpack.c.bf16 %v48_v50, %v47_v46 }
   0xd   :  { %753 = vmatpush3.bf16.msra.mxu0 %v752_v33  ;;  %v788_v54 = vpack.c.bf16 %v62_v45, %v61_v44  ;;  %v31_v56 = vld [vmem:[%s1374_s1 + $0x40] sm:$0xff]  ;;  %v32_v57 = vld [vmem:[%s1374_s1 + $0x48] sm:$0xff]  ;;  %v790_v59 = vpack.c.bf16 %v80_v53, %v79_v52  ;;  %v49_v61 = vld [vmem:[%s1374_s1 + $0xd0] sm:$0xff] }
   0xe   :  { %755 = vmatprep.subr.bf16.mxu0 %v754_v39  ;;  %v63_v58 = vld [vmem:[%s1374_s1 + $0x140] sm:$0xff]  ;;  %v64_v60 = vld [vmem:[%s1374_s1 + $0x148] sm:$0xff]  ;;  %v50_v62 = vld [vmem:[%s1374_s1 + $0xd8] sm:$0xff]  ;;  %v760_v3 = vpack.c.bf16 %v32_v57, %v31_v56 }
   0xf   :  { %785 = vmatpush3.bf16.msra.mxu1 %v784_v38  ;;  %v81_v1 = vld [vmem:[%s1374_s1 + $0x1d0] sm:$0xff]  ;;  %v82_v2 = vld [vmem:[%s1374_s1 + $0x1d8] sm:$0xff]  ;;  %v792_v4 = vpack.c.bf16 %v64_v60, %v63_v58  ;;  %v762_v5 = vpack.c.bf16 %v50_v62, %v49_v61  ;;  %v51_v11 = vld [vmem:[%s1374_s1 + $0xe0] sm:$0xff] }
  0x10   :  { %787 = vmatprep.subr.bf16.mxu1 %v786_v43  ;;  %v33_v6 = vld [vmem:[%s1374_s1 + $0x50] sm:$0xff]  ;;  %v34_v7 = vld [vmem:[%s1374_s1 + $0x58] sm:$0xff]  ;;  %v794_v9 = vpack.c.bf16 %v82_v2, %v81_v1  ;;  %v52_v12 = vld [vmem:[%s1374_s1 + $0xe8] sm:$0xff] }
  0x11   :  { %757 = vmatpush3.bf16.msra.mxu0 %v756_v51  ;;  %v65_v8 = vld [vmem:[%s1374_s1 + $0x150] sm:$0xff]  ;;  %v66_v10 = vld [vmem:[%s1374_s1 + $0x158] sm:$0xff]  ;;  %v83_v14 = vld [vmem:[%s1374_s1 + $0x1e0] sm:$0xff]  ;;  %v764_v16 = vpack.c.bf16 %v34_v7, %v33_v6  ;;  %v766_v19 = vpack.c.bf16 %v52_v12, %v51_v11 }
  0x12   :  { %759 = vmatprep.subr.bf16.mxu0 %v758_v55  ;;  %v84_v15 = vld [vmem:[%s1374_s1 + $0x1e8] sm:$0xff]  ;;  %v35_v17 = vld [vmem:[%s1374_s1 + $0x60] sm:$0xff]  ;;  %v796_v18 = vpack.c.bf16 %v66_v10, %v65_v8  ;;  %v53_v25 = vld [vmem:[%s1374_s1 + $0xf0] sm:$0xff] }
  0x13   :  { %789 = vmatpush3.bf16.msra.mxu1 %v788_v54  ;;  %v36_v20 = vld [vmem:[%s1374_s1 + $0x68] sm:$0xff]  ;;  %v67_v21 = vld [vmem:[%s1374_s1 + $0x160] sm:$0xff]  ;;  %v798_v23 = vpack.c.bf16 %v84_v15, %v83_v14  ;;  %v54_v26 = vld [vmem:[%s1374_s1 + $0xf8] sm:$0xff] }
  0x14   :  { %791 = vmatprep.subr.bf16.mxu1 %v790_v59  ;;  %v21_v22 = vld [vmem:[%s1373_s0] sm:$0xff]  ;;  %v68_v24 = vld [vmem:[%s1374_s1 + $0x168] sm:$0xff]  ;;  %v85_v29 = vld [vmem:[%s1374_s1 + $0x1f0] sm:$0xff]  ;;  %v768_v31 = vpack.c.bf16 %v36_v20, %v35_v17  ;;  %v770_v35 = vpack.c.bf16 %v54_v26, %v53_v25 }
  0x15   :  { %761 = vmatpush3.bf16.msra.mxu0 %v760_v3  ;;  %v167_v27 = vrot.slane %v21_v22, %v1092_v13  ;;  %v160_v28 = vcombine.high %v21_v22, %v21_v22  ;;  %v86_v30 = vld [vmem:[%s1374_s1 + $0x1f8] sm:$0xff]  ;;  %v800_v34 = vpack.c.bf16 %v68_v24, %v67_v21  ;;  %v37_v36 = vld [vmem:[%s1374_s1 + $0x70] sm:$0xff]  ;;  %v103_v41 = vld [vmem:[%s1374_s1 + $0x280] sm:$0xff] }
  0x16   :  { %763 = vmatprep.subr.bf16.mxu0 %v762_v5  ;;  %v38_v37 = vld [vmem:[%s1374_s1 + $0x78] sm:$0xff]  ;;  %v69_v38 = vld [vmem:[%s1374_s1 + $0x170] sm:$0xff]  ;;  %v802_v39 = vpack.c.bf16 %v86_v30, %v85_v29  ;;  %v104_v42 = vld [vmem:[%s1374_s1 + $0x288] sm:$0xff] }
  0x17   :  { %793 = vmatpush3.bf16.msra.mxu1 %v792_v4  ;;  %v175_v32 = vcombine.high %v167_v27, %v167_v27  ;;  %v174_v33 = vrot.slane %v160_v28, %v1092_v13  ;;  %v70_v40 = vld [vmem:[%s1374_s1 + $0x178] sm:$0xff]  ;;  %v135_v44 = vld [vmem:[%s1374_s1 + $0x380] sm:$0xff]  ;;  %v136_v45 = vld [vmem:[%s1374_s1 + $0x388] sm:$0xff]  ;;  %v772_v46 = vpack.c.bf16 %v38_v37, %v37_v36  ;;  %v806_v48 = vpack.c.bf16 %v104_v42, %v103_v41 }
  0x18   :  { %795 = vmatprep.subr.bf16.mxu1 %v794_v9  ;;  %v804_v47 = vpack.c.bf16 %v70_v40, %v69_v38  ;;  %v87_v49 = vld [vmem:[%s1374_s1 + $0x200] sm:$0xff]  ;;  %v88_v50 = vld [vmem:[%s1374_s1 + $0x208] sm:$0xff]  ;;  %v838_v52 = vpack.c.bf16 %v136_v45, %v135_v44  ;;  %v105_v54 = vld [vmem:[%s1374_s1 + $0x290] sm:$0xff] }
  0x19   :  { %765 = vmatpush3.bf16.msra.mxu0 %v764_v16  ;;  %266 = vmatprep.mubr.f32.mxu0 %v175_v32  ;;  %v176_v43 = vcombine.high %v174_v33, %v174_v33  ;;  %v119_v51 = vld [vmem:[%s1374_s1 + $0x300] sm:$0xff]  ;;  %v120_v53 = vld [vmem:[%s1374_s1 + $0x308] sm:$0xff]  ;;  %v106_v55 = vld [vmem:[%s1374_s1 + $0x298] sm:$0xff]  ;;  %v808_v58 = vpack.c.bf16 %v88_v50, %v87_v49 }
  0x1a   :  { %767 = vmatprep.subr.bf16.mxu0 %v766_v19  ;;  %v137_v56 = vld [vmem:[%s1374_s1 + $0x390] sm:$0xff]  ;;  %v138_v57 = vld [vmem:[%s1374_s1 + $0x398] sm:$0xff]  ;;  %v840_v59 = vpack.c.bf16 %v120_v53, %v119_v51  ;;  %v810_v60 = vpack.c.bf16 %v106_v55, %v105_v54  ;;  %v107_v2 = vld [vmem:[%s1374_s1 + $0x2a0] sm:$0xff] }
  0x1b   :  { %797 = vmatpush3.bf16.msra.mxu1 %v796_v18  ;;  %336 = vmatprep.mubr.f32.mxu1 %v176_v43  ;;  %v89_v61 = vld [vmem:[%s1374_s1 + $0x210] sm:$0xff]  ;;  %v90_v62 = vld [vmem:[%s1374_s1 + $0x218] sm:$0xff]  ;;  %v842_v0 = vpack.c.bf16 %v138_v57, %v137_v56  ;;  %v108_v3 = vld [vmem:[%s1374_s1 + $0x2a8] sm:$0xff] }
  0x1c   :  { %799 = vmatprep.subr.bf16.mxu1 %v798_v23  ;;  %v121_v63 = vld [vmem:[%s1374_s1 + $0x310] sm:$0xff]  ;;  %v122_v1 = vld [vmem:[%s1374_s1 + $0x318] sm:$0xff]  ;;  %v139_v4 = vld [vmem:[%s1374_s1 + $0x3a0] sm:$0xff]  ;;  %v812_v6 = vpack.c.bf16 %v90_v62, %v89_v61  ;;  %v814_v8 = vpack.c.bf16 %v108_v3, %v107_v2 }
  0x1d   :  { %769 = vmatpush3.bf16.msra.mxu0 %v768_v31  ;;  %v140_v5 = vld [vmem:[%s1374_s1 + $0x3a8] sm:$0xff]  ;;  %v844_v7 = vpack.c.bf16 %v122_v1, %v121_v63  ;;  %v91_v9 = vld [vmem:[%s1374_s1 + $0x220] sm:$0xff]  ;;  %v109_v15 = vld [vmem:[%s1374_s1 + $0x2b0] sm:$0xff] }
  0x1e   :  { %771 = vmatprep.subr.bf16.mxu0 %v770_v35  ;;  %v92_v10 = vld [vmem:[%s1374_s1 + $0x228] sm:$0xff]  ;;  %v123_v11 = vld [vmem:[%s1374_s1 + $0x320] sm:$0xff]  ;;  %v846_v12 = vpack.c.bf16 %v140_v5, %v139_v4  ;;  %v110_v16 = vld [vmem:[%s1374_s1 + $0x2b8] sm:$0xff] }
  0x1f   :  { %801 = vmatpush3.bf16.msra.mxu1 %v800_v34  ;;  %v124_v14 = vld [vmem:[%s1374_s1 + $0x328] sm:$0xff]  ;;  %v141_v17 = vld [vmem:[%s1374_s1 + $0x3b0] sm:$0xff]  ;;  %v142_v18 = vld [vmem:[%s1374_s1 + $0x3b8] sm:$0xff]  ;;  %v816_v19 = vpack.c.bf16 %v92_v10, %v91_v9  ;;  %v818_v22 = vpack.c.bf16 %v110_v16, %v109_v15 }
  0x20   :  { %803 = vmatprep.subr.bf16.mxu1 %v802_v39  ;;  %v93_v20 = vld [vmem:[%s1374_s1 + $0x230] sm:$0xff]  ;;  %v848_v21 = vpack.c.bf16 %v124_v14, %v123_v11  ;;  %v94_v23 = vld [vmem:[%s1374_s1 + $0x238] sm:$0xff]  ;;  %v850_v26 = vpack.c.bf16 %v142_v18, %v141_v17  ;;  %v112_v28 = vld [vmem:[%s1374_s1 + $0x2c8] sm:$0xff] }
  0x21   :  { %773 = vmatpush3.bf16.msra.mxu0 %v772_v46  ;;  %v125_v24 = vld [vmem:[%s1374_s1 + $0x330] sm:$0xff]  ;;  %v126_v25 = vld [vmem:[%s1374_s1 + $0x338] sm:$0xff]  ;;  %v143_v29 = vld [vmem:[%s1374_s1 + $0x3c0] sm:$0xff] }
  0x22   :  { %807 = vmatprep.subr.bf16.mxu0 %v806_v48  ;;  %v144_v30 = vld [vmem:[%s1374_s1 + $0x3c8] sm:$0xff] }
  0x23   :  { %805 = vmatpush3.bf16.msra.mxu1 %v804_v47  ;;  %v22_v31 = vld [vmem:[%s1373_s0 + $0x8] sm:$0xff] }
  0x24   :  { %839 = vmatprep.subr.bf16.mxu1 %v838_v52  ;;  %267 = vmatmul.mubr.f32.vlgmr.msra.gmra.mrb[0].mxu0 %v167_v27  ;;  %v111_v27 = vld [vmem:[%s1374_s1 + $0x2c0] sm:$0xff] }
  0x25   :  { %809 = vmatpush3.bf16.msra.mxu0 %v808_v58 }
  0x26   :  { %337 = vmatmul.mubr.f32.vlgmr.msra.gmra.mrb[0].mxu1 %v174_v33  ;;  %811 = vmatprep.subr.bf16.mxu0 %v810_v60 }
  0x27   :  { %841 = vmatpush3.bf16.msra.mxu1 %v840_v59 }
  0x28   :  { %843 = vmatprep.subr.bf16.mxu1 %v842_v0 }
  0x29   :  { %813 = vmatpush3.bf16.msra.mxu0 %v812_v6 }
  0x2a   :  { %815 = vmatprep.subr.bf16.mxu0 %v814_v8 }
  0x2b   :  { %845 = vmatpush3.bf16.msra.mxu1 %v844_v7 }
  0x2c   :  { %847 = vmatprep.subr.bf16.mxu1 %v846_v12 }
  0x2d   :  { %10 = vsyncpa [#allocation3], 0  ;;  %817 = vmatpush3.bf16.msra.mxu0 %v816_v19  ;;  %v820_v32 = vpack.c.bf16 %v94_v23, %v93_v20  ;;  %v1253_v33 = vrot.slane %v22_v31, %v1092_v13  ;;  %v177_v34 = vcombine.high %v22_v31, %v22_v31  ;;  %v852_v35 = vpack.c.bf16 %v126_v25, %v125_v24  ;;  %v95_v37 = vld [vmem:[%s1374_s1 + $0x240] sm:$0xff]  ;;  %v96_v38 = vld [vmem:[%s1374_s1 + $0x248] sm:$0xff] }
  0x2e   :  { %819 = vmatprep.subr.bf16.mxu0 %v818_v22  ;;  %v822_v36 = vpack.c.bf16 %v112_v28, %v111_v27  ;;  %v127_v39 = vld [vmem:[%s1374_s1 + $0x340] sm:$0xff]  ;;  %v854_v40 = vpack.c.bf16 %v144_v30, %v143_v29  ;;  %v128_v41 = vld [vmem:[%s1374_s1 + $0x348] sm:$0xff]  ;;  %v113_v42 = vld [vmem:[%s1374_s1 + $0x2d0] sm:$0xff]  ;;  %v824_v48 = vpack.c.bf16 %v96_v38, %v95_v37  ;;  %v908_v22 = vmov 0.0|0.0  }
  0x2f   :  { %849 = vmatpush3.bf16.msra.mxu1 %v848_v21  ;;  %v114_v43 = vld [vmem:[%s1374_s1 + $0x2d8] sm:$0xff]  ;;  %v192_v44 = vcombine.high %v1253_v33, %v1253_v33  ;;  %v191_v45 = vrot.slane %v177_v34, %v1092_v13  ;;  %v145_v46 = vld [vmem:[%s1374_s1 + $0x3d0] sm:$0xff]  ;;  %v856_v50 = vpack.c.bf16 %v128_v41, %v127_v39  ;;  %v115_v56 = vld [vmem:[%s1374_s1 + $0x2e0] sm:$0xff]  ;;  %vm909_vm0 = vmmov 0  }
  0x30   :  { %851 = vmatprep.subr.bf16.mxu1 %v850_v26  ;;  %v146_v47 = vld [vmem:[%s1374_s1 + $0x3d8] sm:$0xff]  ;;  %v826_v51 = vpack.c.bf16 %v114_v43, %v113_v42  ;;  %v97_v13 = vld [vmem:[%s1374_s1 + $0x250] sm:$0xff]  ;;  %v116_v57 = vld [vmem:[%s1374_s1 + $0x2e8] sm:$0xff]  ;;  %v910_v26 = vmov 0.0   ;;  %vm493_vm1 = vcmask 261120   ;;  %vm567_vm2 = vcmask 74752  }
  0x31   :  { %821 = vmatpush3.bf16.msra.mxu0 %v820_v32  ;;  %406 = vmatprep.mubr.f32.mxu0 %v192_v44  ;;  %v193_v49 = vcombine.high %v191_v45, %v191_v45  ;;  %v98_v52 = vld [vmem:[%s1374_s1 + $0x258] sm:$0xff]  ;;  %v129_v53 = vld [vmem:[%s1374_s1 + $0x350] sm:$0xff]  ;;  %v858_v54 = vpack.c.bf16 %v146_v47, %v145_v46  ;;  %v147_v58 = vld [vmem:[%s1374_s1 + $0x3e0] sm:$0xff]  ;;  %v830_v62 = vpack.c.bf16 %v116_v57, %v115_v56 }
  0x32   :  { %823 = vmatprep.subr.bf16.mxu0 %v822_v36  ;;  %v130_v55 = vld [vmem:[%s1374_s1 + $0x358] sm:$0xff]  ;;  %v148_v59 = vld [vmem:[%s1374_s1 + $0x3e8] sm:$0xff]  ;;  %v828_v60 = vpack.c.bf16 %v98_v52, %v97_v13  ;;  %v99_v63 = vld [vmem:[%s1374_s1 + $0x260] sm:$0xff] }
  0x33   :  { %853 = vmatpush3.bf16.msra.mxu1 %v852_v35  ;;  %476 = vmatprep.mubr.f32.mxu1 %v193_v49  ;;  %v860_v61 = vpack.c.bf16 %v130_v55, %v129_v53  ;;  %v100_v0 = vld [vmem:[%s1374_s1 + $0x268] sm:$0xff]  ;;  %v131_v1 = vld [vmem:[%s1374_s1 + $0x360] sm:$0xff]  ;;  %v862_v2 = vpack.c.bf16 %v148_v59, %v147_v58  ;;  %v117_v4 = vld [vmem:[%s1374_s1 + $0x2f0] sm:$0xff] }
  0x34   :  { %855 = vmatprep.subr.bf16.mxu1 %v854_v40  ;;  %v132_v3 = vld [vmem:[%s1374_s1 + $0x368] sm:$0xff]  ;;  %v118_v5 = vld [vmem:[%s1374_s1 + $0x2f8] sm:$0xff]  ;;  %v149_v6 = vld [vmem:[%s1374_s1 + $0x3f0] sm:$0xff]  ;;  %v832_v8 = vpack.c.bf16 %v100_v0, %v99_v63 }
  0x35   :  { %825 = vmatpush3.bf16.msra.mxu0 %v824_v48  ;;  %v150_v7 = vld [vmem:[%s1374_s1 + $0x3f8] sm:$0xff]  ;;  %v864_v9 = vpack.c.bf16 %v132_v3, %v131_v1  ;;  %v834_v10 = vpack.c.bf16 %v118_v5, %v117_v4  ;;  %v101_v11 = vld [vmem:[%s1374_s1 + $0x270] sm:$0xff]  ;;  %v482_v19 = vld [vmem:[%s1376_s3] sm:$0xff] }
  0x36   :  { %827 = vmatprep.subr.bf16.mxu0 %v826_v51  ;;  %v102_v12 = vld [vmem:[%s1374_s1 + $0x278] sm:$0xff]  ;;  %v866_v14 = vpack.c.bf16 %v150_v7, %v149_v6  ;;  %v133_v15 = vld [vmem:[%s1374_s1 + $0x370] sm:$0xff]  ;;  %v483_v20 = vld [vmem:[%s1376_s3 + $0x8] sm:$0xff] }
  0x37   :  { %857 = vmatpush3.bf16.msra.mxu1 %v856_v50  ;;  %v134_v16 = vld [vmem:[%s1374_s1 + $0x378] sm:$0xff]  ;;  %v836_v17 = vpack.c.bf16 %v102_v12, %v101_v11  ;;  %v871_v21 = vpack.c.bf16 %v483_v20, %v482_v19  ;;  %v484_v23 = vld [vmem:[%s1376_s3 + $0x10] sm:$0xff]  ;;  %v583_v28 = vld [vmem:[%s1375_s2] ss:$0 sm:$0xff]  ;;  %s911_s2 = smov [#allocation2]  }
  0x38   :  { %859 = vmatprep.subr.bf16.mxu1 %v858_v54  ;;  %v868_v18 = vpack.c.bf16 %v134_v16, %v133_v15  ;;  %v485_v24 = vld [vmem:[%s1376_s3 + $0x18] sm:$0xff]  ;;  %v584_v44 = vld [vmem:[%s1377_s4] ss:$0 sm:$0xff]  ;;  %s575_s10 = sshll.u32 %s911_s2, 4  ;;  %s576_s10 = int_to_ptr.vmem [resolvable:$true] %s575_s10 }
  0x39   :  { %829 = vmatpush3.bf16.msra.mxu0 %v828_v60  ;;  %v874_v25 = vpack.c.bf16 %v485_v24, %v484_v23  ;;  %s883_s11 = scalar_lea.vmem %s576_s10, 32  ;;  %p888_p1 = scmp.lt.s32.totalorder %s576_s10, %s576_s10 }
  0x3a   :  { %831 = vmatprep.subr.bf16.mxu0 %v830_v62  ;;  %p884_p0 = scmp.ne.s32.totalorder %s576_s10, %s883_s11  ;;  %p889_p2 = scmp.lt.s32.totalorder %s883_s11, %s883_s11 }
  0x3b   :  { %861 = vmatpush3.bf16.msra.mxu1 %v860_v61 }
  0x3c   :  { %863 = vmatprep.subr.bf16.mxu1 %v862_v2  ;;  %p890_p3 = por %p889_p2, %p888_p1 }
  0x3d   :  { %833 = vmatpush3.bf16.msra.mxu0 %v832_v8 }
  0x3e   :  { %835 = vmatprep.subr.bf16.mxu0 %v834_v10  ;;  %p891_p4 = pnand %p890_p3, %p884_p0 }
  0x3f   :  { %865 = vmatpush3.bf16.msra.mxu1 %v864_v9 }
  0x40   :  { %867 = vmatprep.subr.bf16.mxu1 %v866_v14 }
  0x41   :  { %837 = vmatpush3.bf16.msra.mxu0 %v836_v17 }
  0x42   :  { %870 = vmatprep.subr.bf16.mxu0 %v908_v22 }
  0x43   :  { %869 = vmatpush3.bf16.msra.mxu1 %v868_v18 }
  0x44   :  { %407 = vmatmul.mubr.f32.vlgmr.msra.gmra.mrb[2].mxu0 %v1253_v33 }
  0x45   :  { %872 = vmatpush3.bf16.msra.mxu0 %v871_v21  ;;  %739 = vmatprep.mubr.msk.f32.mxu0 %vm909_vm0, %v910_v26 }
  0x46   :  { %477 = vmatmul.mubr.f32.vlgmr.msra.gmra.mrb[2].mxu1 %v191_v45  ;;  %873 = vmatprep.subr.bf16.mxu0 %v908_v22 }
  0x49   :  { %875 = vmatpush3.bf16.msra.mxu0 %v874_v25 }
  0xf7   :  { %v618_v27 = vpop.f32.mrb[0].mxu0 }
  0xf8   :  { %v619_v29 = vpop.f32.mrb[1].mxu0 }
  0xf9   :  { %v653_v30 = vpop.f32.mrb[0].mxu1  ;;  %v620_v31 = vadd.f32 %v619_v29, %v618_v27 }
  0xfa   :  { %v654_v32 = vpop.f32.mrb[1].mxu1 }
  0xfb   :  { %v655_v33 = vadd.f32 %v654_v32, %v653_v30  ;;  %v269_v34 = vadd.f32 %v620_v31, %v583_v28 }
  0xfd   :  { %v339_v35 = vadd.f32 %v655_v33, %v269_v34 }
 0x117   :  { %v688_v36 = vpop.f32.mrb[2].mxu0 }
 0x118   :  { %v689_v37 = vpop.f32.mrb[3].mxu0 }
 0x119   :  { %v723_v38 = vpop.f32.mrb[2].mxu1  ;;  %v690_v39 = vadd.f32 %v689_v37, %v688_v36 }
 0x11a   :  { %v724_v40 = vpop.f32.mrb[3].mxu1 }
 0x11b   :  { %v725_v41 = vadd.f32 %v724_v40, %v723_v38  ;;  %v409_v42 = vadd.f32 %v690_v39, %v339_v35 }
 0x11d   :  { %v479_v43 = vadd.f32 %v725_v41, %v409_v42 }
 0x11f   :  { %740 = vmatmul.mubr.msk.f32.vlgmr.msra.gmra.mrb[4].mxu0 %vm493_vm1, %v479_v43 }
 0x1f2   :  { %v563_v45 = vpop.f32.mrb[4].mxu0 }
 0x1f3   :  { %v564_v46 = vadd.f32 %v584_v44, %v563_v45  ;;  %v741_v47 = vpop.f32.mrb[5].mxu0 }
 0x1f5   :  { %568 = vst.msk [vmem:[#allocation2] sm:$0x3] %vm567_vm2, %v564_v46 }
 0x1f6   :  { %894 = shalt.err (!%p891_p4)
}
 0x1f7   :  { %s895_s14 = scalar_lea.hbm %s1378_s5, 32 }
 0x1f8   :  { %p896_p5 = scmp.ne.s32.totalorder %s1378_s5, %s895_s14  ;;  %p899_p6 = scmp.lt.u32.totalorder %s895_s14, %s1378_s5 }
 0x1fa   :  { %p901_p7 = pnand %p899_p6, %p896_p5 }
 0x1fc   :  { %904 = shalt.err (!%p901_p7)
}
 0x1fd   :  { %578 = dma.vmem_to_hbm [thread:$0]  %s576_s10, 32, %s1378_s5, [#allocation3]  }
 0x1fe   :  { %905 = dma.done.wait [#allocation3], 32  }
 0x1ff   :  { %906 = vsyncadd [#allocation3], 4294967264 }
 0x200   :  { %582 = vsyncpa [#allocation3], 1 }

// kernel: deep_network_forward.4
= control target key start
LH: loop header
LB: loop body
LE: loop exit
PB: predicated region body
PF: predicated region fallthrough
CT: control target
= control target key end

     0   :  { %s2150_s27 = smov 0   ;;  %s2785_s0 = inlined_call_operand.vmem [shape: f32[2,64,16], index: 0, kind: input, shape index: {}]   ;;  %s2786_s1 = inlined_call_operand.vmem [shape: f32[2,64,1], index: 1, kind: input, shape index: {}]   ;;  %s2787_s2 = inlined_call_operand.vmem [shape: f32[9,64], index: 2, kind: input, shape index: {}]   ;;  %s2788_s3 = inlined_call_operand.vmem [shape: bf16[16,64], index: 3, kind: input, shape index: {}]   ;;  %s2789_s4 = inlined_call_operand.vmem [shape: f32[1,19], index: 4, kind: input, shape index: {}]   ;;  %s2790_s5 = inlined_call_operand.vmem [shape: bf16[16,72], index: 5, kind: input, shape index: {}]   ;;  %s2791_s6 = inlined_call_operand.vmem [shape: f32[16,1], index: 6, kind: input, shape index: {}]   ;;  %s2792_s7 = inlined_call_operand.vmem [shape: f32[16,1], index: 7, kind: input, shape index: {}]   ;;  %s2793_s8 = inlined_call_operand.vmem [shape: f32[2,16,64], index: 8, kind: output, shape index: {}]  }
   0x1 LB: > { %s1782_s28 = sadd.s32 4294967295, %s2078_s27   ;;  %p1786_p0 = scmp.ge.s32.totalorder %s2078_s27, 1  ;;  %s2078_s27 = sphi %s2150_s27, %s18_s27  }
   0x2   : > { %p272_p1 = scmp.lt.s32.totalorder %s2078_s27, 3 }
   0x4   : > { %p273_p2 = pnand %p1786_p0, %p272_p1 }
   0x5   : > { %p311_p3 = scmp.lt.s32.totalorder (!%p273_p2), %s1782_s28, 1  ;;  %v2080_v0 = vmov (!%p273_p2), 0   ;;  %v2063_v5 = vld [vmem:[%s2788_s3] sm:$0xff] (!%p273_p2)   ;;  %s2081_s15 = smov (!%p273_p2), 127   ;;  %vm403_vm0 = vcmask (!%p273_p2), 130048   ;;  %vm483_vm1 = vcmask (!%p273_p2), 523264  }
   0x6   : > { %276 = sbr.rel (%p273_p2) target bundleno = 1098 (0x44a), region = 52  ;;  %2062 = vset.pattern.permute.xlu1 (!%p273_p2), %v2080_v0  ;;  %2061 = vset.pattern.permute.xlu0 (!%p273_p2), %v2080_v0  ;;  %v2172_v10 = vld [vmem:[%s2789_s4] sm:$0x1] (!%p273_p2)  ;;  %s2082_s16 = smov (!%p273_p2), 110   ;;  %vm605_vm2 = vcmask (!%p273_p2), 1040384   ;;  %vm607_vm3 = vcmask (!%p273_p2), 1041408  }
   0x7   : > { %1868 = vmatprep.subr.bf16.mxu0 (!%p273_p2), %v2063_v5  ;;  %s2083_s17 = smov (!%p273_p2), 125   ;;  %s2084_s18 = smov (!%p273_p2), 126   ;;  %vm609_vm4 = vcmask (!%p273_p2), 1042432   ;;  %vm611_vm5 = vcmask (!%p273_p2), 1043456   ;;  %vm613_vm6 = vcmask (!%p273_p2), 1044480   ;;  %vm615_vm7 = vcmask (!%p273_p2), 1045504  }
   0x8   : > { %1869 = vmatpush3.bf16.msra.mxu0 (!%p273_p2), %v2063_v5  ;;  %s2085_s19 = smov (!%p273_p2), 123   ;;  %s2086_s20 = smov (!%p273_p2), 124   ;;  %vm617_vm8 = vcmask (!%p273_p2), 1046528   ;;  %vm656_vm9 = vcmask (!%p273_p2), 64512   ;;  %vm639_vm10 = vcmask (!%p273_p2), 72704   ;;  %vm690_vm11 = vcmask (!%p273_p2), 7168  }
   0x9   : > { %s2087_s21 = smov (!%p273_p2), 121   ;;  %s2088_s22 = smov (!%p273_p2), 122   ;;  %vm673_vm12 = vcmask (!%p273_p2), 56320   ;;  %vm736_vm13 = vcmask (!%p273_p2), 465920   ;;  %vm719_vm14 = vcmask (!%p273_p2), 515072   ;;  %vm770_vm15 = vcmask (!%p273_p2), 449536  }
   0xa   : > { %s2089_s23 = smov (!%p273_p2), 119   ;;  %s2090_s24 = smov (!%p273_p2), 120  }
   0xb   : > { %s2091_s25 = smov (!%p273_p2), 117   ;;  %s2092_s26 = smov (!%p273_p2), 118  }
   0xc   : > { %s2093_s30 = smov (!%p273_p2), 115   ;;  %s2094_s9 = smov (!%p273_p2), 116  }
   0xd   : > { %s2795_s28 = smov (!%p311_p3, %s1782_s28), 1  ;;  %s2096_s13 = smov 114  }
   0xe   : > { %s1812_s29 = sshll.u32 %s2795_s28, 6  ;;  %s2097_s14 = smov 111  }
   0xf   : > { %s320_s10 = scalar_lea.vmem %s2786_s1, %s1812_s29  ;;  %s315_s12 = scalar_lea.vmem %s2785_s0, %s1812_s29 }
  0x10   : > { %v337_v1 = vld [vmem:[%s320_s10 + $0x10] sm:$0xff]  ;;  %v335_v2 = vld [vmem:[%s320_s10] sm:$0xff]  ;;  %v338_v3 = vld [vmem:[%s320_s10 + $0x18] sm:$0xff]  ;;  %s2095_s29 = smov 113  }
  0x11   : > { %355 = vperm.xlu1 %2062, %v337_v1   ;;  %345 = vperm.xlu0 %2061, %v335_v2   ;;  %v336_v4 = vld [vmem:[%s320_s10 + $0x8] sm:$0xff]  ;;  %v339_v7 = vld [vmem:[%s320_s10 + $0x20] sm:$0xff]  ;;  %v342_v8 = vld [vmem:[%s320_s10 + $0x38] sm:$0xff] }
  0x12   : > { %v340_v6 = vld [vmem:[%s320_s10 + $0x28] sm:$0xff]  ;;  %v341_v9 = vld [vmem:[%s320_s10 + $0x30] sm:$0xff]  ;;  %v327_v14 = vld [vmem:[%s315_s12] sm:$0xff] }
  0x13   : > { %v329_v13 = vld [vmem:[%s315_s12 + $0x10] sm:$0xff]  ;;  %v330_v15 = vld [vmem:[%s315_s12 + $0x18] sm:$0xff]  ;;  %v328_v16 = vld [vmem:[%s315_s12 + $0x8] sm:$0xff] }
  0x14   : > { %v332_v23 = vld [vmem:[%s315_s12 + $0x28] sm:$0xff]  ;;  %v331_v24 = vld [vmem:[%s315_s12 + $0x20] sm:$0xff]  ;;  %v334_v31 = vld [vmem:[%s315_s12 + $0x38] sm:$0xff] }
  0x15   : > { %360 = vperm.xlu1 %2062, %v338_v3   ;;  %350 = vperm.xlu0 %2061, %v336_v4   ;;  %v333_v32 = vld [vmem:[%s315_s12 + $0x30] sm:$0xff] }
  0x19   : > { %370 = vperm.xlu1 %2062, %v340_v6   ;;  %365 = vperm.xlu0 %2061, %v339_v7  }
  0x1d   : > { %380 = vperm.xlu1 %2062, %v342_v8   ;;  %375 = vperm.xlu0 %2061, %v341_v9  }
  0x21   : > { %649 = vrot.lane.b32.xlu1 %v2172_v10, %s2081_s15  ;;  %628 = vrot.lane.b32.xlu0 %v2172_v10, %s2082_s16  ;;  %s2098_s16 = smov 112  }
  0x25   : > { %683 = vrot.lane.b32.xlu1 %v2172_v10, %s2083_s17  ;;  %666 = vrot.lane.b32.xlu0 %v2172_v10, %s2084_s18  ;;  %s2099_s17 = smov 8   ;;  %s2100_s18 = smov 9  }
  0x29   : > { %712 = vrot.lane.b32.xlu1 %v2172_v10, %s2085_s19  ;;  %700 = vrot.lane.b32.xlu0 %v2172_v10, %s2086_s20  ;;  %s2101_s19 = smov 1   ;;  %s2102_s20 = smov 7  }
  0x2d   : > { %746 = vrot.lane.b32.xlu1 %v2172_v10, %s2087_s21  ;;  %729 = vrot.lane.b32.xlu0 %v2172_v10, %s2088_s22 }
  0x31   : > { %780 = vrot.lane.b32.xlu1 %v2172_v10, %s2089_s23  ;;  %763 = vrot.lane.b32.xlu0 %v2172_v10, %s2090_s24 }
  0x35   : > { %805 = vrot.lane.b32.xlu1 %v2172_v10, %s2091_s25  ;;  %793 = vrot.lane.b32.xlu0 %v2172_v10, %s2092_s26 }
  0x39   : > { %829 = vrot.lane.b32.xlu1 %v2172_v10, %s2093_s30  ;;  %817 = vrot.lane.b32.xlu0 %v2172_v10, %s2094_s9 }
  0x3d   : > { %849 = vrot.lane.b32.xlu1 %v2172_v10, %s2095_s29  ;;  %837 = vrot.lane.b32.xlu0 %v2172_v10, %s2096_s13 }
  0x41   : > { %873 = vrot.lane.b32.xlu1 %v2172_v10, %s2097_s14  ;;  %861 = vrot.lane.b32.xlu0 %v2172_v10, %s2098_s16 }
  0x90   : > { %v356_v11 = vpop.permute.xlu1 %355  ;;  %v346_v12 = vpop.permute.xlu0 %345 }
  0x91   : > { %v385_v19 = vmul.f32 %v356_v11, %v329_v13  ;;  %v383_v20 = vmul.f32 %v346_v12, %v327_v14 }
  0x94   : > { %v361_v17 = vpop.permute.xlu1 %360  ;;  %v351_v18 = vpop.permute.xlu0 %350 }
  0x95   : > { %v386_v21 = vmul.f32 %v361_v17, %v330_v15  ;;  %v384_v22 = vmul.f32 %v351_v18, %v328_v16 }
  0x97   : > { %v392_v25 = vpack.c.bf16 %v386_v21, %v385_v19  ;;  %v391_v26 = vpack.c.bf16 %v384_v22, %v383_v20 }
  0x98   : > { %v371_v27 = vpop.permute.xlu1 %370  ;;  %v366_v28 = vpop.permute.xlu0 %365 }
  0x99   : > { %v388_v29 = vmul.f32 %v371_v27, %v332_v23  ;;  %v387_v30 = vmul.f32 %v366_v28, %v331_v24  ;;  %1870 = vmatprep.mubr.msk.bf16.mxu0 %vm403_vm0, %v391_v26 }
  0x9a   : > { %1871 = vmatmul.mubr.msk.bf16.vlgmr.msra.gmra.mrb[0].mxu0 %vm403_vm0, %v392_v25 }
  0x9b   : > { %v393_v33 = vpack.c.bf16 %v388_v29, %v387_v30 }
  0x9c   : > { %v381_v34 = vpop.permute.xlu1 %380  ;;  %v376_v35 = vpop.permute.xlu0 %375 }
  0x9d   : > { %v390_v36 = vmul.f32 %v381_v34, %v334_v31  ;;  %v389_v37 = vmul.f32 %v376_v35, %v333_v32  ;;  %1874 = vmatprep.mubr.msk.bf16.mxu0 %vm403_vm0, %v393_v33 }
  0x9f   : > { %v394_v38 = vpack.c.bf16 %v390_v36, %v389_v37 }
  0xa0   : > { %v650_v39 = vpop.permute.xlu1 %649  ;;  %v629_v40 = vpop.permute.xlu0 %628 }
  0xa1   : > { %1990 = vpush %v629_v40 }
  0xa2   : > { %1875 = vmatmul.mubr.msk.bf16.gmra.mrb[4].mxu0 %vm403_vm0, %v394_v38  ;;  %1992 = vpush %v2172_v10  ;;  %vm753_vm0 = vcmask 457728  }
  0xa3   : > { %1994 = vpush %v650_v39 }
  0xa4   : > { %v684_v41 = vpop.permute.xlu1 %683  ;;  %v667_v42 = vpop.permute.xlu0 %666 }
  0xa5   : > { %1996 = vpush %v667_v42 }
  0xa6   : > { %1998 = vpush %v684_v41 }
  0xa8   : > { %v713_v43 = vpop.permute.xlu1 %712  ;;  %v701_v44 = vpop.permute.xlu0 %700 }
  0xa9   : > { %2000 = vpush %v701_v44 }
  0xaa   : > { %2002 = vpush %v713_v43 }
  0xac   : > { %v747_v45 = vpop.permute.xlu1 %746  ;;  %v730_v46 = vpop.permute.xlu0 %729 }
  0xad   : > { %2004 = vpush %v730_v46 }
  0xae   : > { %2006 = vpush %v747_v45 }
  0xb0   : > { %v781_v47 = vpop.permute.xlu1 %780  ;;  %v764_v48 = vpop.permute.xlu0 %763 }
  0xb1   : > { %2008 = vpush %v764_v48 }
  0xb2   : > { %2010 = vpush %v781_v47 }
  0xb4   : > { %v806_v49 = vpop.permute.xlu1 %805  ;;  %v794_v50 = vpop.permute.xlu0 %793 }
  0xb5   : > { %2012 = vpush %v794_v50 }
  0xb6   : > { %2014 = vpush %v806_v49 }
  0xb8   : > { %v830_v51 = vpop.permute.xlu1 %829  ;;  %v818_v52 = vpop.permute.xlu0 %817 }
  0xb9   : > { %2016 = vpush %v818_v52 }
  0xba   : > { %2018 = vpush %v830_v51 }
  0xbc   : > { %v850_v53 = vpop.permute.xlu1 %849  ;;  %v838_v54 = vpop.permute.xlu0 %837 }
  0xbd   : > { %2020 = vpush %v838_v54 }
  0xbe   : > { %2022 = vpush %v850_v53 }
  0xc0   : > { %v874_v5 = vpop.permute.xlu1 %873  ;;  %v862_v10 = vpop.permute.xlu0 %861 }
  0xc1   : > { %2024 = vpush %v862_v10 }
  0xc2   : > { %2026 = vpush %v874_v5 }
  0xd2   : > { %s2302_s22 = spop %1990 }
  0xd3   : > { %s1993_s30 = spop %1992 }
  0xd4   : > { %s1995_s9 = spop %1994 }
  0xd6   : > { %s1997_s10 = spop %1996 }
  0xd7   : > { %s1999_s11 = spop %1998 }
  0xda   : > { %s2001_s12 = spop %2000 }
  0xdb   : > { %s2003_s29 = spop %2002 }
  0xde   : > { %s2005_s13 = spop %2004 }
  0xdf   : > { %s2007_s14 = spop %2006 }
  0xe2   : > { %s2009_s25 = spop %2008 }
  0xe3   : > { %s2011_s26 = spop %2010 }
 0x16d   : > { %v2206_v55 = vpop.f32.mrb[0].mxu0 }
 0x16e   : > { %v515_v56 = vsel %vm483_vm1, %v2206_v55, 0.0  ;;  %v523_v57 = vsel %vm483_vm1, %v2206_v55, -inf  ;;  %v2212_v58 = vpop.f32.mrb[1].mxu0 }
 0x16f   : > { %v516_v59 = vrot.slane %v515_v56, 4  ;;  %v524_v60 = vrot.slane %v523_v57, 4  ;;  %v484_v61 = vsel %vm483_vm1, %v2212_v58, 0.0  ;;  %v493_v62 = vsel %vm483_vm1, %v2212_v58, -inf  ;;  %v2218_v63 = vpop.f32.mrb[2].mxu0 }
 0x170   : > { %v485_v0 = vrot.slane %v484_v61, 4  ;;  %v494_v1 = vrot.slane %v493_v62, 4  ;;  %v530_v2 = vsel %vm483_vm1, %v2218_v63, 0.0  ;;  %v538_v3 = vsel %vm483_vm1, %v2218_v63, -inf  ;;  %v2224_v4 = vpop.f32.mrb[3].mxu0 }
 0x171   : > { %v517_v6 = vadd.f32 %v516_v59, %v515_v56  ;;  %v525_v7 = vmax.f32 %v523_v57, %v524_v60  ;;  %v531_v8 = vrot.slane %v530_v2, 4  ;;  %v539_v9 = vrot.slane %v538_v3, 4 }
 0x172   : > { %v486_v11 = vadd.f32 %v485_v0, %v484_v61  ;;  %v495_v12 = vmax.f32 %v493_v62, %v494_v1  ;;  %v500_v13 = vsel %vm483_vm1, %v2224_v4, 0.0  ;;  %v508_v14 = vsel %vm483_vm1, %v2224_v4, -inf }
 0x173   : > { %v518_v15 = vrot.slane %v517_v6, 2  ;;  %v526_v16 = vrot.slane %v525_v7, 2  ;;  %v532_v17 = vadd.f32 %v531_v8, %v530_v2  ;;  %v540_v18 = vmax.f32 %v538_v3, %v539_v9 }
 0x174   : > { %v487_v19 = vrot.slane %v486_v11, 2  ;;  %v496_v20 = vrot.slane %v495_v12, 2  ;;  %v501_v21 = vrot.slane %v500_v13, 4  ;;  %v509_v22 = vrot.slane %v508_v14, 4 }
 0x175   : > { %v519_v23 = vadd.f32 %v518_v15, %v517_v6  ;;  %v527_v24 = vmax.f32 %v525_v7, %v526_v16  ;;  %v533_v25 = vrot.slane %v532_v17, 2  ;;  %v541_v26 = vrot.slane %v540_v18, 2  ;;  %v2230_v27 = vpop.f32.mrb[4].mxu0 }
 0x176   : > { %v488_v28 = vadd.f32 %v487_v19, %v486_v11  ;;  %v497_v29 = vmax.f32 %v495_v12, %v496_v20  ;;  %v502_v30 = vadd.f32 %v501_v21, %v500_v13  ;;  %v510_v31 = vmax.f32 %v508_v14, %v509_v22  ;;  %v2232_v32 = vpop.f32.mrb[5].mxu0 }
 0x177   : > { %v520_v33 = vrot.slane %v519_v23, 1  ;;  %v528_v34 = vrot.slane %v527_v24, 1  ;;  %v534_v35 = vadd.f32 %v533_v25, %v532_v17  ;;  %v542_v36 = vmax.f32 %v540_v18, %v541_v26  ;;  %v2234_v37 = vpop.f32.mrb[6].mxu0 }
 0x178   : > { %v489_v38 = vrot.slane %v488_v28, 1  ;;  %v498_v39 = vrot.slane %v497_v29, 1  ;;  %v503_v40 = vrot.slane %v502_v30, 2  ;;  %v511_v41 = vrot.slane %v510_v31, 2  ;;  %v2236_v42 = vpop.f32.mrb[7].mxu0 }
 0x179   : > { %v521_v43 = vadd.f32 %v520_v33, %v519_v23  ;;  %v535_v44 = vrot.slane %v534_v35, 1  ;;  %v543_v45 = vrot.slane %v542_v36, 1  ;;  %v529_v48 = vmax.f32 %v527_v24, %v528_v34 }
 0x17a   : > { %v504_v46 = vadd.f32 %v503_v40, %v502_v30  ;;  %v512_v47 = vmax.f32 %v510_v31, %v511_v41  ;;  %v490_v49 = vadd.f32 %v489_v38, %v488_v28  ;;  %v499_v50 = vmax.f32 %v497_v29, %v498_v39 }
 0x17b   : > { %v575_v51 = vsel %vm483_vm1, %v2230_v27, 0.0  ;;  %v522_v52 = vmul.f32 0.125, %v521_v43  ;;  %v536_v57 = vadd.f32 %v535_v44, %v534_v35  ;;  %v583_v59 = vsel %vm483_vm1, %v2230_v27, -inf }
 0x17c   : > { %v505_v53 = vrot.slane %v504_v46, 1  ;;  %v513_v54 = vrot.slane %v512_v47, 1  ;;  %v576_v56 = vrot.slane %v575_v51, 4  ;;  %v545_v60 = vsel %vm483_vm1, %v2232_v32, 0.0 }
 0x17d   : > { %v553_v61 = vsel %vm483_vm1, %v2232_v32, -inf  ;;  %v544_v62 = vmax.f32 %v542_v36, %v543_v45  ;;  %v492_v3 = vmul.f32 0.125, %v490_v49  ;;  %v546_v5 = vrot.slane %v545_v60, 4 }
 0x17e   : > { %v506_v0 = vadd.f32 %v505_v53, %v504_v46  ;;  %v514_v1 = vmax.f32 %v512_v47, %v513_v54  ;;  %v577_v2 = vadd.f32 %v576_v56, %v575_v51  ;;  %v554_v6 = vrot.slane %v553_v61, 4 }
 0x17f   : > { %v590_v7 = vsel %vm483_vm1, %v2234_v37, 0.0  ;;  %v584_v10 = vrot.slane %v583_v59, 4  ;;  %v598_v11 = vsel %vm483_vm1, %v2234_v37, -inf  ;;  %v547_v13 = vadd.f32 %v546_v5, %v545_v60 }
 0x180   : > { %v507_v8 = vmul.f32 0.125, %v506_v0  ;;  %v619_v9 = vsel %vm605_vm2, %v499_v50, %v514_v1  ;;  %v555_v14 = vmax.f32 %v553_v61, %v554_v6  ;;  %v591_v15 = vrot.slane %v590_v7, 4 }
 0x181   : > { %v620_v12 = vsel %vm607_vm3, %v619_v9, %v529_v48  ;;  %v537_v16 = vmul.f32 0.125, %v536_v57  ;;  %v578_v18 = vrot.slane %v577_v2, 2  ;;  %v548_v21 = vrot.slane %v547_v13, 2 }
 0x182   : > { %v606_v17 = vsel %vm605_vm2, %v492_v3, %v507_v8  ;;  %v621_v19 = vsel %vm609_vm4, %v620_v12, %v544_v62  ;;  %v556_v22 = vrot.slane %v555_v14, 2  ;;  %v592_v23 = vadd.f32 %v591_v15, %v590_v7 }
 0x183   : > { %v608_v20 = vsel %vm607_vm3, %v606_v17, %v522_v52  ;;  %v585_v24 = vmax.f32 %v583_v59, %v584_v10  ;;  %v599_v26 = vrot.slane %v598_v11, 4  ;;  %v549_v28 = vadd.f32 %v548_v21, %v547_v13 }
 0x184   : > { %v610_v25 = vsel %vm609_vm4, %v608_v20, %v537_v16  ;;  %v557_v29 = vmax.f32 %v555_v14, %v556_v22  ;;  %v593_v30 = vrot.slane %v592_v23, 2  ;;  %v560_v31 = vsel %vm483_vm1, %v2236_v42, 0.0 }
 0x185   : > { %v600_v33 = vmax.f32 %v598_v11, %v599_v26  ;;  %v561_v34 = vrot.slane %v560_v31, 4  ;;  %v579_v35 = vadd.f32 %v578_v18, %v577_v2  ;;  %v550_v36 = vrot.slane %v549_v28, 1 }
 0x186   : > { %v558_v38 = vrot.slane %v557_v29, 1  ;;  %v568_v39 = vsel %vm483_vm1, %v2236_v42, -inf  ;;  %v586_v40 = vrot.slane %v585_v24, 2  ;;  %v594_v41 = vadd.f32 %v593_v30, %v592_v23  ;;  %v481_v23 = vld [vmem:[%s2787_s2] sm:$0xff] }
 0x187   : > { %v562_v43 = vadd.f32 %v561_v34, %v560_v31  ;;  %v551_v44 = vadd.f32 %v550_v36, %v549_v28  ;;  %v601_v46 = vrot.slane %v600_v33, 2  ;;  %v569_v47 = vrot.slane %v568_v39, 4 }
 0x188   : > { %v559_v45 = vmax.f32 %v557_v29, %v558_v38  ;;  %v580_v49 = vrot.slane %v579_v35, 1  ;;  %v587_v53 = vmax.f32 %v585_v24, %v586_v40  ;;  %v595_v54 = vrot.slane %v594_v41, 1 }
 0x189   : > { %v563_v48 = vrot.slane %v562_v43, 2  ;;  %v552_v50 = vmul.f32 0.125, %v551_v44  ;;  %v570_v52 = vmax.f32 %v568_v39, %v569_v47  ;;  %v602_v59 = vmax.f32 %v600_v33, %v601_v46 }
 0x18a   : > { %v622_v51 = vsel %vm611_vm5, %v621_v19, %v559_v45  ;;  %v581_v62 = vadd.f32 %v580_v49, %v579_v35  ;;  %v588_v1 = vrot.slane %v587_v53, 1  ;;  %v596_v2 = vadd.f32 %v595_v54, %v594_v41 }
 0x18b   : > { %v564_v56 = vadd.f32 %v563_v48, %v562_v43  ;;  %v612_v57 = vsel %vm611_vm5, %v610_v25, %v552_v50  ;;  %v571_v60 = vrot.slane %v570_v52, 2  ;;  %v603_v5 = vrot.slane %v602_v59, 1 }
 0x18c   : > { %v582_v8 = vmul.f32 0.125, %v581_v62  ;;  %v589_v10 = vmax.f32 %v587_v53, %v588_v1  ;;  %v597_v11 = vmul.f32 0.125, %v596_v2  ;;  %v641_v19 = vlaneseq }
 0x18d   : > { %v565_v61 = vrot.slane %v564_v56, 1  ;;  %v572_v0 = vmax.f32 %v570_v52, %v571_v60  ;;  %v604_v13 = vmax.f32 %v602_v59, %v603_v5  ;;  %v646_v30 = vstv %s1993_s30  ;;  %s2013_s30 = spop %2012 }
 0x18e   : > { %v2298_v20 = vshrl.u32 %v641_v19, 7  ;;  %v632_v43 = vstv %s2302_s22  ;;  %v663_v44 = vstv %s1995_s9  ;;  %v680_v45 = vstv %s1997_s10  ;;  %s2015_s9 = spop %2014 }
 0x18f   : > { %v566_v3 = vadd.f32 %v565_v61, %v564_v56  ;;  %v573_v6 = vrot.slane %v572_v0, 1  ;;  %v697_v61 = vstv %s1999_s11  ;;  %v709_v62 = vstv %s2001_s12  ;;  %s2017_s10 = spop %2016 }
 0x190   : > { %v660_v21 = vsub.s32 1, %v2298_v20  ;;  %v643_v22 = vsub.s32 0, %v2298_v20  ;;  %v694_v24 = vsub.s32 3, %v2298_v20  ;;  %v677_v28 = vsub.s32 2, %v2298_v20  ;;  %s2019_s11 = spop %2018 }
 0x191   : > { %v567_v7 = vmul.f32 0.125, %v566_v3  ;;  %v574_v9 = vmax.f32 %v572_v0, %v573_v6  ;;  %v706_v29 = vsub.s32 4, %v2298_v20  ;;  %v723_v38 = vsub.s32 5, %v2298_v20  ;;  %s2021_s12 = spop %2020 }
 0x192   : > { %v2308_v25 = vrot.slane %v481_v23, %v660_v21  ;;  %v2310_v26 = vrot.slane %v481_v23, %v643_v22  ;;  %v2316_v36 = vrot.slane %v481_v23, %v694_v24  ;;  %v2321_v41 = vrot.slane %v481_v23, %v677_v28  ;;  %v2347_v21 = vld [vmem:[%s2787_s2 + $0x8] ss:$0 sm:$0xff] }
 0x193   : > { %v614_v12 = vsel %vm613_vm6, %v612_v57, %v567_v7  ;;  %v623_v15 = vsel %vm613_vm6, %v622_v51, %v574_v9  ;;  %v2324_v46 = vrot.slane %v481_v23, %v706_v29  ;;  %v740_v50 = vsub.s32 6, %v2298_v20 }
 0x194   : > { %v616_v14 = vsel %vm615_vm7, %v614_v12, %v582_v8  ;;  %v624_v17 = vsel %vm615_vm7, %v623_v15, %v589_v10  ;;  %v2329_v53 = vrot.slane %v481_v23, %v723_v38  ;;  %v757_v54 = vsub.s32 7, %v2298_v20 }
 0x195   : > { %v2262_v16 = vsel %vm617_vm8, %v616_v14, %v597_v11  ;;  %v2264_v18 = vsel %vm617_vm8, %v624_v17, %v604_v13  ;;  %v2336_v3 = vrot.slane %v481_v23, %v740_v50  ;;  %v726_v13 = vstv %s2003_s29  ;;  %s2023_s29 = spop %2022 }
 0x196   : > { %653 = vrot.lane.b32.xlu1 %v2262_v16, %s2099_s17  ;;  %636 = vrot.lane.b32.xlu0 %v2262_v16, %s2100_s18  ;;  %v708_v0 = vmul.f32 %v2324_v46, %v2262_v16  ;;  %v2341_v12 = vrot.slane %v481_v23, %v757_v54  ;;  %v743_v20 = vstv %s2005_s13  ;;  %s2025_s13 = spop %2024  ;;  %vm2104_vm3 = vmmov 0  }
 0x197   : > { %vm1274_vm4 = vcmask 588800  }
 0x198   : > { %v710_v14 = vmul.f32 %v709_v62, %v708_v0  ;;  %v814_v0 = vstv %s2015_s9 }
 0x19a   : > { %687 = vrot.lane.b32.xlu1 %v2262_v16, %s2101_s19  ;;  %670 = vrot.lane.b32.xlu0 %v2262_v16, %s2102_s20 }
 0x19e   : > { %733 = vrot.lane.b32.xlu1 %v2262_v16, %s2087_s21  ;;  %716 = vrot.lane.b32.xlu0 %v2262_v16, %s2081_s15 }
 0x1a2   : > { %767 = vrot.lane.b32.xlu1 %v2262_v16, %s2089_s23  ;;  %750 = vrot.lane.b32.xlu0 %v2262_v16, %s2090_s24 }
 0x1a6   : > { %797 = vrot.lane.b32.xlu1 %v2264_v18, %s2099_s17  ;;  %785 = vrot.lane.b32.xlu0 %v2264_v18, %s2100_s18 }
 0x1aa   : > { %821 = vrot.lane.b32.xlu1 %v2264_v18, %s2101_s19  ;;  %809 = vrot.lane.b32.xlu0 %v2264_v18, %s2102_s20 }
 0x1ae   : > { %853 = vrot.lane.b32.xlu1 %v2264_v18, %s2087_s21  ;;  %841 = vrot.lane.b32.xlu0 %v2264_v18, %s2081_s15 }
 0x1b2   : > { %877 = vrot.lane.b32.xlu1 %v2264_v18, %s2089_s23  ;;  %865 = vrot.lane.b32.xlu0 %v2264_v18, %s2090_s24 }
 0x208   : > { %v654_v31 = vpop.permute.xlu1 %653  ;;  %v637_v33 = vpop.permute.xlu0 %636 }
 0x209   : > { %v657_v34 = vsel %vm656_vm9, 0.0, %v654_v31  ;;  %v640_v35 = vsel %vm639_vm10, 0.0, %v637_v33 }
 0x20a   : > { %v662_v39 = vmul.f32 %v2308_v25, %v657_v34  ;;  %v645_v40 = vmul.f32 %v2310_v26, %v640_v35 }
 0x20c   : > { %v647_v47 = vmul.f32 %v646_v30, %v645_v40  ;;  %v688_v48 = vpop.permute.xlu1 %687  ;;  %v671_v49 = vpop.permute.xlu0 %670  ;;  %v664_v56 = vmul.f32 %v663_v44, %v662_v39  ;;  %v760_v30 = vstv %s2007_s14  ;;  %v777_v39 = vstv %s2009_s25  ;;  %s2027_s14 = spop %2026 }
 0x20d   : > { %v691_v51 = vsel %vm690_vm11, 0.0, %v688_v48  ;;  %v674_v52 = vsel %vm673_vm12, 0.0, %v671_v49  ;;  %v790_v48 = vstv %s2011_s26 }
 0x20e   : > { %v648_v57 = vadd.f32 %v647_v47, %v632_v43  ;;  %v696_v59 = vmul.f32 %v2316_v36, %v691_v51  ;;  %v679_v60 = vmul.f32 %v2321_v41, %v674_v52 }
 0x210   : > { %v665_v1 = vadd.f32 %v664_v56, %v648_v57  ;;  %v681_v2 = vmul.f32 %v680_v45, %v679_v60  ;;  %v734_v5 = vpop.permute.xlu1 %733  ;;  %v717_v6 = vpop.permute.xlu0 %716  ;;  %v698_v9 = vmul.f32 %v697_v61, %v696_v59  ;;  %v802_v56 = vstv %s2013_s30  ;;  %s1814_s30 = sshll.u32 %s2795_s28, 4 }
 0x211   : > { %v737_v7 = vsel %vm736_vm13, %v734_v5, 0.0  ;;  %v720_v8 = vsel %vm719_vm14, %v717_v6, 0.0 }
 0x212   : > { %v682_v10 = vadd.f32 %v681_v2, %v665_v1  ;;  %v725_v11 = vmul.f32 %v2329_v53, %v720_v8  ;;  %v742_v16 = vmul.f32 %v2336_v3, %v737_v7  ;;  %v826_v8 = vstv %s2017_s10 }
 0x214   : > { %v699_v15 = vadd.f32 %v698_v9, %v682_v10  ;;  %v768_v17 = vpop.permute.xlu1 %767  ;;  %v751_v19 = vpop.permute.xlu0 %750  ;;  %v727_v28 = vmul.f32 %v726_v13, %v725_v11  ;;  %v744_v31 = vmul.f32 %v743_v20, %v742_v16  ;;  %v833_v10 = vmul.f32 %v2324_v46, %v2264_v18 }
 0x215   : > { %v771_v22 = vsel %vm770_vm15, %v768_v17, 0.0  ;;  %v754_v24 = vsel %vm753_vm0, %v751_v19, 0.0 }
 0x216   : > { %v711_v23 = vadd.f32 %v710_v14, %v699_v15  ;;  %v759_v29 = vmul.f32 %v2341_v12, %v754_v24  ;;  %v776_v34 = vmul.f32 %v2347_v21, %v771_v22  ;;  %v834_v14 = vstv %s2019_s11  ;;  %s325_s11 = scalar_lea.vmem %s2793_s8, %s1814_s30 }
 0x217   : > { %v846_v24 = vstv %s2021_s12 }
 0x218   : > { %v728_v33 = vadd.f32 %v727_v28, %v711_v23  ;;  %v798_v35 = vpop.permute.xlu1 %797  ;;  %v786_v38 = vpop.permute.xlu0 %785  ;;  %v761_v45 = vmul.f32 %v760_v30, %v759_v29  ;;  %v778_v49 = vmul.f32 %v777_v39, %v776_v34  ;;  %v835_v28 = vmul.f32 %v834_v14, %v833_v10 }
 0x219   : > { %v800_v40 = vsel %vm656_vm9, 0.0, %v798_v35  ;;  %v788_v43 = vsel %vm639_vm10, 0.0, %v786_v38  ;;  %v858_v30 = vstv %s2023_s29  ;;  %v870_v38 = vstv %s2025_s13 }
 0x21a   : > { %v745_v44 = vadd.f32 %v744_v31, %v728_v33  ;;  %v789_v47 = vmul.f32 %v788_v43, %v2310_v26  ;;  %v801_v51 = vmul.f32 %v800_v40, %v2308_v25  ;;  %v2103_v10 = vmov 0.0  }
 0x21b   : > { %1878 = vmatprep.subr.bf16.mxu1 %v2103_v10  ;;  %1892 = vmatprep.subr.bf16.mxu0 %v2103_v10 }
 0x21c   : > { %v762_v50 = vadd.f32 %v761_v45, %v745_v44  ;;  %v822_v52 = vpop.permute.xlu1 %821  ;;  %v810_v54 = vpop.permute.xlu0 %809  ;;  %v791_v61 = vmul.f32 %v790_v48, %v789_v47  ;;  %v803_v1 = vmul.f32 %v802_v56, %v801_v51  ;;  %v882_v44 = vstv %s2027_s14  ;;  %1888 = vmatprep.mubr.msk.bf16.mxu1 %vm2104_vm3, %v2103_v10  ;;  %1902 = vmatprep.mubr.msk.bf16.mxu0 %vm2104_vm3, %v2103_v10 }
 0x21d   : > { %v824_v57 = vsel %vm690_vm11, 0.0, %v822_v52  ;;  %v812_v59 = vsel %vm673_vm12, 0.0, %v810_v54 }
 0x21e   : > { %v779_v60 = vadd.f32 %v778_v49, %v762_v50  ;;  %v813_v62 = vmul.f32 %v812_v59, %v2321_v41  ;;  %v825_v5 = vmul.f32 %v824_v57, %v2316_v36 }
 0x220   : > { %v792_v2 = vadd.f32 %v791_v61, %v779_v60  ;;  %v854_v6 = vpop.permute.xlu1 %853  ;;  %v842_v7 = vpop.permute.xlu0 %841  ;;  %v815_v13 = vmul.f32 %v814_v0, %v813_v62  ;;  %v827_v16 = vmul.f32 %v826_v8, %v825_v5 }
 0x221   : > { %v844_v9 = vsel %vm719_vm14, %v842_v7, 0.0  ;;  %v856_v15 = vsel %vm736_vm13, %v854_v6, 0.0 }
 0x222   : > { %v804_v11 = vadd.f32 %v803_v1, %v792_v2  ;;  %v845_v19 = vmul.f32 %v844_v9, %v2329_v53  ;;  %v857_v29 = vmul.f32 %v856_v15, %v2336_v3 }
 0x224   : > { %v816_v17 = vadd.f32 %v815_v13, %v804_v11  ;;  %v878_v20 = vpop.permute.xlu1 %877  ;;  %v866_v22 = vpop.permute.xlu0 %865  ;;  %v847_v34 = vmul.f32 %v846_v24, %v845_v19  ;;  %v859_v40 = vmul.f32 %v858_v30, %v857_v29 }
 0x225   : > { %v868_v23 = vsel %vm753_vm0, %v866_v22, 0.0  ;;  %v880_v31 = vsel %vm770_vm15, %v878_v20, 0.0 }
 0x226   : > { %v828_v18 = vadd.f32 %v827_v16, %v816_v17  ;;  %v869_v35 = vmul.f32 %v868_v23, %v2341_v12  ;;  %v881_v43 = vmul.f32 %v2347_v21, %v880_v31 }
 0x228   : > { %v836_v33 = vadd.f32 %v835_v28, %v828_v18  ;;  %v871_v47 = vmul.f32 %v870_v38, %v869_v35  ;;  %v883_v49 = vmul.f32 %v882_v44, %v881_v43  ;;  %v1257_v43 = vld [vmem:[%s2791_s6] sm:$0xff]  ;;  %v1698_v44 = vld [vmem:[%s2792_s7 + $0x8] sm:$0xff] }
 0x22a   : > { %v848_v39 = vadd.f32 %v847_v34, %v836_v33 }
 0x22c   : > { %v860_v45 = vadd.f32 %v859_v40, %v848_v39  ;;  %v1258_v40 = vld [vmem:[%s2791_s6 + $0x8] sm:$0xff] }
 0x22e   : > { %v872_v48 = vadd.f32 %v871_v47, %v860_v45  ;;  %v1697_v45 = vld [vmem:[%s2792_s7] sm:$0xff] }
 0x230   : > { %v884_v50 = vadd.f32 %v883_v49, %v872_v48 }
 0x232   : > { %v886_v51 = vmin.f32 %v884_v50, 0.0  ;;  %vm885_vm2 = vcmp.gt.f32.partialorder %v884_v50, 0.0 }
 0x234   : > { %v887_v52 = vmul.f32 1.442695, %v886_v51 }
 0x236   : > { %2065 = vpow2.f32 %v887_v52 }
 0x240   : > { %v2066_v54 = vpop.eup %2065 }
 0x241   : > { %v1799_v56 = vadd.f32 -1.0, %v2066_v54 }
 0x243   : > { %v890_v57 = vsel %vm885_vm2, %v884_v50, %v1799_v56  ;;  %v1700_v56 = vmul.f32 0.125, %v1698_v44 }
 0x244   : > { %v891_v59 = vmul.f32 0.999995, %v890_v57  ;;  %v1699_v57 = vmul.f32 0.125, %v1697_v45 }
 0x246   : > { %v892_v60 = vsel %vm483_vm1, %v891_v59, 0.0 }
 0x247   : > { %v893_v61 = vrot.slane %v892_v60, 4 }
 0x249   : > { %v894_v62 = vadd.f32 %v893_v61, %v892_v60 }
 0x24b   : > { %v895_v0 = vrot.slane %v894_v62, 2 }
 0x24d   : > { %v896_v1 = vadd.f32 %v895_v0, %v894_v62 }
 0x24f   : > { %v897_v2 = vrot.slane %v896_v1, 1 }
 0x251   : > { %v898_v5 = vadd.f32 %v897_v2, %v896_v1 }
 0x253   : > { %v1800_v6 = vmul.f32 -0.125, %v898_v5 }
 0x255   : > { %v901_v7 = vmul.f32 1.442695, %v1800_v6 }
 0x257   : > { %2067 = vpow2.f32 %v901_v7 }
 0x261   : > { %v2068_v8 = vpop.eup %2067 }
 0x262   : > { %v903_v9 = vadd.f32 1.0, %v2068_v8 }
 0x264   : > { %2069 = vrcp.f32 %v903_v9 }
 0x26e   : > { %v2070_v11 = vpop.eup %2069 }
 0x26f   : > { %v2375_v13 = vmul.f32 %v2070_v11, %v2212_v58  ;;  %v2378_v14 = vmul.f32 %v2070_v11, %v2224_v4  ;;  %v2381_v15 = vmul.f32 %v2070_v11, %v2206_v55  ;;  %v2384_v16 = vmul.f32 %v2070_v11, %v2218_v63 }
 0x270   : > { %v2387_v17 = vmul.f32 %v2070_v11, %v2232_v32  ;;  %v2390_v19 = vmul.f32 %v2070_v11, %v2236_v42  ;;  %v2393_v20 = vmul.f32 %v2070_v11, %v2230_v27  ;;  %v2396_v58 = vmul.f32 %v2070_v11, %v2234_v37 }
 0x271   : > { %962 = vrot.lane.b32.xlu1 %v2375_v13, %s2099_s17  ;;  %922 = vrot.lane.b32.xlu0 %v2375_v13, %s2100_s18  ;;  %v1083_v62 = vmul.f32 %v2378_v14, %v2324_v46  ;;  %v1082_v5 = vmul.f32 %v2375_v13, %v2324_v46 }
 0x275   : > { %964 = vrot.lane.b32.xlu1 %v2378_v14, %s2099_s17  ;;  %924 = vrot.lane.b32.xlu0 %v2378_v14, %s2100_s18 }
 0x279   : > { %1042 = vrot.lane.b32.xlu1 %v2375_v13, %s2101_s19  ;;  %1002 = vrot.lane.b32.xlu0 %v2375_v13, %s2102_s20 }
 0x27d   : > { %1044 = vrot.lane.b32.xlu1 %v2378_v14, %s2101_s19  ;;  %1004 = vrot.lane.b32.xlu0 %v2378_v14, %s2102_s20 }
 0x281   : > { %1092 = vrot.lane.b32.xlu1 %v2378_v14, %s2081_s15  ;;  %1090 = vrot.lane.b32.xlu0 %v2375_v13, %s2081_s15 }
 0x285   : > { %1170 = vrot.lane.b32.xlu1 %v2375_v13, %s2090_s24  ;;  %1130 = vrot.lane.b32.xlu0 %v2375_v13, %s2087_s21 }
 0x289   : > { %1172 = vrot.lane.b32.xlu1 %v2378_v14, %s2090_s24  ;;  %1132 = vrot.lane.b32.xlu0 %v2378_v14, %s2087_s21 }
 0x28d   : > { %1212 = vrot.lane.b32.xlu1 %v2378_v14, %s2089_s23  ;;  %1210 = vrot.lane.b32.xlu0 %v2375_v13, %s2089_s23 }
 0x291   : > { %966 = vrot.lane.b32.xlu1 %v2381_v15, %s2099_s17  ;;  %926 = vrot.lane.b32.xlu0 %v2381_v15, %s2100_s18 }
 0x295   : > { %968 = vrot.lane.b32.xlu1 %v2384_v16, %s2099_s17  ;;  %928 = vrot.lane.b32.xlu0 %v2384_v16, %s2100_s18 }
 0x299   : > { %1046 = vrot.lane.b32.xlu1 %v2381_v15, %s2101_s19  ;;  %1006 = vrot.lane.b32.xlu0 %v2381_v15, %s2102_s20 }
 0x29d   : > { %1048 = vrot.lane.b32.xlu1 %v2384_v16, %s2101_s19  ;;  %1008 = vrot.lane.b32.xlu0 %v2384_v16, %s2102_s20 }
 0x2a1   : > { %1096 = vrot.lane.b32.xlu1 %v2384_v16, %s2081_s15  ;;  %1094 = vrot.lane.b32.xlu0 %v2381_v15, %s2081_s15 }
 0x2a5   : > { %1174 = vrot.lane.b32.xlu1 %v2381_v15, %s2090_s24  ;;  %1134 = vrot.lane.b32.xlu0 %v2381_v15, %s2087_s21 }
 0x2a9   : > { %1176 = vrot.lane.b32.xlu1 %v2384_v16, %s2090_s24  ;;  %1136 = vrot.lane.b32.xlu0 %v2384_v16, %s2087_s21 }
 0x2ad   : > { %1216 = vrot.lane.b32.xlu1 %v2384_v16, %s2089_s23  ;;  %1214 = vrot.lane.b32.xlu0 %v2381_v15, %s2089_s23 }
 0x2b1   : > { %970 = vrot.lane.b32.xlu1 %v2387_v17, %s2099_s17  ;;  %930 = vrot.lane.b32.xlu0 %v2387_v17, %s2100_s18 }
 0x2b5   : > { %972 = vrot.lane.b32.xlu1 %v2390_v19, %s2099_s17  ;;  %932 = vrot.lane.b32.xlu0 %v2390_v19, %s2100_s18 }
 0x2b9   : > { %1050 = vrot.lane.b32.xlu1 %v2387_v17, %s2101_s19  ;;  %1010 = vrot.lane.b32.xlu0 %v2387_v17, %s2102_s20 }
 0x2bd   : > { %1052 = vrot.lane.b32.xlu1 %v2390_v19, %s2101_s19  ;;  %1012 = vrot.lane.b32.xlu0 %v2390_v19, %s2102_s20 }
 0x2c1   : > { %1100 = vrot.lane.b32.xlu1 %v2390_v19, %s2081_s15  ;;  %1098 = vrot.lane.b32.xlu0 %v2387_v17, %s2081_s15 }
 0x2c5   : > { %1178 = vrot.lane.b32.xlu1 %v2387_v17, %s2090_s24  ;;  %1138 = vrot.lane.b32.xlu0 %v2387_v17, %s2087_s21 }
 0x2c9   : > { %1180 = vrot.lane.b32.xlu1 %v2390_v19, %s2090_s24  ;;  %1140 = vrot.lane.b32.xlu0 %v2390_v19, %s2087_s21 }
 0x2cd   : > { %1220 = vrot.lane.b32.xlu1 %v2390_v19, %s2089_s23  ;;  %1218 = vrot.lane.b32.xlu0 %v2387_v17, %s2089_s23 }
 0x2d1   : > { %974 = vrot.lane.b32.xlu1 %v2393_v20, %s2099_s17  ;;  %934 = vrot.lane.b32.xlu0 %v2393_v20, %s2100_s18 }
 0x2d5   : > { %976 = vrot.lane.b32.xlu1 %v2396_v58, %s2099_s17  ;;  %936 = vrot.lane.b32.xlu0 %v2396_v58, %s2100_s18 }
 0x2d9   : > { %1054 = vrot.lane.b32.xlu1 %v2393_v20, %s2101_s19  ;;  %1014 = vrot.lane.b32.xlu0 %v2393_v20, %s2102_s20 }
 0x2dd   : > { %1056 = vrot.lane.b32.xlu1 %v2396_v58, %s2101_s19  ;;  %1016 = vrot.lane.b32.xlu0 %v2396_v58, %s2102_s20 }
 0x2e1   : > { %1104 = vrot.lane.b32.xlu1 %v2396_v58, %s2081_s15  ;;  %1102 = vrot.lane.b32.xlu0 %v2393_v20, %s2081_s15 }
 0x2e3   : > { %v963_v55 = vpop.permute.xlu1 %962  ;;  %v923_v63 = vpop.permute.xlu0 %922 }
 0x2e4   : > { %v986_v4 = vsel %vm656_vm9, 0.0, %v963_v55  ;;  %v946_v27 = vsel %vm639_vm10, 0.0, %v923_v63 }
 0x2e5   : > { %v994_v32 = vmul.f32 %v986_v4, %v2308_v25  ;;  %v954_v37 = vmul.f32 %v946_v27, %v2310_v26  ;;  %1182 = vrot.lane.b32.xlu1 %v2393_v20, %s2090_s24  ;;  %1142 = vrot.lane.b32.xlu0 %v2393_v20, %s2087_s21 }
 0x2e7   : > { %v965_v42 = vpop.permute.xlu1 %964  ;;  %v925_v22 = vpop.permute.xlu0 %924  ;;  %v1252_v24 = vpack.c.bf16 %v994_v32, %v954_v37 }
 0x2e8   : > { %v987_v23 = vsel %vm656_vm9, 0.0, %v965_v42  ;;  %v947_v28 = vsel %vm639_vm10, 0.0, %v925_v22 }
 0x2e9   : > { %v995_v29 = vmul.f32 %v987_v23, %v2308_v25  ;;  %v955_v18 = vmul.f32 %v947_v28, %v2310_v26  ;;  %1184 = vrot.lane.b32.xlu1 %v2396_v58, %s2090_s24  ;;  %1144 = vrot.lane.b32.xlu0 %v2396_v58, %s2087_s21 }
 0x2ea   : > { %1879 = vmatpush3.bf16.msra.mxu1 %v1252_v24 }
 0x2eb   : > { %v1326_v30 = vpack.c.bf16 %v995_v29, %v955_v18  ;;  %v1043_v31 = vpop.permute.xlu1 %1042  ;;  %v1003_v33 = vpop.permute.xlu0 %1002  ;;  %1880 = vmatprep.subr.bf16.mxu1 %v2103_v10 }
 0x2ec   : > { %v1066_v34 = vsel %vm690_vm11, 0.0, %v1043_v31  ;;  %v1026_v35 = vsel %vm673_vm12, 0.0, %v1003_v33 }
 0x2ed   : > { %v1074_v38 = vmul.f32 %v1066_v34, %v2316_v36  ;;  %v1034_v39 = vmul.f32 %v1026_v35, %v2321_v41  ;;  %1224 = vrot.lane.b32.xlu1 %v2396_v58, %s2089_s23  ;;  %1222 = vrot.lane.b32.xlu0 %v2393_v20, %s2089_s23 }
 0x2ee   : > { %1893 = vmatpush3.bf16.msra.mxu0 %v1326_v30 }
 0x2ef   : > { %v1253_v47 = vpack.c.bf16 %v1074_v38, %v1034_v39  ;;  %v1045_v48 = vpop.permute.xlu1 %1044  ;;  %v1005_v49 = vpop.permute.xlu0 %1004  ;;  %1894 = vmatprep.subr.bf16.mxu0 %v2103_v10 }
 0x2f0   : > { %v1067_v50 = vsel %vm690_vm11, 0.0, %v1045_v48  ;;  %v1027_v51 = vsel %vm673_vm12, 0.0, %v1005_v49  ;;  %v2595_v49 = vld [vmem:[%s2790_s5] sm:$0xff]  }
 0x2f1   : > { %v1075_v52 = vmul.f32 %v1067_v50, %v2316_v36  ;;  %v1035_v54 = vmul.f32 %v1027_v51, %v2321_v41  ;;  %1266 = vperm.xlu1 %2062, %v1258_v40   ;;  %1261 = vperm.xlu0 %2061, %v1257_v43  }
 0x2f2   : > { %1881 = vmatpush3.bf16.msra.mxu1 %v1253_v47 }
 0x2f3   : > { %v1327_v59 = vpack.c.bf16 %v1075_v52, %v1035_v54  ;;  %v1093_v60 = vpop.permute.xlu1 %1092  ;;  %v1091_v61 = vpop.permute.xlu0 %1090  ;;  %1882 = vmatprep.subr.bf16.mxu1 %v2103_v10 }
 0x2f4   : > { %v1115_v0 = vsel %vm719_vm14, %v1093_v60, 0.0  ;;  %v1114_v1 = vsel %vm719_vm14, %v1091_v61, 0.0 }
 0x2f5   : > { %v1123_v2 = vmul.f32 %v1115_v0, %v2329_v53  ;;  %v1122_v6 = vmul.f32 %v1114_v1, %v2329_v53  ;;  %1708 = vperm.xlu1 %2062, %v1700_v56   ;;  %1703 = vperm.xlu0 %2061, %v1699_v57  }
 0x2f6   : > { %1895 = vmatpush3.bf16.msra.mxu0 %v1327_v59 }
 0x2f7   : > { %v1328_v7 = vpack.c.bf16 %v1123_v2, %v1083_v62  ;;  %v1254_v8 = vpack.c.bf16 %v1122_v6, %v1082_v5  ;;  %v1171_v9 = vpop.permute.xlu1 %1170  ;;  %v1131_v11 = vpop.permute.xlu0 %1130  ;;  %1896 = vmatprep.subr.bf16.mxu0 %v2103_v10 }
 0x2f8   : > { %v1194_v14 = vsel %vm753_vm0, %v1171_v9, 0.0  ;;  %v1154_v55 = vsel %vm736_vm13, %v1131_v11, 0.0 }
 0x2f9   : > { %v1202_v63 = vmul.f32 %v1194_v14, %v2341_v12  ;;  %v1162_v4 = vmul.f32 %v1154_v55, %v2336_v3  ;;  %1883 = vmatpush3.bf16.msra.mxu1 %v1254_v8 }
 0x2fa   : > { %1897 = vmatpush3.bf16.msra.mxu0 %v1328_v7  ;;  %1884 = vmatprep.subr.bf16.mxu1 %v2103_v10 }
 0x2fb   : > { %v1255_v13 = vpack.c.bf16 %v1202_v63, %v1162_v4  ;;  %v1173_v27 = vpop.permute.xlu1 %1172  ;;  %v1133_v32 = vpop.permute.xlu0 %1132  ;;  %1898 = vmatprep.subr.bf16.mxu0 %v2103_v10 }
 0x2fc   : > { %v1195_v37 = vsel %vm753_vm0, %v1173_v27, 0.0  ;;  %v1155_v42 = vsel %vm736_vm13, %v1133_v32, 0.0 }
 0x2fd   : > { %v1203_v22 = vmul.f32 %v1195_v37, %v2341_v12  ;;  %v1163_v24 = vmul.f32 %v1155_v42, %v2336_v3  ;;  %1885 = vmatpush3.bf16.msra.mxu1 %v1255_v13  ;;  %v1085_v37 = vmul.f32 %v2384_v16, %v2324_v46 }
 0x2fe   : > { %1886 = vmatprep.subr.bf16.mxu1 %v2103_v10 }
 0x2ff   : > { %v1329_v23 = vpack.c.bf16 %v1203_v22, %v1163_v24  ;;  %v1213_v28 = vpop.permute.xlu1 %1212  ;;  %v1211_v29 = vpop.permute.xlu0 %1210  ;;  %v1084_v22 = vmul.f32 %v2381_v15, %v2324_v46 }
 0x300   : > { %v1235_v18 = vsel %vm770_vm15, %v1213_v28, 0.0  ;;  %v1234_v30 = vsel %vm770_vm15, %v1211_v29, 0.0 }
 0x301   : > { %v1243_v31 = vmul.f32 %v2347_v21, %v1235_v18  ;;  %v1242_v33 = vmul.f32 %v2347_v21, %v1234_v30  ;;  %1899 = vmatpush3.bf16.msra.mxu0 %v1329_v23 }
 0x302   : > { %1900 = vmatprep.subr.bf16.mxu0 %v2103_v10 }
 0x303   : > { %v1330_v34 = vpack.c.bf16 %v1243_v31, %v1243_v31  ;;  %v1256_v35 = vpack.c.bf16 %v1242_v33, %v1242_v33  ;;  %v967_v38 = vpop.permute.xlu1 %966  ;;  %v927_v39 = vpop.permute.xlu0 %926 }
 0x304   : > { %v988_v40 = vsel %vm656_vm9, 0.0, %v967_v38  ;;  %v948_v43 = vsel %vm639_vm10, 0.0, %v927_v39 }
 0x305   : > { %v996_v44 = vmul.f32 %v988_v40, %v2308_v25  ;;  %v956_v45 = vmul.f32 %v948_v43, %v2310_v26  ;;  %v1279_v47 = vsel %vm611_vm5, %v1256_v35, 0  ;;  %v1332_v48 = vsel %vm611_vm5, %v1330_v34, 0 }
 0x306   : > { %1887 = vmatpush3.bf16.msra.mxu1 %v1279_v47  ;;  %1901 = vmatpush3.bf16.msra.mxu0 %v1332_v48 }
 0x307   : > { %v1379_v50 = vpack.c.bf16 %v996_v44, %v956_v45  ;;  %v969_v51 = vpop.permute.xlu1 %968  ;;  %v929_v52 = vpop.permute.xlu0 %928  ;;  %1906 = vmatprep.subr.bf16.mxu1 %v2103_v10  ;;  %1920 = vmatprep.subr.bf16.mxu0 %v2103_v10 }
 0x308   : > { %v989_v54 = vsel %vm656_vm9, 0.0, %v969_v51  ;;  %v949_v56 = vsel %vm639_vm10, 0.0, %v929_v52 }
 0x309   : > { %v997_v57 = vmul.f32 %v989_v54, %v2308_v25  ;;  %v957_v59 = vmul.f32 %v949_v56, %v2310_v26  ;;  %1889 = vmatmul.mubr.msk.bf16.vlgmr.msra.gmra.mrb[0].mxu1 %vm1274_vm4, %v2595_v49  ;;  %1903 = vmatmul.mubr.msk.bf16.vlgmr.msra.gmra.mrb[8].mxu0 %vm1274_vm4, %v2595_v49 }
 0x30a   : > { %1907 = vmatpush3.bf16.msra.mxu1 %v1379_v50  ;;  %1916 = vmatprep.mubr.msk.bf16.mxu1 %vm2104_vm3, %v2103_v10 }
 0x30b   : > { %v1432_v60 = vpack.c.bf16 %v997_v57, %v957_v59  ;;  %v1047_v61 = vpop.permute.xlu1 %1046  ;;  %v1007_v62 = vpop.permute.xlu0 %1006  ;;  %1908 = vmatprep.subr.bf16.mxu1 %v2103_v10  ;;  %1930 = vmatprep.mubr.msk.bf16.mxu0 %vm2104_vm3, %v2103_v10 }
 0x30c   : > { %v1068_v0 = vsel %vm690_vm11, 0.0, %v1047_v61  ;;  %v1028_v1 = vsel %vm673_vm12, 0.0, %v1007_v62 }
 0x30d   : > { %v1076_v2 = vmul.f32 %v1068_v0, %v2316_v36  ;;  %v1036_v5 = vmul.f32 %v1028_v1, %v2321_v41  ;;  %1921 = vmatpush3.bf16.msra.mxu0 %v1432_v60 }
 0x30e   : > { %1922 = vmatprep.subr.bf16.mxu0 %v2103_v10 }
 0x30f   : > { %v1380_v6 = vpack.c.bf16 %v1076_v2, %v1036_v5  ;;  %v1049_v7 = vpop.permute.xlu1 %1048  ;;  %v1009_v8 = vpop.permute.xlu0 %1008 }
 0x310   : > { %v1069_v9 = vsel %vm690_vm11, 0.0, %v1049_v7  ;;  %v1029_v11 = vsel %vm673_vm12, 0.0, %v1009_v8 }
 0x311   : > { %v1077_v14 = vmul.f32 %v1069_v9, %v2316_v36  ;;  %v1037_v55 = vmul.f32 %v1029_v11, %v2321_v41  ;;  %1909 = vmatpush3.bf16.msra.mxu1 %v1380_v6 }
 0x312   : > { %1910 = vmatprep.subr.bf16.mxu1 %v2103_v10 }
 0x313   : > { %v1433_v63 = vpack.c.bf16 %v1077_v14, %v1037_v55  ;;  %v1097_v4 = vpop.permute.xlu1 %1096  ;;  %v1095_v13 = vpop.permute.xlu0 %1094 }
 0x314   : > { %v1117_v27 = vsel %vm719_vm14, %v1097_v4, 0.0  ;;  %v1116_v32 = vsel %vm719_vm14, %v1095_v13, 0.0 }
 0x315   : > { %v1125_v42 = vmul.f32 %v1117_v27, %v2329_v53  ;;  %v1124_v24 = vmul.f32 %v1116_v32, %v2329_v53  ;;  %1923 = vmatpush3.bf16.msra.mxu0 %v1433_v63 }
 0x316   : > { %1924 = vmatprep.subr.bf16.mxu0 %v2103_v10 }
 0x317   : > { %v1434_v23 = vpack.c.bf16 %v1125_v42, %v1085_v37  ;;  %v1381_v28 = vpack.c.bf16 %v1124_v24, %v1084_v22  ;;  %v1175_v29 = vpop.permute.xlu1 %1174  ;;  %v1135_v18 = vpop.permute.xlu0 %1134 }
 0x318   : > { %v1196_v30 = vsel %vm753_vm0, %v1175_v29, 0.0  ;;  %v1156_v31 = vsel %vm736_vm13, %v1135_v18, 0.0 }
 0x319   : > { %v1204_v16 = vmul.f32 %v1196_v30, %v2341_v12  ;;  %v1164_v33 = vmul.f32 %v1156_v31, %v2336_v3  ;;  %1911 = vmatpush3.bf16.msra.mxu1 %v1381_v28  ;;  %1925 = vmatpush3.bf16.msra.mxu0 %v1434_v23 }
 0x31a   : > { %1912 = vmatprep.subr.bf16.mxu1 %v2103_v10  ;;  %1926 = vmatprep.subr.bf16.mxu0 %v2103_v10 }
 0x31b   : > { %v1382_v15 = vpack.c.bf16 %v1204_v16, %v1164_v33  ;;  %v1177_v34 = vpop.permute.xlu1 %1176  ;;  %v1137_v35 = vpop.permute.xlu0 %1136 }
 0x31c   : > { %v1197_v38 = vsel %vm753_vm0, %v1177_v34, 0.0  ;;  %v1157_v39 = vsel %vm736_vm13, %v1137_v35, 0.0  ;;  %v1087_v34 = vmul.f32 %v2390_v19, %v2324_v46 }
 0x31d   : > { %v1205_v40 = vmul.f32 %v1197_v38, %v2341_v12  ;;  %v1165_v43 = vmul.f32 %v1157_v39, %v2336_v3  ;;  %1913 = vmatpush3.bf16.msra.mxu1 %v1382_v15  ;;  %v1086_v38 = vmul.f32 %v2387_v17, %v2324_v46 }
 0x31e   : > { %1914 = vmatprep.subr.bf16.mxu1 %v2103_v10 }
 0x31f   : > { %v1435_v44 = vpack.c.bf16 %v1205_v40, %v1165_v43  ;;  %v1217_v45 = vpop.permute.xlu1 %1216  ;;  %v1215_v47 = vpop.permute.xlu0 %1214 }
 0x320   : > { %v1237_v48 = vsel %vm770_vm15, %v1217_v45, 0.0  ;;  %v1236_v50 = vsel %vm770_vm15, %v1215_v47, 0.0 }
 0x321   : > { %v1245_v51 = vmul.f32 %v2347_v21, %v1237_v48  ;;  %v1244_v52 = vmul.f32 %v2347_v21, %v1236_v50  ;;  %1927 = vmatpush3.bf16.msra.mxu0 %v1435_v44 }
 0x322   : > { %1928 = vmatprep.subr.bf16.mxu0 %v2103_v10 }
 0x323   : > { %v1436_v54 = vpack.c.bf16 %v1245_v51, %v1245_v51  ;;  %v1383_v56 = vpack.c.bf16 %v1244_v52, %v1244_v52  ;;  %v971_v57 = vpop.permute.xlu1 %970  ;;  %v931_v59 = vpop.permute.xlu0 %930 }
 0x324   : > { %v990_v60 = vsel %vm656_vm9, 0.0, %v971_v57  ;;  %v950_v61 = vsel %vm639_vm10, 0.0, %v931_v59 }
 0x325   : > { %v998_v62 = vmul.f32 %v990_v60, %v2308_v25  ;;  %v958_v0 = vmul.f32 %v950_v61, %v2310_v26  ;;  %v1385_v1 = vsel %vm611_vm5, %v1383_v56, 0  ;;  %v1438_v2 = vsel %vm611_vm5, %v1436_v54, 0 }
 0x326   : > { %1915 = vmatpush3.bf16.msra.mxu1 %v1385_v1  ;;  %1929 = vmatpush3.bf16.msra.mxu0 %v1438_v2 }
 0x327   : > { %v1485_v5 = vpack.c.bf16 %v998_v62, %v958_v0  ;;  %v973_v6 = vpop.permute.xlu1 %972  ;;  %v933_v7 = vpop.permute.xlu0 %932  ;;  %1934 = vmatprep.subr.bf16.mxu1 %v2103_v10  ;;  %1948 = vmatprep.subr.bf16.mxu0 %v2103_v10 }
 0x328   : > { %v991_v8 = vsel %vm656_vm9, 0.0, %v973_v6  ;;  %v951_v9 = vsel %vm639_vm10, 0.0, %v933_v7 }
 0x329   : > { %v999_v11 = vmul.f32 %v991_v8, %v2308_v25  ;;  %v959_v14 = vmul.f32 %v951_v9, %v2310_v26  ;;  %1917 = vmatmul.mubr.msk.bf16.vlgmr.msra.gmra.mrb[4].mxu1 %vm1274_vm4, %v2595_v49  ;;  %1931 = vmatmul.mubr.msk.bf16.vlgmr.msra.gmra.mrb[12].mxu0 %vm1274_vm4, %v2595_v49 }
 0x32a   : > { %1935 = vmatpush3.bf16.msra.mxu1 %v1485_v5  ;;  %1944 = vmatprep.mubr.msk.bf16.mxu1 %vm2104_vm3, %v2103_v10 }
 0x32b   : > { %v1538_v55 = vpack.c.bf16 %v999_v11, %v959_v14  ;;  %v1051_v63 = vpop.permute.xlu1 %1050  ;;  %v1011_v4 = vpop.permute.xlu0 %1010  ;;  %1936 = vmatprep.subr.bf16.mxu1 %v2103_v10  ;;  %1958 = vmatprep.mubr.msk.bf16.mxu0 %vm2104_vm3, %v2103_v10 }
 0x32c   : > { %v1070_v13 = vsel %vm690_vm11, 0.0, %v1051_v63  ;;  %v1030_v27 = vsel %vm673_vm12, 0.0, %v1011_v4 }
 0x32d   : > { %v1078_v32 = vmul.f32 %v1070_v13, %v2316_v36  ;;  %v1038_v37 = vmul.f32 %v1030_v27, %v2321_v41  ;;  %1949 = vmatpush3.bf16.msra.mxu0 %v1538_v55 }
 0x32e   : > { %1950 = vmatprep.subr.bf16.mxu0 %v2103_v10 }
 0x32f   : > { %v1486_v42 = vpack.c.bf16 %v1078_v32, %v1038_v37  ;;  %v1053_v22 = vpop.permute.xlu1 %1052  ;;  %v1013_v24 = vpop.permute.xlu0 %1012 }
 0x330   : > { %v1071_v23 = vsel %vm690_vm11, 0.0, %v1053_v22  ;;  %v1031_v28 = vsel %vm673_vm12, 0.0, %v1013_v24 }
 0x331   : > { %v1079_v29 = vmul.f32 %v1071_v23, %v2316_v36  ;;  %v1039_v18 = vmul.f32 %v1031_v28, %v2321_v41  ;;  %1937 = vmatpush3.bf16.msra.mxu1 %v1486_v42 }
 0x332   : > { %1938 = vmatprep.subr.bf16.mxu1 %v2103_v10 }
 0x333   : > { %v1539_v30 = vpack.c.bf16 %v1079_v29, %v1039_v18  ;;  %v1101_v31 = vpop.permute.xlu1 %1100  ;;  %v1099_v16 = vpop.permute.xlu0 %1098 }
 0x334   : > { %v1119_v33 = vsel %vm719_vm14, %v1101_v31, 0.0  ;;  %v1118_v15 = vsel %vm719_vm14, %v1099_v16, 0.0 }
 0x335   : > { %v1127_v35 = vmul.f32 %v1119_v33, %v2329_v53  ;;  %v1126_v39 = vmul.f32 %v1118_v15, %v2329_v53  ;;  %1951 = vmatpush3.bf16.msra.mxu0 %v1539_v30 }
 0x336   : > { %1952 = vmatprep.subr.bf16.mxu0 %v2103_v10 }
 0x337   : > { %v1540_v40 = vpack.c.bf16 %v1127_v35, %v1087_v34  ;;  %v1487_v43 = vpack.c.bf16 %v1126_v39, %v1086_v38  ;;  %v1179_v44 = vpop.permute.xlu1 %1178  ;;  %v1139_v45 = vpop.permute.xlu0 %1138 }
 0x338   : > { %v1198_v47 = vsel %vm753_vm0, %v1179_v44, 0.0  ;;  %v1158_v48 = vsel %vm736_vm13, %v1139_v45, 0.0 }
 0x339   : > { %v1206_v19 = vmul.f32 %v1198_v47, %v2341_v12  ;;  %v1166_v50 = vmul.f32 %v1158_v48, %v2336_v3  ;;  %1939 = vmatpush3.bf16.msra.mxu1 %v1487_v43  ;;  %1953 = vmatpush3.bf16.msra.mxu0 %v1540_v40  ;;  %v1089_v47 = vmul.f32 %v2396_v58, %v2324_v46 }
 0x33a   : > { %1940 = vmatprep.subr.bf16.mxu1 %v2103_v10  ;;  %1954 = vmatprep.subr.bf16.mxu0 %v2103_v10 }
 0x33b   : > { %v1488_v17 = vpack.c.bf16 %v1206_v19, %v1166_v50  ;;  %v1181_v51 = vpop.permute.xlu1 %1180  ;;  %v1141_v52 = vpop.permute.xlu0 %1140 }
 0x33c   : > { %v1199_v54 = vsel %vm753_vm0, %v1181_v51, 0.0  ;;  %v1159_v56 = vsel %vm736_vm13, %v1141_v52, 0.0 }
 0x33d   : > { %v1207_v57 = vmul.f32 %v1199_v54, %v2341_v12  ;;  %v1167_v59 = vmul.f32 %v1159_v56, %v2336_v3  ;;  %1941 = vmatpush3.bf16.msra.mxu1 %v1488_v17 }
 0x33e   : > { %1942 = vmatprep.subr.bf16.mxu1 %v2103_v10 }
 0x33f   : > { %v1541_v60 = vpack.c.bf16 %v1207_v57, %v1167_v59  ;;  %v1221_v61 = vpop.permute.xlu1 %1220  ;;  %v1219_v62 = vpop.permute.xlu0 %1218 }
 0x340   : > { %v1239_v0 = vsel %vm770_vm15, %v1221_v61, 0.0  ;;  %v1238_v1 = vsel %vm770_vm15, %v1219_v62, 0.0 }
 0x341   : > { %v1247_v2 = vmul.f32 %v2347_v21, %v1239_v0  ;;  %v1246_v5 = vmul.f32 %v2347_v21, %v1238_v1  ;;  %1955 = vmatpush3.bf16.msra.mxu0 %v1541_v60 }
 0x342   : > { %1956 = vmatprep.subr.bf16.mxu0 %v2103_v10 }
 0x343   : > { %v1542_v6 = vpack.c.bf16 %v1247_v2, %v1247_v2  ;;  %v1489_v7 = vpack.c.bf16 %v1246_v5, %v1246_v5  ;;  %v975_v8 = vpop.permute.xlu1 %974  ;;  %v935_v9 = vpop.permute.xlu0 %934 }
 0x344   : > { %v992_v11 = vsel %vm656_vm9, 0.0, %v975_v8  ;;  %v952_v14 = vsel %vm639_vm10, 0.0, %v935_v9 }
 0x345   : > { %v1000_v55 = vmul.f32 %v992_v11, %v2308_v25  ;;  %v960_v63 = vmul.f32 %v952_v14, %v2310_v26  ;;  %v1491_v4 = vsel %vm611_vm5, %v1489_v7, 0  ;;  %v1544_v13 = vsel %vm611_vm5, %v1542_v6, 0  ;;  %v2071_v6 = vld [vmem:[%s2787_s2 + $0x8] ss:$0 sm:$0xff] }
 0x346   : > { %1943 = vmatpush3.bf16.msra.mxu1 %v1491_v4  ;;  %1957 = vmatpush3.bf16.msra.mxu0 %v1544_v13 }
 0x347   : > { %v1591_v21 = vpack.c.bf16 %v1000_v55, %v960_v63  ;;  %v977_v27 = vpop.permute.xlu1 %976  ;;  %v937_v32 = vpop.permute.xlu0 %936  ;;  %1962 = vmatprep.subr.bf16.mxu1 %v2103_v10  ;;  %1976 = vmatprep.subr.bf16.mxu0 %v2103_v10 }
 0x348   : > { %v993_v37 = vsel %vm656_vm9, 0.0, %v977_v27  ;;  %v953_v42 = vsel %vm639_vm10, 0.0, %v937_v32 }
 0x349   : > { %v1001_v22 = vmul.f32 %v993_v37, %v2308_v25  ;;  %v961_v24 = vmul.f32 %v953_v42, %v2310_v26  ;;  %1945 = vmatmul.mubr.msk.bf16.vlgmr.msra.gmra.mrb[8].mxu1 %vm1274_vm4, %v2595_v49  ;;  %1959 = vmatmul.mubr.msk.bf16.vlgmr.msra.gmra.mrb[16].mxu0 %vm1274_vm4, %v2595_v49 }
 0x34a   : > { %1963 = vmatpush3.bf16.msra.mxu1 %v1591_v21  ;;  %1972 = vmatprep.mubr.msk.bf16.mxu1 %vm2104_vm3, %v2103_v10 }
 0x34b   : > { %v1644_v23 = vpack.c.bf16 %v1001_v22, %v961_v24  ;;  %v1055_v28 = vpop.permute.xlu1 %1054  ;;  %v1015_v29 = vpop.permute.xlu0 %1014  ;;  %1964 = vmatprep.subr.bf16.mxu1 %v2103_v10  ;;  %1986 = vmatprep.mubr.msk.bf16.mxu0 %vm2104_vm3, %v2103_v10 }
 0x34c   : > { %v1072_v25 = vsel %vm690_vm11, 0.0, %v1055_v28  ;;  %v1032_v26 = vsel %vm673_vm12, 0.0, %v1015_v29 }
 0x34d   : > { %v1080_v18 = vmul.f32 %v1072_v25, %v2316_v36  ;;  %v1040_v30 = vmul.f32 %v1032_v26, %v2321_v41  ;;  %1977 = vmatpush3.bf16.msra.mxu0 %v1644_v23 }
 0x34e   : > { %1978 = vmatprep.subr.bf16.mxu0 %v2103_v10 }
 0x34f   : > { %v1592_v31 = vpack.c.bf16 %v1080_v18, %v1040_v30  ;;  %v1057_v16 = vpop.permute.xlu1 %1056  ;;  %v1017_v33 = vpop.permute.xlu0 %1016 }
 0x350   : > { %v1073_v15 = vsel %vm690_vm11, 0.0, %v1057_v16  ;;  %v1033_v34 = vsel %vm673_vm12, 0.0, %v1017_v33 }
 0x351   : > { %v1081_v35 = vmul.f32 %v1073_v15, %v2316_v36  ;;  %v1041_v38 = vmul.f32 %v1033_v34, %v2321_v41  ;;  %1965 = vmatpush3.bf16.msra.mxu1 %v1592_v31  ;;  %v1088_v36 = vmul.f32 %v2393_v20, %v2324_v46 }
 0x352   : > { %1966 = vmatprep.subr.bf16.mxu1 %v2103_v10 }
 0x353   : > { %v1645_v39 = vpack.c.bf16 %v1081_v35, %v1041_v38  ;;  %v1105_v40 = vpop.permute.xlu1 %1104  ;;  %v1103_v43 = vpop.permute.xlu0 %1102 }
 0x354   : > { %v1121_v44 = vsel %vm719_vm14, %v1105_v40, 0.0  ;;  %v1120_v45 = vsel %vm719_vm14, %v1103_v43, 0.0 }
 0x355   : > { %v1129_v48 = vmul.f32 %v1121_v44, %v2329_v53  ;;  %v1128_v41 = vmul.f32 %v1120_v45, %v2329_v53  ;;  %1979 = vmatpush3.bf16.msra.mxu0 %v1645_v39 }
 0x356   : > { %1980 = vmatprep.subr.bf16.mxu0 %v2103_v10 }
 0x357   : > { %v1646_v19 = vpack.c.bf16 %v1129_v48, %v1089_v47  ;;  %v1593_v50 = vpack.c.bf16 %v1128_v41, %v1088_v36  ;;  %v1183_v17 = vpop.permute.xlu1 %1182  ;;  %v1143_v51 = vpop.permute.xlu0 %1142 }
 0x358   : > { %v1200_v52 = vsel %vm753_vm0, %v1183_v17, 0.0  ;;  %v1160_v54 = vsel %vm736_vm13, %v1143_v51, 0.0 }
 0x359   : > { %v1208_v58 = vmul.f32 %v1200_v52, %v2341_v12  ;;  %v1168_v56 = vmul.f32 %v1160_v54, %v2336_v3  ;;  %1967 = vmatpush3.bf16.msra.mxu1 %v1593_v50  ;;  %1981 = vmatpush3.bf16.msra.mxu0 %v1646_v19 }
 0x35a   : > { %1968 = vmatprep.subr.bf16.mxu1 %v2103_v10  ;;  %1982 = vmatprep.subr.bf16.mxu0 %v2103_v10 }
 0x35b   : > { %v1594_v46 = vpack.c.bf16 %v1208_v58, %v1168_v56  ;;  %v1185_v53 = vpop.permute.xlu1 %1184  ;;  %v1145_v20 = vpop.permute.xlu0 %1144 }
 0x35c   : > { %v1201_v57 = vsel %vm753_vm0, %v1185_v53, 0.0  ;;  %v1161_v59 = vsel %vm736_vm13, %v1145_v20, 0.0 }
 0x35d   : > { %v1209_v60 = vmul.f32 %v1201_v57, %v2341_v12  ;;  %v1169_v61 = vmul.f32 %v1161_v59, %v2336_v3  ;;  %1969 = vmatpush3.bf16.msra.mxu1 %v1594_v46 }
 0x35e   : > { %1970 = vmatprep.subr.bf16.mxu1 %v2103_v10 }
 0x35f   : > { %v1647_v62 = vpack.c.bf16 %v1209_v60, %v1169_v61  ;;  %v1225_v0 = vpop.permute.xlu1 %1224  ;;  %v1223_v1 = vpop.permute.xlu0 %1222 }
 0x360   : > { %v1241_v2 = vsel %vm770_vm15, %v1225_v0, 0.0  ;;  %v1240_v5 = vsel %vm770_vm15, %v1223_v1, 0.0 }
 0x361   : > { %v1249_v7 = vmul.f32 %v2071_v6, %v1241_v2  ;;  %v1248_v8 = vmul.f32 %v2071_v6, %v1240_v5  ;;  %1983 = vmatpush3.bf16.msra.mxu0 %v1647_v62 }
 0x362   : > { %1984 = vmatprep.subr.bf16.mxu0 %v2103_v10 }
 0x363   : > { %v1648_v3 = vpack.c.bf16 %v1249_v7, %v1249_v7  ;;  %v1595_v12 = vpack.c.bf16 %v1248_v8, %v1248_v8 }
 0x365   : > { %v1597_v9 = vsel %vm611_vm5, %v1595_v12, 0  ;;  %v1650_v11 = vsel %vm611_vm5, %v1648_v3, 0 }
 0x366   : > { %1971 = vmatpush3.bf16.msra.mxu1 %v1597_v9  ;;  %1985 = vmatpush3.bf16.msra.mxu0 %v1650_v11 }
 0x369   : > { %1973 = vmatmul.mubr.msk.bf16.vlgmr.msra.gmra.mrb[12].mxu1 %vm1274_vm4, %v2595_v49  ;;  %1987 = vmatmul.mubr.msk.bf16.vlgmr.msra.gmra.mrb[20].mxu0 %vm1274_vm4, %v2595_v49 }
 0x370   : > { %v2766_v14 = vpop.permute.xlu1 %1266  ;;  %v1262_v55 = vpop.permute.xlu0 %1261 }
 0x3dc   : > { %v1315_v63 = vpop.f32.mrb[0].mxu1  ;;  %v1368_v4 = vpop.f32.mrb[8].mxu0 }
 0x3dd   : > { %v1316_v10 = vadd.f32 %v1315_v63, %v1262_v55  ;;  %v1369_v13 = vadd.f32 %v1368_v4, %v1262_v55  ;;  %v1890_v21 = vpop.f32.mrb[1].mxu1  ;;  %v1904_v27 = vpop.f32.mrb[9].mxu0 }
 0x3de   : > { %v1318_v32 = vpop.f32.mrb[2].mxu1  ;;  %v1371_v37 = vpop.f32.mrb[10].mxu0 }
 0x3df   : > { %v1322_v42 = vmax.f32 %v1316_v10, 0.0  ;;  %v1375_v22 = vmax.f32 %v1369_v13, 0.0  ;;  %v1319_v24 = vadd.f32 %v1318_v32, %v2766_v14  ;;  %v1372_v23 = vadd.f32 %v1371_v37, %v2766_v14  ;;  %v1891_v28 = vpop.f32.mrb[3].mxu1  ;;  %v1905_v29 = vpop.f32.mrb[11].mxu0 }
 0x3e1   : > { %v1377_v49 = vadd.f32 %v1375_v22, %v1322_v42  ;;  %v1323_v25 = vmax.f32 %v1319_v24, 0.0  ;;  %v1376_v26 = vmax.f32 %v1372_v23, 0.0 }
 0x3e3   : > { %v1378_v18 = vadd.f32 %v1376_v26, %v1323_v25  ;;  %v1704_v25 = vpop.permute.xlu0 %1703 }
 0x3fc   : > { %v1421_v30 = vpop.f32.mrb[4].mxu1  ;;  %v1474_v31 = vpop.f32.mrb[12].mxu0 }
 0x3fd   : > { %v1422_v16 = vadd.f32 %v1421_v30, %v1262_v55  ;;  %v1475_v33 = vadd.f32 %v1474_v31, %v1262_v55  ;;  %v1918_v15 = vpop.f32.mrb[5].mxu1  ;;  %v1932_v34 = vpop.f32.mrb[13].mxu0 }
 0x3fe   : > { %v1424_v35 = vpop.f32.mrb[6].mxu1  ;;  %v1477_v38 = vpop.f32.mrb[14].mxu0 }
 0x3ff   : > { %v1428_v39 = vmax.f32 %v1422_v16, 0.0  ;;  %v1425_v40 = vadd.f32 %v1424_v35, %v2766_v14  ;;  %v1478_v43 = vadd.f32 %v1477_v38, %v2766_v14  ;;  %v1919_v44 = vpop.f32.mrb[7].mxu1  ;;  %v1933_v45 = vpop.f32.mrb[15].mxu0  ;;  %v1481_v48 = vmax.f32 %v1475_v33, 0.0 }
 0x401   : > { %v1430_v47 = vadd.f32 %v1428_v39, %v1377_v49  ;;  %v1429_v36 = vmax.f32 %v1425_v40, 0.0  ;;  %v1482_v50 = vmax.f32 %v1478_v43, 0.0 }
 0x403   : > { %v1483_v41 = vadd.f32 %v1481_v48, %v1430_v47  ;;  %v1431_v19 = vadd.f32 %v1429_v36, %v1378_v18  ;;  %v1709_v18 = vpop.permute.xlu1 %1708 }
 0x405   : > { %v1484_v17 = vadd.f32 %v1482_v50, %v1431_v19 }
 0x41c   : > { %v1527_v51 = vpop.f32.mrb[8].mxu1  ;;  %v1580_v52 = vpop.f32.mrb[16].mxu0 }
 0x41d   : > { %v1528_v54 = vadd.f32 %v1527_v51, %v1262_v55  ;;  %v1581_v58 = vadd.f32 %v1580_v52, %v1262_v55  ;;  %v1946_v56 = vpop.f32.mrb[9].mxu1  ;;  %v1960_v46 = vpop.f32.mrb[17].mxu0 }
 0x41e   : > { %v1530_v53 = vpop.f32.mrb[10].mxu1  ;;  %v1583_v20 = vpop.f32.mrb[18].mxu0 }
 0x41f   : > { %v1534_v57 = vmax.f32 %v1528_v54, 0.0  ;;  %v1531_v59 = vadd.f32 %v1530_v53, %v2766_v14  ;;  %v1584_v60 = vadd.f32 %v1583_v20, %v2766_v14  ;;  %v1947_v61 = vpop.f32.mrb[11].mxu1  ;;  %v1961_v62 = vpop.f32.mrb[19].mxu0  ;;  %v1587_v1 = vmax.f32 %v1581_v58, 0.0 }
 0x421   : > { %v1536_v0 = vadd.f32 %v1534_v57, %v1483_v41  ;;  %v1535_v2 = vmax.f32 %v1531_v59, 0.0  ;;  %v1588_v7 = vmax.f32 %v1584_v60, 0.0 }
 0x423   : > { %v1589_v5 = vadd.f32 %v1587_v1, %v1536_v0  ;;  %v1537_v6 = vadd.f32 %v1535_v2, %v1484_v17 }
 0x425   : > { %v1590_v8 = vadd.f32 %v1588_v7, %v1537_v6 }
 0x43c   : > { %v1633_v3 = vpop.f32.mrb[12].mxu1  ;;  %v1686_v12 = vpop.f32.mrb[20].mxu0 }
 0x43d   : > { %v1634_v9 = vadd.f32 %v1633_v3, %v1262_v55  ;;  %v1687_v11 = vadd.f32 %v1686_v12, %v1262_v55  ;;  %v1974_v63 = vpop.f32.mrb[13].mxu1  ;;  %v1988_v4 = vpop.f32.mrb[21].mxu0 }
 0x43e   : > { %v1636_v10 = vpop.f32.mrb[14].mxu1  ;;  %v1689_v13 = vpop.f32.mrb[22].mxu0 }
 0x43f   : > { %v1640_v21 = vmax.f32 %v1634_v9, 0.0  ;;  %v1637_v27 = vadd.f32 %v1636_v10, %v2766_v14  ;;  %v1690_v32 = vadd.f32 %v1689_v13, %v2766_v14  ;;  %v1975_v37 = vpop.f32.mrb[15].mxu1  ;;  %v1989_v42 = vpop.f32.mrb[23].mxu0  ;;  %v1693_v24 = vmax.f32 %v1687_v11, 0.0 }
 0x441   : > { %v1642_v22 = vadd.f32 %v1640_v21, %v1589_v5  ;;  %v1641_v23 = vmax.f32 %v1637_v27, 0.0  ;;  %v1694_v49 = vmax.f32 %v1690_v32, 0.0 }
 0x443   : > { %v1695_v28 = vadd.f32 %v1693_v24, %v1642_v22  ;;  %v1643_v29 = vadd.f32 %v1641_v23, %v1590_v8 }
 0x445   : > { %v1711_v55 = vmul.f32 %v1704_v25, %v1695_v28  ;;  %v1696_v26 = vadd.f32 %v1694_v49, %v1643_v29 }
 0x447   : > { %1713 = vst.msk [vmem:[%s325_s11] sm:$0xff] %vm483_vm1, %v1711_v55  ;;  %v1712_v14 = vmul.f32 %v1709_v18, %v1696_v26 }
 0x449   : > { %1714 = vst.msk [vmem:[%s325_s11 + $0x8] sm:$0xff] %vm483_vm1, %v1712_v14 }
 0x44a PF: > { %s18_s27 = sadd.s32 1, %s2078_s27  }
 0x44b   : > { %p15_p4 = scmp.ge.s32.totalorder %s18_s27, 4  }
 0x44d   :  { %17 = sbr.rel (!%p15_p4) target bundleno = 1 (0x1), region = 85 }

</bundles_post_ra>
